<compile_context>
chip_gen: v5e
topology: v5e:2x2
jax: 0.10.0
libtpu: 0.0.40
codegen_flags: <defaults>
</compile_context>

<pallas_src>
import jax
import jax.numpy as jnp
import numpy as np
from jax.experimental import pallas as pl
from jax.experimental.pallas import tpu as pltpu

EPS = 1e-5


# --------------------------------------------------------------------------- #
# Small helpers
# --------------------------------------------------------------------------- #
def _vmem_capacity_bytes():
    """Physical VMEM of the attached chip (64 MiB v7x-safe fallback)."""
    try:
        return int(pltpu.get_tpu_info().vmem_capacity_bytes)
    except Exception:
        return 64 << 20


def _mosaic_params(block_bytes, scratch_bytes):
    """Per-call compiler params: batch-parallel grid + chip-aware VMEM budget."""
    cap = _vmem_capacity_bytes()
    # 2x on blocks: Pallas double-buffers every pipelined BlockSpec.
    need = 2 * int(block_bytes) + int(scratch_bytes) + (2 << 20)
    limit = int(max(16 << 20, min(need, (cap * 7) // 8)))
    return pltpu.CompilerParams(dimension_semantics=("parallel",),
                                vmem_limit_bytes=limit)


def _stripe_spec(shape):
    """Block one batch stripe: (1, *shape[1:]) at block index (n, 0, ...)."""
    nd = len(shape)
    return pl.BlockSpec((1,) + tuple(shape[1:]),
                        lambda n: (n,) + (0,) * (nd - 1))


def _whole_spec(shape):
    """Whole array resident in VMEM (weights, per-channel scale/shift)."""
    nd = len(shape)
    return pl.BlockSpec(tuple(shape), lambda n: (0,) * nd)


# --------------------------------------------------------------------------- #
# In-kernel building blocks
# --------------------------------------------------------------------------- #
def _write_padded(pad_ref, val, h, w, p):
    """Halo-only zeroing + one interior copy into an (h+2p, w+2p, C) scratch."""
    c = val.shape[-1]
    wp = w + 2 * p
    dt = pad_ref.dtype
    zrow = jnp.zeros((p, wp, c), dt)
    zcol = jnp.zeros((h, p, c), dt)
    pad_ref[:p, :, :] = zrow
    pad_ref[p + h:, :, :] = zrow
    pad_ref[p:p + h, :p, :] = zcol
    pad_ref[p:p + h, p + w:, :] = zcol
    pad_ref[p:p + h, p:p + w, :] = val


def _im2col(pad_val, slab_ref, ho, wo, c, s, d):
    """Write the (ho*wo, 9*c) im2col slab so the conv is ONE K=9*c MXU matmul."""
    for kh in range(3):
        for kw in range(3):
            t = kh * 3 + kw
            h0, w0 = kh * d, kw * d
            if s == 1:
                patch = jax.lax.slice(pad_val, (h0, w0, 0),
                                      (h0 + ho, w0 + wo, c))
            else:
                # TODO(synk): strided conv1 path (stride>1) keeps the in-kernel
                # strided slice of the previous revision; a space-to-batch
                # pre-split in the wrapper would avoid the sublane gather.
                patch = jax.lax.slice(
                    pad_val, (h0, w0, 0),
                    (h0 + (ho - 1) * s + 1, w0 + (wo - 1) * s + 1, c),
                    (s, s, 1))
            # TODO(synk): the per-tap reshape is a sublane relayout; a
            # shifted-row (flat padded buffer) conv formulation would remove it.
            # TODO(synk): with C not a multiple of 128 this column store is
            # masked; pad channels (and the matching weight K rows) to 128 for
            # real ResNet stages.
            slab_ref[:, t * c:(t + 1) * c] = patch.reshape(ho * wo, c)


def _write_partial_stats(sum_ref, sq_ref, acc):
    """Per-stripe partial BatchNorm statistics (sum, sum of squares), f32."""
    sum_ref[0] = jnp.sum(acc, axis=0, keepdims=True)
    sq_ref[0] = jnp.sum(acc * acc, axis=0, keepdims=True)


# --------------------------------------------------------------------------- #
# Kernels (one batch stripe per grid step)
# --------------------------------------------------------------------------- #
def _make_conv1_kernel(H, W, Cin, Ho, Wo, stride, dilation, pad):
    def kernel(x_ref, w1_ref, y1_ref, s1_ref, q1_ref, pad_scr, slab_scr):
        xv = x_ref[0].astype(pad_scr.dtype)          # single cast to MXU dtype
        _write_padded(pad_scr, xv, H, W, pad)
        _im2col(pad_scr[...], slab_scr, Ho, Wo, Cin, stride, dilation)
        acc = jnp.dot(slab_scr[...], w1_ref[...],
                      preferred_element_type=jnp.float32)   # (Ho*Wo, Cmid) f32
        y1_ref[0] = acc
        _write_partial_stats(s1_ref, q1_ref, acc)
    return kernel


def _make_conv2_kernel(Ho, Wo, Cmid, dilation, pad, has_downsample):
    def kernel(*refs):
        if has_downsample:
            (y1_ref, sc1_ref, sh1_ref, w2_ref, xs_ref, wd_ref,
             y2_ref, s2_ref, q2_ref, r_ref, sd_ref, qd_ref,
             pad_scr, slab_scr) = refs
        else:
            (y1_ref, sc1_ref, sh1_ref, w2_ref,
             y2_ref, s2_ref, q2_ref, pad_scr, slab_scr) = refs

        # bn1 folded to a per-channel FMA, fused with ReLU (f32), one cast.
        o1 = jnp.maximum(y1_ref[0] * sc1_ref[...] + sh1_ref[...], 0.0)
        o1 = o1.reshape(Ho, Wo, Cmid).astype(pad_scr.dtype)

        _write_padded(pad_scr, o1, Ho, Wo, pad)
        _im2col(pad_scr[...], slab_scr, Ho, Wo, Cmid, 1, dilation)
        acc2 = jnp.dot(slab_scr[...], w2_ref[...],
                       preferred_element_type=jnp.float32)
        y2_ref[0] = acc2
        _write_partial_stats(s2_ref, q2_ref, acc2)

        if has_downsample:
            # 1x1 downsample conv on the (wrapper-strided) residual input.
            racc = jnp.dot(xs_ref[0].astype(wd_ref.dtype), wd_ref[...],
                           preferred_element_type=jnp.float32)
            r_ref[0] = racc
            _write_partial_stats(sd_ref, qd_ref, racc)
    return kernel


def _make_epilogue_kernel(has_downsample):
    def kernel(*refs):
        if has_downsample:
            y2_ref, sc2_ref, sh2_ref, r_ref, scd_ref, shd_ref, out_ref = refs
            res = r_ref[0] * scd_ref[...] + shd_ref[...]
        else:
            y2_ref, sc2_ref, sh2_ref, x_ref, out_ref = refs
            res = x_ref[0]
        # bn2 FMA + residual add + final ReLU in one elementwise pass.
        out_ref[0] = jnp.maximum(
            y2_ref[0] * sc2_ref[...] + sh2_ref[...] + res, 0.0)
    return kernel


# --------------------------------------------------------------------------- #
# Cross-stripe BN reduction (tiny per-channel math; runs as XLA between calls)
# --------------------------------------------------------------------------- #
def _bn_scale_shift(sums, sqs, gamma, beta, count):
    """Fold training-mode BatchNorm to per-channel scale/shift from per-stripe
    partial sums (biased variance, clamped >= 0 so rsqrt never sees negatives)."""
    total = jnp.sum(sums, axis=(0, 1))
    total_sq = jnp.sum(sqs, axis=(0, 1))
    mean = total / count
    var = jnp.maximum(total_sq / count - mean * mean, 0.0)
    scale = gamma.reshape(-1) * jax.lax.rsqrt(var + EPS)
    shift = beta.reshape(-1) - mean * scale
    return scale.reshape(1, -1), shift.reshape(1, -1)


# --------------------------------------------------------------------------- #
# Forward wrapper
# --------------------------------------------------------------------------- #
def basic_block_forward(x_nchw, params, stride=1, dilation=1,
                        compute_dtype=jnp.bfloat16):
    """PyTorch-equivalent BasicBlock forward. x_nchw: (N, Cin, H, W) float32.

    compute_dtype sets the MXU operand dtype (bfloat16 by default, the fast
    path on v5e/v6e/v7x); accumulation, BatchNorm statistics and all
    elementwise math stay float32.  Pass jnp.float32 for tight comparisons.
    """
    x = jnp.transpose(x_nchw, (0, 2, 3, 1)).astype(jnp.float32)    # -> NHWC
    N, H, W, Cin = x.shape
    Cmid = params['w1'].shape[-1]
    Cout = Cmid                                                    # expansion=1
    has_ds = 'wd' in params
    assert has_ds == (stride != 1 or Cin != Cout), \
        "downsample params must be present iff stride != 1 or Cin != Cout"

    p = dilation
    d = dilation
    s = stride
    Ho = (H + 2 * p - 2 * d - 1) // s + 1
    Wo = (W + 2 * p - 2 * d - 1) // s + 1
    P1 = Ho * Wo                              # pixels per batch stripe
    f32 = jnp.float32
    cd = compute_dtype
    cdi = np.dtype(cd).itemsize

    w1 = params['w1'].reshape(9 * Cin, Cmid).astype(cd)
    w2 = params['w2'].reshape(9 * Cmid, Cout).astype(cd)

    # ---------------- pass 1: conv1 + partial bn1 statistics ----------------
    pad1_shape = (H + 2 * p, W + 2 * p, Cin)
    slab1_shape = (P1, 9 * Cin)
    blk_a = (H * W * Cin * 4 + 9 * Cin * Cmid * cdi
             + P1 * Cmid * 4 + 2 * Cmid * 4)
    scr_a = (int(np.prod(pad1_shape)) + int(np.prod(slab1_shape))) * cdi
    cost_a = pl.CostEstimate(
        flops=int(2 * N * P1 * 9 * Cin * Cmid + 3 * N * P1 * Cmid),
        transcendentals=0,
        bytes_accessed=int(N * (blk_a + 2 * scr_a)))       # incl. slab traffic
    y1, s1, q1 = pl.pallas_call(
        _make_conv1_kernel(H, W, Cin, Ho, Wo, s, d, p),
        out_shape=(jax.ShapeDtypeStruct((N, P1, Cmid), f32),
                   jax.ShapeDtypeStruct((N, 1, Cmid), f32),
                   jax.ShapeDtypeStruct((N, 1, Cmid), f32)),
        grid_spec=pltpu.PrefetchScalarGridSpec(
            num_scalar_prefetch=0, grid=(N,),
            in_specs=[_stripe_spec((N, H, W, Cin)),
                      _whole_spec((9 * Cin, Cmid))],
            out_specs=(_stripe_spec((N, P1, Cmid)),
                       _stripe_spec((N, 1, Cmid)),
                       _stripe_spec((N, 1, Cmid))),
            scratch_shapes=[pltpu.VMEM(pad1_shape, cd),
                            pltpu.VMEM(slab1_shape, cd)]),
        compiler_params=_mosaic_params(blk_a, scr_a),
        cost_estimate=cost_a,
    )(x, w1)
    scale1, shift1 = _bn_scale_shift(s1, q1, params['g1'], params['b1'], N * P1)

    # -------- pass 2: bn1+relu, conv2, 1x1 downsample, partial stats ---------
    pad2_shape = (Ho + 2 * p, Wo + 2 * p, Cmid)
    slab2_shape = (P1, 9 * Cmid)
    in_b = [y1, scale1, shift1, w2]
    in_specs_b = [_stripe_spec((N, P1, Cmid)), _whole_spec((1, Cmid)),
                  _whole_spec((1, Cmid)), _whole_spec((9 * Cmid, Cout))]
    out_shape_b = [jax.ShapeDtypeStruct((N, P1, Cout), f32),
                   jax.ShapeDtypeStruct((N, 1, Cout), f32),
                   jax.ShapeDtypeStruct((N, 1, Cout), f32)]
    out_specs_b = [_stripe_spec((N, P1, Cout)), _stripe_spec((N, 1, Cout)),
                   _stripe_spec((N, 1, Cout))]
    blk_b = (P1 * Cmid * 4 + 4 * Cmid * 4 + 9 * Cmid * Cout * cdi
             + P1 * Cout * 4 + 2 * Cout * 4)
    flops_b = 2 * N * P1 * 9 * Cmid * Cout + 7 * N * P1 * Cmid
    if has_ds:
        # Residual striding is a free HBM-side slice here, not an in-kernel
        # relayout.
        xs = x if s == 1 else x[:, ::s, ::s, :]
        xs = xs.reshape(N, P1, Cin)
        wd = params['wd'].astype(cd)
        in_b += [xs, wd]
        in_specs_b += [_stripe_spec((N, P1, Cin)), _whole_spec((Cin, Cout))]
        out_shape_b += [jax.ShapeDtypeStruct((N, P1, Cout), f32),
                        jax.ShapeDtypeStruct((N, 1, Cout), f32),
                        jax.ShapeDtypeStruct((N, 1, Cout), f32)]
        out_specs_b += [_stripe_spec((N, P1, Cout)),
                        _stripe_spec((N, 1, Cout)),
                        _stripe_spec((N, 1, Cout))]
        blk_b += P1 * Cin * 4 + Cin * Cout * cdi + P1 * Cout * 4 + 2 * Cout * 4
        flops_b += 2 * N * P1 * Cin * Cout + 3 * N * P1 * Cout
    scr_b = (int(np.prod(pad2_shape)) + int(np.prod(slab2_shape))) * cdi
    cost_b = pl.CostEstimate(flops=int(flops_b), transcendentals=0,
                             bytes_accessed=int(N * (blk_b + 2 * scr_b)))
    res_b = pl.pallas_call(
        _make_conv2_kernel(Ho, Wo, Cmid, d, p, has_ds),
        out_shape=tuple(out_shape_b),
        grid_spec=pltpu.PrefetchScalarGridSpec(
            num_scalar_prefetch=0, grid=(N,),
            in_specs=in_specs_b, out_specs=tuple(out_specs_b),
            scratch_shapes=[pltpu.VMEM(pad2_shape, cd),
                            pltpu.VMEM(slab2_shape, cd)]),
        compiler_params=_mosaic_params(blk_b, scr_b),
        cost_estimate=cost_b,
    )(*in_b)
    if has_ds:
        y2, s2, q2, racc, sd, qd = res_b
    else:
        y2, s2, q2 = res_b
    scale2, shift2 = _bn_scale_shift(s2, q2, params['g2'], params['b2'], N * P1)

    # -------- pass 3: bn2 + (bn_d) residual + final relu (elementwise) -------
    if has_ds:
        scaled, shiftd = _bn_scale_shift(sd, qd, params['gd'], params['bd'],
                                         N * P1)
        in_c = [y2, scale2, shift2, racc, scaled, shiftd]
        in_specs_c = [_stripe_spec((N, P1, Cout)), _whole_spec((1, Cout)),
                      _whole_spec((1, Cout)), _stripe_spec((N, P1, Cout)),
                      _whole_spec((1, Cout)), _whole_spec((1, Cout))]
    else:
        in_c = [y2, scale2, shift2, x.reshape(N, P1, Cin)]
        in_specs_c = [_stripe_spec((N, P1, Cout)), _whole_spec((1, Cout)),
                      _whole_spec((1, Cout)), _stripe_spec((N, P1, Cin))]
    blk_c = 3 * P1 * Cout * 4
    cost_c = pl.CostEstimate(flops=int(8 * N * P1 * Cout), transcendentals=0,
                             bytes_accessed=int(N * blk_c))
    out_flat = pl.pallas_call(
        _make_epilogue_kernel(has_ds),
        out_shape=jax.ShapeDtypeStruct((N, P1, Cout), f32),
        grid_spec=pltpu.PrefetchScalarGridSpec(
            num_scalar_prefetch=0, grid=(N,),
            in_specs=in_specs_c,
            out_specs=_stripe_spec((N, P1, Cout))),
        compiler_params=_mosaic_params(blk_c, 0),
        cost_estimate=cost_c,
    )(*in_c)

    out = out_flat.reshape(N, Ho, Wo, Cout)
    # TODO(synk): keep NHWC across blocks and transpose only at network
    # boundaries; NCHW is emitted here purely for PyTorch parity.
    return jnp.transpose(out, (0, 3, 1, 2))


# --------------------------------------------------------------------------- #
# Parameters and pure-JAX reference
# --------------------------------------------------------------------------- #
def init_params(in_channels, channels, stride, key):
    """Deterministic synthetic parameters matching BasicBlock.__init__ shapes."""
    out_channels = channels  # expansion = 1
    ks = jax.random.split(key, 9)
    p = {
        'w1': 0.1 * jax.random.normal(ks[0], (3, 3, in_channels, channels), jnp.float32),
        'g1': 1.0 + 0.1 * jax.random.normal(ks[1], (1, channels), jnp.float32),
        'b1': 0.1 * jax.random.normal(ks[2], (1, channels), jnp.float32),
        'w2': 0.1 * jax.random.normal(ks[3], (3, 3, channels, channels), jnp.float32),
        'g2': 1.0 + 0.1 * jax.random.normal(ks[4], (1, channels), jnp.float32),
        'b2': 0.1 * jax.random.normal(ks[5], (1, channels), jnp.float32),
    }
    if stride != 1 or in_channels != out_channels:
        p['wd'] = 0.1 * jax.random.normal(ks[6], (in_channels, out_channels), jnp.float32)
        p['gd'] = 1.0 + 0.1 * jax.random.normal(ks[7], (1, out_channels), jnp.float32)
        p['bd'] = 0.1 * jax.random.normal(ks[8], (1, out_channels), jnp.float32)
    return p


def ref_forward(x_nchw, params, stride=1, dilation=1):
    """Pure-JAX reference (same math as the PyTorch module, training-mode BN)."""
    x = jnp.transpose(x_nchw, (0, 2, 3, 1)).astype(jnp.float32)

    def conv3x3(y, w, s, d):
        return jax.lax.conv_general_dilated(
            y, w, window_strides=(s, s), padding=[(d, d), (d, d)],
            rhs_dilation=(d, d), dimension_numbers=('NHWC', 'HWIO', 'NHWC'))

    def bn(y, g, b):
        m = jnp.mean(y, axis=(0, 1, 2), keepdims=True)
        v = jnp.mean(jnp.square(y - m), axis=(0, 1, 2), keepdims=True)
        return (y - m) * jax.lax.rsqrt(v + EPS) * g + b

    out = jax.nn.relu(bn(conv3x3(x, params['w1'], stride, dilation),
                         params['g1'], params['b1']))
    out = bn(conv3x3(out, params['w2'], 1, dilation), params['g2'], params['b2'])
    if 'wd' in params:
        xs = x[:, ::stride, ::stride, :]
        res = bn(jnp.einsum('nhwc,co->nhwo', xs, params['wd']),
                 params['gd'], params['bd'])
    else:
        res = x
    return jnp.transpose(jax.nn.relu(out + res), (0, 3, 1, 2))


if __name__ == "__main__":
    key = jax.random.PRNGKey(0)
    kx, kp, kp2 = jax.random.split(key, 3)

    # Config A: channel expansion -> exercises the 1x1-conv+BN downsample branch.
    N, Cin, H, W = 2, 4, 16, 16
    channels, stride, dilation = 8, 1, 1
    x = jax.random.normal(kx, (N, Cin, H, W), jnp.float32)
    params = init_params(Cin, channels, stride, kp)
    ref = ref_forward(x, params, stride, dilation)

    out_f32 = jax.block_until_ready(
        basic_block_forward(x, params, stride, dilation,
                            compute_dtype=jnp.float32))
    assert out_f32.shape == (N, channels, H, W), out_f32.shape
    np.testing.assert_allclose(np.asarray(out_f32), np.asarray(ref),
                               atol=2e-4, rtol=2e-4)

    # Default path: bf16 MXU operands (v5e/v6e/v7x fast path); BN math stays
    # f32 but statistics come from bf16-precision matmul outputs, hence the
    # loose tolerance.
    out_bf16 = jax.block_until_ready(
        basic_block_forward(x, params, stride, dilation))
    np.testing.assert_allclose(np.asarray(out_bf16), np.asarray(ref),
                               atol=0.3, rtol=0.1)

    # Config B: identity residual path (Cin == Cout, stride 1, no downsample).
    params_id = init_params(channels, channels, 1, kp2)
    x2 = jax.random.normal(kx, (N, channels, H, W), jnp.float32)
    out2 = jax.block_until_ready(
        basic_block_forward(x2, params_id, 1, 1, compute_dtype=jnp.float32))
    ref2 = ref_forward(x2, params_id, 1, 1)
    np.testing.assert_allclose(np.asarray(out2), np.asarray(ref2),
                               atol=2e-4, rtol=2e-4)

    print("KERNEL_OK")
</pallas_src>

<mosaic_0001>
module attributes {stable_mosaic.version = 11 : i64} {
  func.func @kernel(%arg0: i32, %arg1: memref<1x16x16x4xf32, #tpu.memory_space<vmem>>, %arg2: memref<36x8xf32, #tpu.memory_space<vmem>>, %arg3: memref<1x256x8xf32, #tpu.memory_space<vmem>>, %arg4: memref<1x1x8xf32, #tpu.memory_space<vmem>>, %arg5: memref<1x1x8xf32, #tpu.memory_space<vmem>>, %arg6: memref<18x18x4xf32, #tpu.memory_space<vmem>>, %arg7: memref<256x36xf32, #tpu.memory_space<vmem>>) attributes {dimension_semantics = [#tpu.dimension_semantics<parallel>], iteration_bounds = array<i64: 2>, scalar_prefetch = 0 : i64, scratch_operands = 2 : i64, tpu.core_type = #tpu.core_type<tc>, window_params = [{transform_indices = @transform_0, window_bounds = array<i64: 1, 16, 16, 4>}, {pipeline_mode = #tpu.pipeline_mode<synchronous>, transform_indices = @transform_1, window_bounds = array<i64: 36, 8>}, {transform_indices = @transform_2, window_bounds = array<i64: 1, 256, 8>}, {transform_indices = @transform_3, window_bounds = array<i64: 1, 1, 8>}, {transform_indices = @transform_4, window_bounds = array<i64: 1, 1, 8>}]} {
    %c0 = arith.constant 0 : index
    %c0_0 = arith.constant 0 : index
    %c0_1 = arith.constant 0 : index
    %c0_2 = arith.constant 0 : index
    %0 = vector.load %arg1[%c0, %c0_0, %c0_1, %c0_2] : memref<1x16x16x4xf32, #tpu.memory_space<vmem>>, vector<1x16x16x4xf32>
    %1 = vector.shape_cast %0 : vector<1x16x16x4xf32> to vector<16x16x4xf32>
    %cst = arith.constant 0.000000e+00 : f32
    %2 = vector.broadcast %cst : f32 to vector<1x18x4xf32>
    %cst_3 = arith.constant 0.000000e+00 : f32
    %3 = vector.broadcast %cst_3 : f32 to vector<16x1x4xf32>
    %c0_4 = arith.constant 0 : index
    %c0_5 = arith.constant 0 : index
    %c0_6 = arith.constant 0 : index
    %4 = vector.load %arg6[%c0_4, %c0_5, %c0_6] : memref<18x18x4xf32, #tpu.memory_space<vmem>>, vector<1x18x4xf32>
    tpu.vector_store %arg6[%c0_4, %c0_5, %c0_6], %2 {strides = array<i32>} : memref<18x18x4xf32, #tpu.memory_space<vmem>>, vector<1x18x4xf32>,
    %c17 = arith.constant 17 : index
    %c0_7 = arith.constant 0 : index
    %c0_8 = arith.constant 0 : index
    %5 = vector.load %arg6[%c17, %c0_7, %c0_8] : memref<18x18x4xf32, #tpu.memory_space<vmem>>, vector<1x18x4xf32>
    tpu.vector_store %arg6[%c17, %c0_7, %c0_8], %2 {strides = array<i32>} : memref<18x18x4xf32, #tpu.memory_space<vmem>>, vector<1x18x4xf32>,
    %c1 = arith.constant 1 : index
    %c0_9 = arith.constant 0 : index
    %c0_10 = arith.constant 0 : index
    %6 = vector.load %arg6[%c1, %c0_9, %c0_10] : memref<18x18x4xf32, #tpu.memory_space<vmem>>, vector<16x1x4xf32>
    tpu.vector_store %arg6[%c1, %c0_9, %c0_10], %3 {strides = array<i32>} : memref<18x18x4xf32, #tpu.memory_space<vmem>>, vector<16x1x4xf32>,
    %c1_11 = arith.constant 1 : index
    %c17_12 = arith.constant 17 : index
    %c0_13 = arith.constant 0 : index
    %7 = vector.load %arg6[%c1_11, %c17_12, %c0_13] : memref<18x18x4xf32, #tpu.memory_space<vmem>>, vector<16x1x4xf32>
    tpu.vector_store %arg6[%c1_11, %c17_12, %c0_13], %3 {strides = array<i32>} : memref<18x18x4xf32, #tpu.memory_space<vmem>>, vector<16x1x4xf32>,
    %c1_14 = arith.constant 1 : index
    %c1_15 = arith.constant 1 : index
    %c0_16 = arith.constant 0 : index
    %8 = vector.load %arg6[%c1_14, %c1_15, %c0_16] : memref<18x18x4xf32, #tpu.memory_space<vmem>>, vector<16x16x4xf32>
    tpu.vector_store %arg6[%c1_14, %c1_15, %c0_16], %1 {strides = array<i32>} : memref<18x18x4xf32, #tpu.memory_space<vmem>>, vector<16x16x4xf32>,
    %c0_17 = arith.constant 0 : index
    %c0_18 = arith.constant 0 : index
    %c0_19 = arith.constant 0 : index
    %9 = vector.load %arg6[%c0_17, %c0_18, %c0_19] : memref<18x18x4xf32, #tpu.memory_space<vmem>>, vector<18x18x4xf32>
    %10 = vector.extract_strided_slice %9 {offsets = [0, 0, 0], sizes = [16, 16, 4], strides = [1, 1, 1]} : vector<18x18x4xf32> to vector<16x16x4xf32>
    %11 = vector.shape_cast %10 : vector<16x16x4xf32> to vector<256x4xf32>
    %c0_20 = arith.constant 0 : index
    %c0_21 = arith.constant 0 : index
    %12 = vector.load %arg7[%c0_20, %c0_21] : memref<256x36xf32, #tpu.memory_space<vmem>>, vector<256x4xf32>
    tpu.vector_store %arg7[%c0_20, %c0_21], %11 {strides = array<i32>} : memref<256x36xf32, #tpu.memory_space<vmem>>, vector<256x4xf32>,
    %13 = vector.extract_strided_slice %9 {offsets = [0, 1, 0], sizes = [16, 16, 4], strides = [1, 1, 1]} : vector<18x18x4xf32> to vector<16x16x4xf32>
    %14 = vector.shape_cast %13 : vector<16x16x4xf32> to vector<256x4xf32>
    %c0_22 = arith.constant 0 : index
    %c4 = arith.constant 4 : index
    %15 = vector.load %arg7[%c0_22, %c4] : memref<256x36xf32, #tpu.memory_space<vmem>>, vector<256x4xf32>
    tpu.vector_store %arg7[%c0_22, %c4], %14 {strides = array<i32>} : memref<256x36xf32, #tpu.memory_space<vmem>>, vector<256x4xf32>,
    %16 = vector.extract_strided_slice %9 {offsets = [0, 2, 0], sizes = [16, 16, 4], strides = [1, 1, 1]} : vector<18x18x4xf32> to vector<16x16x4xf32>
    %17 = vector.shape_cast %16 : vector<16x16x4xf32> to vector<256x4xf32>
    %c0_23 = arith.constant 0 : index
    %c8 = arith.constant 8 : index
    %18 = vector.load %arg7[%c0_23, %c8] : memref<256x36xf32, #tpu.memory_space<vmem>>, vector<256x4xf32>
    tpu.vector_store %arg7[%c0_23, %c8], %17 {strides = array<i32>} : memref<256x36xf32, #tpu.memory_space<vmem>>, vector<256x4xf32>,
    %19 = vector.extract_strided_slice %9 {offsets = [1, 0, 0], sizes = [16, 16, 4], strides = [1, 1, 1]} : vector<18x18x4xf32> to vector<16x16x4xf32>
    %20 = vector.shape_cast %19 : vector<16x16x4xf32> to vector<256x4xf32>
    %c0_24 = arith.constant 0 : index
    %c12 = arith.constant 12 : index
    %21 = vector.load %arg7[%c0_24, %c12] : memref<256x36xf32, #tpu.memory_space<vmem>>, vector<256x4xf32>
    tpu.vector_store %arg7[%c0_24, %c12], %20 {strides = array<i32>} : memref<256x36xf32, #tpu.memory_space<vmem>>, vector<256x4xf32>,
    %22 = vector.extract_strided_slice %9 {offsets = [1, 1, 0], sizes = [16, 16, 4], strides = [1, 1, 1]} : vector<18x18x4xf32> to vector<16x16x4xf32>
    %23 = vector.shape_cast %22 : vector<16x16x4xf32> to vector<256x4xf32>
    %c0_25 = arith.constant 0 : index
    %c16 = arith.constant 16 : index
    %24 = vector.load %arg7[%c0_25, %c16] : memref<256x36xf32, #tpu.memory_space<vmem>>, vector<256x4xf32>
    tpu.vector_store %arg7[%c0_25, %c16], %23 {strides = array<i32>} : memref<256x36xf32, #tpu.memory_space<vmem>>, vector<256x4xf32>,
    %25 = vector.extract_strided_slice %9 {offsets = [1, 2, 0], sizes = [16, 16, 4], strides = [1, 1, 1]} : vector<18x18x4xf32> to vector<16x16x4xf32>
    %26 = vector.shape_cast %25 : vector<16x16x4xf32> to vector<256x4xf32>
    %c0_26 = arith.constant 0 : index
    %c20 = arith.constant 20 : index
    %27 = vector.load %arg7[%c0_26, %c20] : memref<256x36xf32, #tpu.memory_space<vmem>>, vector<256x4xf32>
    tpu.vector_store %arg7[%c0_26, %c20], %26 {strides = array<i32>} : memref<256x36xf32, #tpu.memory_space<vmem>>, vector<256x4xf32>,
    %28 = vector.extract_strided_slice %9 {offsets = [2, 0, 0], sizes = [16, 16, 4], strides = [1, 1, 1]} : vector<18x18x4xf32> to vector<16x16x4xf32>
    %29 = vector.shape_cast %28 : vector<16x16x4xf32> to vector<256x4xf32>
    %c0_27 = arith.constant 0 : index
    %c24 = arith.constant 24 : index
    %30 = vector.load %arg7[%c0_27, %c24] : memref<256x36xf32, #tpu.memory_space<vmem>>, vector<256x4xf32>
    tpu.vector_store %arg7[%c0_27, %c24], %29 {strides = array<i32>} : memref<256x36xf32, #tpu.memory_space<vmem>>, vector<256x4xf32>,
    %31 = vector.extract_strided_slice %9 {offsets = [2, 1, 0], sizes = [16, 16, 4], strides = [1, 1, 1]} : vector<18x18x4xf32> to vector<16x16x4xf32>
    %32 = vector.shape_cast %31 : vector<16x16x4xf32> to vector<256x4xf32>
    %c0_28 = arith.constant 0 : index
    %c28 = arith.constant 28 : index
    %33 = vector.load %arg7[%c0_28, %c28] : memref<256x36xf32, #tpu.memory_space<vmem>>, vector<256x4xf32>
    tpu.vector_store %arg7[%c0_28, %c28], %32 {strides = array<i32>} : memref<256x36xf32, #tpu.memory_space<vmem>>, vector<256x4xf32>,
    %34 = vector.extract_strided_slice %9 {offsets = [2, 2, 0], sizes = [16, 16, 4], strides = [1, 1, 1]} : vector<18x18x4xf32> to vector<16x16x4xf32>
    %35 = vector.shape_cast %34 : vector<16x16x4xf32> to vector<256x4xf32>
    %c0_29 = arith.constant 0 : index
    %c32 = arith.constant 32 : index
    %36 = vector.load %arg7[%c0_29, %c32] : memref<256x36xf32, #tpu.memory_space<vmem>>, vector<256x4xf32>
    tpu.vector_store %arg7[%c0_29, %c32], %35 {strides = array<i32>} : memref<256x36xf32, #tpu.memory_space<vmem>>, vector<256x4xf32>,
    %c0_30 = arith.constant 0 : index
    %c0_31 = arith.constant 0 : index
    %37 = vector.load %arg7[%c0_30, %c0_31] : memref<256x36xf32, #tpu.memory_space<vmem>>, vector<256x36xf32>
    %c0_32 = arith.constant 0 : index
    %c0_33 = arith.constant 0 : index
    %38 = vector.load %arg2[%c0_32, %c0_33] : memref<36x8xf32, #tpu.memory_space<vmem>>, vector<36x8xf32>
    %cst_34 = arith.constant dense<0.000000e+00> : vector<256x8xf32>
    %39 = tpu.matmul %37, %38, %cst_34 {dimension_numbers = #tpu.dot_dimension_numbers<[1], [0], [0], [1], [0, 0, 1, 1], [], []>} : vector<256x36xf32>, vector<36x8xf32>, vector<256x8xf32> -> vector<256x8xf32>
    %c0_35 = arith.constant 0 : index
    %c0_36 = arith.constant 0 : index
    %c0_37 = arith.constant 0 : index
    %40 = vector.load %arg3[%c0_35, %c0_36, %c0_37] : memref<1x256x8xf32, #tpu.memory_space<vmem>>, vector<1x256x8xf32>
    %41 = vector.shape_cast %40 : vector<1x256x8xf32> to vector<256x8xf32>
    %42 = vector.shape_cast %39 : vector<256x8xf32> to vector<1x256x8xf32>
    tpu.vector_store %arg3[%c0_35, %c0_36, %c0_37], %42 {strides = array<i32>} : memref<1x256x8xf32, #tpu.memory_space<vmem>>, vector<1x256x8xf32>,
    %cst_38 = arith.constant dense<0.000000e+00> : vector<8xf32>
    %43 = vector.multi_reduction <add>, %39, %cst_38 [0] : vector<256x8xf32> to vector<8xf32>
    %44 = vector.shape_cast %43 : vector<8xf32> to vector<1x8xf32>
    %c0_39 = arith.constant 0 : index
    %c0_40 = arith.constant 0 : index
    %c0_41 = arith.constant 0 : index
    %45 = vector.load %arg4[%c0_39, %c0_40, %c0_41] : memref<1x1x8xf32, #tpu.memory_space<vmem>>, vector<1x1x8xf32>
    %46 = vector.shape_cast %45 : vector<1x1x8xf32> to vector<1x8xf32>
    %47 = vector.shape_cast %44 : vector<1x8xf32> to vector<1x1x8xf32>
    tpu.vector_store %arg4[%c0_39, %c0_40, %c0_41], %47 {strides = array<i32>} : memref<1x1x8xf32, #tpu.memory_space<vmem>>, vector<1x1x8xf32>,
    %48 = arith.mulf %39, %39 : vector<256x8xf32>
    %cst_42 = arith.constant dense<0.000000e+00> : vector<8xf32>
    %49 = vector.multi_reduction <add>, %48, %cst_42 [0] : vector<256x8xf32> to vector<8xf32>
    %50 = vector.shape_cast %49 : vector<8xf32> to vector<1x8xf32>
    %c0_43 = arith.constant 0 : index
    %c0_44 = arith.constant 0 : index
    %c0_45 = arith.constant 0 : index
    %51 = vector.load %arg5[%c0_43, %c0_44, %c0_45] : memref<1x1x8xf32, #tpu.memory_space<vmem>>, vector<1x1x8xf32>
    %52 = vector.shape_cast %51 : vector<1x1x8xf32> to vector<1x8xf32>
    %53 = vector.shape_cast %50 : vector<1x8xf32> to vector<1x1x8xf32>
    tpu.vector_store %arg5[%c0_43, %c0_44, %c0_45], %53 {strides = array<i32>} : memref<1x1x8xf32, #tpu.memory_space<vmem>>, vector<1x1x8xf32>,
    return
  }
  func.func @transform_0(%arg0: i32) -> (i32, i32, i32, i32) {
    %c0_i32 = arith.constant 0 : i32
    %c0_i32_0 = arith.constant 0 : i32
    %c0_i32_1 = arith.constant 0 : i32
    %c0_i32_2 = arith.constant 0 : i32
    return %arg0, %c0_i32, %c0_i32_0, %c0_i32_1 : i32, i32, i32, i32
  }
  func.func @transform_1(%arg0: i32) -> (i32, i32) {
    %c0_i32 = arith.constant 0 : i32
    %c0_i32_0 = arith.constant 0 : i32
    %c0_i32_1 = arith.constant 0 : i32
    return %c0_i32, %c0_i32_0 : i32, i32
  }
  func.func @transform_2(%arg0: i32) -> (i32, i32, i32) {
    %c0_i32 = arith.constant 0 : i32
    %c0_i32_0 = arith.constant 0 : i32
    %c0_i32_1 = arith.constant 0 : i32
    return %arg0, %c0_i32, %c0_i32_0 : i32, i32, i32
  }
  func.func @transform_3(%arg0: i32) -> (i32, i32, i32) {
    %c0_i32 = arith.constant 0 : i32
    %c0_i32_0 = arith.constant 0 : i32
    %c0_i32_1 = arith.constant 0 : i32
    return %arg0, %c0_i32, %c0_i32_0 : i32, i32, i32
  }
  func.func @transform_4(%arg0: i32) -> (i32, i32, i32) {
    %c0_i32 = arith.constant 0 : i32
    %c0_i32_0 = arith.constant 0 : i32
    %c0_i32_1 = arith.constant 0 : i32
    return %arg0, %c0_i32, %c0_i32_0 : i32, i32, i32
  }
}

</mosaic_0001>

<bundles_post_ra>
// kernel: tpu_custom_call.1
= control target key start
LH: loop header
LB: loop body
LE: loop exit
PB: predicated region body
PF: predicated region fallthrough
CT: control target
= control target key end

     0   :  { %10 = vsyncpa [#allocation5], 0  ;;  %s4281_s0 = inlined_call_operand.vmem [shape: f32[2,16,16,4], index: 0, kind: input, shape index: {}]   ;;  %s4282_s1 = inlined_call_operand.vmem [shape: f32[36,8], index: 1, kind: input, shape index: {}]   ;;  %s4283_s2 = inlined_call_operand.vmem [shape: f32[2,256,8], index: 2, kind: output, shape index: {0}]   ;;  %s4284_s3 = inlined_call_operand.hbm [shape: f32[2,1,8], index: 3, kind: output, shape index: {1}]   ;;  %s4285_s4 = inlined_call_operand.hbm [shape: f32[2,1,8], index: 4, kind: output, shape index: {2}]  }
   0x1   :  { %12 = vsyncpa [#allocation5 + $0x1], 0 }
   0x2   :  { %13 = vsyncpa [#allocation7], 0 }
   0x3   :  { %15 = vsyncpa [#allocation7 + $0x1], 0  ;;  %s2524_s15 = smov 0   ;;  %s2526_s16 = smov 0  }
   0x4   :  { %s2528_s17 = smov 0   ;;  %s2530_s18 = smov 0  }
   0x5 LB: > { %s2545_s19 = sadd.s32 4294967295, %s2488_s18   ;;  %s2281_s20 = sadd.s32 4294967294, %s2488_s18   ;;  %s2488_s18 = sphi %s2530_s18, %s4497_s18   ;;  %s2484_s17 = sphi %s2528_s17, %s4496_s17   ;;  %s2480_s16 = sphi %s2526_s16, %s4495_s16   ;;  %s2476_s15 = sphi %s2524_s15, %s4494_s15  }
   0x6   : > { %s2549_s21 = sadd.s32 1, %s2488_s18   ;;  %s101_s22 = sadd.s32 1, %s2484_s17 }
   0x7   : > { %s98_s23 = ssub.s32 %s2488_s18, %s2549_s21  ;;  %p111_p0 = scmp.ne.s32.totalorder %s2484_s17, %s2480_s16 }
   0x8   : > { %p99_p1 = scmp.eq.s32.totalorder %s98_s23, 0  ;;  %p112_p2 = scmp.eq.s32.totalorder %s2545_s19, 1 }
   0x9   : > { %p117_p3 = scmp.ne.s32.totalorder %s2480_s16, %s2476_s15  ;;  %p118_p4 = scmp.eq.s32.totalorder %s2281_s20, 1 }
   0xa   : > { %s2560_s24 = scalar_select %p99_p1, %s2484_s17, %s101_s22  }
   0xb   : > { %p2562_p5 = por %p112_p2, %p111_p0  ;;  %p2566_p6 = por %p118_p4, %p117_p3 }
   0xc   : > { %p2284_p7 = scmp.ge.s32.totalorder %s2488_s18, 1  ;;  %p173_p8 = scmp.lt.s32.totalorder %s2488_s18, 3 }
   0xe   : > { %p174_p9 = pnand %p2284_p7, %p173_p8 }
  0x10   : > { %177 = sbr.rel (%p174_p9) target bundleno = 1044 (0x414), region = 28 }
  0x15   : > { %vm249_vm0 = vcmask 31744   ;;  %p207_p10 = scmp.lt.s32.totalorder %s2545_s19, 1  ;;  %v2490_v0 = vmov 0.0   ;;  %vm259_vm1 = vcmask 24576   ;;  %vm458_vm2 = vcmask 1046528   ;;  %s2491_s6 = smov 4  }
  0x16   : > { %250 = vst.msk [vmem:[#allocation2] sm:$0xff] %vm249_vm0, %v2490_v0  ;;  %vm252_vm3 = vcmask 25600   ;;  %vm668_vm4 = vcmask 1045504   ;;  %vm635_vm5 = vcmask 64544   ;;  %s2492_s7 = smov 8   ;;  %s2493_s8 = smov 12  }
  0x17   : > { %251 = vst.msk [vmem:[#allocation2 + $0x8] sm:$0xff] %vm249_vm0, %v2490_v0  ;;  %s2578_s27 = scalar_select %p207_p10, %s2545_s19, 1  ;;  %vm845_vm6 = vcmask 97344   ;;  %vm976_vm7 = vcmask 130144   ;;  %vm1111_vm8 = vcmask 162944   ;;  %vm1245_vm9 = vcmask 195744  }
  0x18   : > { %255 = vst.msk [vmem:[#allocation2 + $0x198] sm:$0xff] %vm249_vm0, %v2490_v0  ;;  %s2494_s9 = smov 16   ;;  %s2495_s10 = smov 20   ;;  %vm1812_vm10 = vcmask 1043456   ;;  %vm1376_vm11 = vcmask 228544   ;;  %vm1511_vm12 = vcmask 261344  }
  0x19   : > { %256 = vst.msk [vmem:[#allocation2 + $0x1a0] sm:$0xff] %vm249_vm0, %v2490_v0  ;;  %s2324_s28 = sshll.u32 %s2578_s27, 8  ;;  %s2496_s11 = smov 24   ;;  %vm1645_vm13 = vcmask 294144   ;;  %vm1715_vm14 = vcmask 293888   ;;  %vm1929_vm15 = vcmask 64512  }
  0x1a   : > { %s2590_s5 = scalar_lea.vmem %s4281_s0, %s2324_s28  ;;  %260 = vst.msk [vmem:[#allocation2 + $0x18] sm:$0x1] %vm259_vm1, %v2490_v0  ;;  %s2497_s12 = smov 32  }
  0x1b   : > { %v217_v1 = vld [vmem:[%s2590_s5] sm:$0xff]  ;;  %v218_v2 = vld [vmem:[%s2590_s5 + $0x8] sm:$0xff]  ;;  %261 = vst.msk [vmem:[#allocation2 + $0x30] sm:$0x1] %vm259_vm1, %v2490_v0  ;;  %v223_v18 = vld [vmem:[%s2590_s5 + $0x30] sm:$0xff]  ;;  %s2498_s13 = smov 28   ;;  %s3941_s20 = scalar_lea.vmem %s4283_s2, %s2324_s28 }
  0x1c   : > { %292 = vst.msk [vmem:[#allocation2 + $0x19] sm:$0xff] %vm249_vm0, %v217_v1  ;;  %v221_v16 = vld [vmem:[%s2590_s5 + $0x20] sm:$0xff]  ;;  %v222_v17 = vld [vmem:[%s2590_s5 + $0x28] sm:$0xff]  ;;  %v224_v19 = vld [vmem:[%s2590_s5 + $0x38] sm:$0xff]  ;;  %s4210_s27 = sand.u32 1, %s2480_s16   ;;  %s2169_s22 = scalar_lea.hbm %s4285_s4, %s2545_s19 }
  0x1d   : > { %v2599_v3 = vld [vmem:[#allocation2] sm:$0xff]  ;;  %293 = vst.msk [vmem:[#allocation2 + $0x21] sm:$0xff] %vm249_vm0, %v218_v2  ;;  %v219_v20 = vld [vmem:[%s2590_s5 + $0x10] sm:$0xff]  ;;  %v220_v21 = vld [vmem:[%s2590_s5 + $0x18] sm:$0xff]  ;;  %s200_s23 = scalar_lea.vmem [#allocation4], %s4210_s27  ;;  %s2414_s28 = scalar_lea.hbm %s4284_s3, 2 }
  0x1e   : > { %v2602_v4 = vld [vmem:[#allocation2 + $0x8] sm:$0xff]  ;;  %v459_v5 = vrot.slane %v2599_v3, 1  ;;  %378 = vst.msk [vmem:[#allocation3] sm:$0xff] %vm249_vm0, %v2599_v3  ;;  %v225_v22 = vld [vmem:[%s2590_s5 + $0x40] sm:$0xff]  ;;  %v227_v27 = vld [vmem:[%s2590_s5 + $0x50] sm:$0xff]  ;;  %s4221_s29 = sshll.u32 %s200_s23, 4  ;;  %s2159_s29 = int_to_ptr.vmem [resolvable:$true] %s4221_s29 }
  0x1f   : > { %v460_v6 = vrot.slane %v2602_v4, 1  ;;  %379 = vst.msk [vmem:[#allocation3 + $0x8] sm:$0xff] %vm249_vm0, %v2602_v4  ;;  %v226_v23 = vld [vmem:[%s2590_s5 + $0x48] sm:$0xff]  ;;  %v228_v41 = vld [vmem:[%s2590_s5 + $0x58] sm:$0xff]  ;;  %v229_v46 = vld [vmem:[%s2590_s5 + $0x60] sm:$0xff] }
  0x20   : > { %262 = vst.msk [vmem:[#allocation2 + $0x48] sm:$0x1] %vm259_vm1, %v2490_v0  ;;  %v230_v50 = vld [vmem:[%s2590_s5 + $0x68] sm:$0xff]  ;;  %v231_v56 = vld [vmem:[%s2590_s5 + $0x70] sm:$0xff]  ;;  %v232_v58 = vld [vmem:[%s2590_s5 + $0x78] sm:$0xff] }
  0x21   : > { %v461_v7 = vsel %vm458_vm2, %v459_v5, %v460_v6  ;;  %263 = vst.msk [vmem:[#allocation2 + $0x60] sm:$0x1] %vm259_vm1, %v2490_v0  ;;  %v233_v59 = vld [vmem:[%s2590_s5 + $0x80] sm:$0xff]  ;;  %v234_v62 = vld [vmem:[%s2590_s5 + $0x88] sm:$0xff]  ;;  %v235_v1 = vld [vmem:[%s2590_s5 + $0x90] sm:$0xff] }
  0x22   : > { %539 = vrot.lane.b32.xlu0 %v461_v7, %s2491_s6  ;;  %264 = vst.msk [vmem:[#allocation2 + $0x78] sm:$0x1] %vm259_vm1, %v2490_v0  ;;  %v236_v7 = vld [vmem:[%s2590_s5 + $0x98] sm:$0xff] }
  0x23   : > { %v2620_v8 = vld [vmem:[#allocation2 + $0x18] sm:$0xff]  ;;  %265 = vst.msk [vmem:[#allocation2 + $0x90] sm:$0x1] %vm259_vm1, %v2490_v0 }
  0x24   : > { %v2624_v9 = vld [vmem:[#allocation2 + $0x20] sm:$0xff]  ;;  %v464_v10 = vrot.slane %v2620_v8, 1  ;;  %266 = vst.msk [vmem:[#allocation2 + $0xa8] sm:$0x1] %vm259_vm1, %v2490_v0 }
  0x25   : > { %v465_v11 = vrot.slane %v2624_v9, 1  ;;  %267 = vst.msk [vmem:[#allocation2 + $0xc0] sm:$0x1] %vm259_vm1, %v2490_v0 }
  0x26   : > { %268 = vst.msk [vmem:[#allocation2 + $0xd8] sm:$0x1] %vm259_vm1, %v2490_v0 }
  0x27   : > { %v2635_v12 = vsel %vm458_vm2, %v464_v10, %v465_v11  ;;  %269 = vst.msk [vmem:[#allocation2 + $0xf0] sm:$0x1] %vm259_vm1, %v2490_v0 }
  0x28   : > { %543 = vrot.lane.b32.xlu1 %v2635_v12, %s2491_s6  ;;  %270 = vst.msk [vmem:[#allocation2 + $0x108] sm:$0x1] %vm259_vm1, %v2490_v0 }
  0x29   : > { %271 = vst.msk [vmem:[#allocation2 + $0x120] sm:$0x1] %vm259_vm1, %v2490_v0 }
  0x2a   : > { %272 = vst.msk [vmem:[#allocation2 + $0x138] sm:$0x1] %vm259_vm1, %v2490_v0 }
  0x2b   : > { %273 = vst.msk [vmem:[#allocation2 + $0x150] sm:$0x1] %vm259_vm1, %v2490_v0 }
  0x2c   : > { %274 = vst.msk [vmem:[#allocation2 + $0x168] sm:$0x1] %vm259_vm1, %v2490_v0 }
  0x2d   : > { %275 = vst.msk [vmem:[#allocation2 + $0x180] sm:$0x1] %vm259_vm1, %v2490_v0 }
  0x2e   : > { %276 = vst.msk [vmem:[#allocation2 + $0x29] sm:$0x1] %vm259_vm1, %v2490_v0 }
  0x2f   : > { %277 = vst.msk [vmem:[#allocation2 + $0x41] sm:$0x1] %vm259_vm1, %v2490_v0 }
  0x30   : > { %278 = vst.msk [vmem:[#allocation2 + $0x59] sm:$0x1] %vm259_vm1, %v2490_v0 }
  0x31   : > { %279 = vst.msk [vmem:[#allocation2 + $0x71] sm:$0x1] %vm259_vm1, %v2490_v0 }
  0x32   : > { %280 = vst.msk [vmem:[#allocation2 + $0x89] sm:$0x1] %vm259_vm1, %v2490_v0 }
  0x33   : > { %281 = vst.msk [vmem:[#allocation2 + $0xa1] sm:$0x1] %vm259_vm1, %v2490_v0 }
  0x34   : > { %282 = vst.msk [vmem:[#allocation2 + $0xb9] sm:$0x1] %vm259_vm1, %v2490_v0 }
  0x35   : > { %283 = vst.msk [vmem:[#allocation2 + $0xd1] sm:$0x1] %vm259_vm1, %v2490_v0  ;;  %v2669_v13 = vld [vmem:[#allocation2 + $0x28] sm:$0x3] }
  0x36   : > { %284 = vst.msk [vmem:[#allocation2 + $0xe9] sm:$0x1] %vm259_vm1, %v2490_v0  ;;  %v467_v14 = vrot.slane %v2669_v13, 1 }
  0x37   : > { %285 = vst.msk [vmem:[#allocation2 + $0x101] sm:$0x1] %vm259_vm1, %v2490_v0 }
  0x38   : > { %286 = vst.msk [vmem:[#allocation2 + $0x119] sm:$0x1] %vm259_vm1, %v2490_v0  ;;  %v2679_v15 = vsel %vm458_vm2, %v465_v11, %v467_v14 }
  0x39   : > { %287 = vst.msk [vmem:[#allocation2 + $0x131] sm:$0x1] %vm259_vm1, %v2490_v0  ;;  %545 = vrot.lane.b32.xlu1 %v2679_v15, %s2491_s6 }
  0x3a   : > { %288 = vst.msk [vmem:[#allocation2 + $0x149] sm:$0x1] %vm259_vm1, %v2490_v0 }
  0x3b   : > { %289 = vst.msk [vmem:[#allocation2 + $0x161] sm:$0x1] %vm259_vm1, %v2490_v0 }
  0x3c   : > { %290 = vst.msk [vmem:[#allocation2 + $0x179] sm:$0x1] %vm259_vm1, %v2490_v0 }
  0x3d   : > { %291 = vst.msk [vmem:[#allocation2 + $0x191] sm:$0x1] %vm259_vm1, %v2490_v0 }
  0x3e   : > { %380 = vst.msk [vmem:[#allocation3 + $0x10] sm:$0xff] %vm249_vm0, %v2620_v8 }
  0x3f   : > { %381 = vst.msk [vmem:[#allocation3 + $0x18] sm:$0xff] %vm249_vm0, %v2624_v9 }
  0x40   : > { %253 = vst.msk [vmem:[#allocation2 + $0x10] sm:$0x3] %vm252_vm3, %v2490_v0 }
  0x41   : > { %257 = vst.msk [vmem:[#allocation2 + $0x1a8] sm:$0x3] %vm252_vm3, %v2490_v0 }
  0x42   : > { %296 = vst.msk [vmem:[#allocation2 + $0x49] sm:$0xff] %vm249_vm0, %v221_v16 }
  0x43   : > { %297 = vst.msk [vmem:[#allocation2 + $0x51] sm:$0xff] %vm249_vm0, %v222_v17 }
  0x44   : > { %298 = vst.msk [vmem:[#allocation2 + $0x61] sm:$0xff] %vm249_vm0, %v223_v18 }
  0x45   : > { %299 = vst.msk [vmem:[#allocation2 + $0x69] sm:$0xff] %vm249_vm0, %v224_v19 }
  0x46   : > { %294 = vst.msk [vmem:[#allocation2 + $0x31] sm:$0xff] %vm249_vm0, %v219_v20 }
  0x47   : > { %v2712_v24 = vld [vmem:[#allocation2 + $0x10] sm:$0x3]  ;;  %295 = vst.msk [vmem:[#allocation2 + $0x39] sm:$0xff] %vm249_vm0, %v220_v21 }
  0x48   : > { %v462_v25 = vrot.slane %v2712_v24, 1  ;;  %300 = vst.msk [vmem:[#allocation2 + $0x79] sm:$0xff] %vm249_vm0, %v225_v22 }
  0x49   : > { %v2717_v26 = vld [vmem:[#allocation2 + $0x48] sm:$0xff]  ;;  %301 = vst.msk [vmem:[#allocation2 + $0x81] sm:$0xff] %vm249_vm0, %v226_v23 }
  0x4a   : > { %v463_v28 = vsel %vm458_vm2, %v460_v6, %v462_v25  ;;  %v2724_v29 = vld [vmem:[#allocation2 + $0x50] sm:$0xff]  ;;  %384 = vst.msk [vmem:[#allocation3 + $0x30] sm:$0xff] %vm249_vm0, %v2717_v26  ;;  %v2728_v30 = vld [vmem:[#allocation2 + $0x58] sm:$0x3]  ;;  %v474_v33 = vrot.slane %v2717_v26, 1 }
  0x4b   : > { %541 = vrot.lane.b32.xlu0 %v463_v28, %s2491_s6  ;;  %v475_v31 = vrot.slane %v2724_v29, 1  ;;  %385 = vst.msk [vmem:[#allocation3 + $0x38] sm:$0xff] %vm249_vm0, %v2724_v29  ;;  %v477_v32 = vrot.slane %v2728_v30, 1  ;;  %v2799_v57 = vld [vmem:[#allocation2 + $0x60] sm:$0xff] }
  0x4c   : > { %v2736_v34 = vld [vmem:[#allocation2 + $0x68] sm:$0xff]  ;;  %302 = vst.msk [vmem:[#allocation2 + $0x91] sm:$0xff] %vm249_vm0, %v227_v27  ;;  %v2770_v47 = vld [vmem:[#allocation2 + $0x70] sm:$0x3]  ;;  %v479_v6 = vrot.slane %v2799_v57, 1  ;;  %v237_v28 = vld [vmem:[%s2590_s5 + $0xa0] sm:$0xff] }
  0x4d   : > { %v2740_v35 = vsel %vm458_vm2, %v475_v31, %v477_v32  ;;  %387 = vst.msk [vmem:[#allocation3 + $0x48] sm:$0xff] %vm249_vm0, %v2736_v34  ;;  %v2744_v36 = vld [vmem:[#allocation2 + $0x30] sm:$0xff]  ;;  %v2760_v42 = vsel %vm458_vm2, %v474_v33, %v475_v31  ;;  %v480_v54 = vrot.slane %v2736_v34, 1  ;;  %v482_v55 = vrot.slane %v2770_v47, 1  ;;  %v238_v32 = vld [vmem:[%s2590_s5 + $0xa8] sm:$0xff] }
  0x4e   : > { %4378 = vst [vmem:[#allocation10_spill] sm:$0xff] %v2740_v35  ;;  %553 = vrot.lane.b32.xlu1 %v2740_v35, %s2491_s6  ;;  %v2748_v37 = vld [vmem:[#allocation2 + $0x38] sm:$0xff]  ;;  %v469_v38 = vrot.slane %v2744_v36, 1  ;;  %v2767_v45 = vld [vmem:[#allocation2 + $0x40] sm:$0x3] }
  0x4f   : > { %382 = vst.msk [vmem:[#allocation3 + $0x20] sm:$0xff] %vm249_vm0, %v2744_v36  ;;  %v470_v39 = vrot.slane %v2748_v37, 1  ;;  %v2756_v40 = vld [vmem:[#allocation2 + $0x78] sm:$0xff]  ;;  %v472_v53 = vrot.slane %v2767_v45, 1  ;;  %v2812_v61 = vsel %vm458_vm2, %v480_v54, %v482_v55  ;;  %v2848_v17 = vsel %vm458_vm2, %v479_v6, %v480_v54  ;;  %v241_v54 = vld [vmem:[%s2590_s5 + $0xc0] sm:$0xff]  ;;  %v243_v6 = vld [vmem:[%s2590_s5 + $0xd0] sm:$0xff] }
  0x50   : > { %383 = vst.msk [vmem:[#allocation3 + $0x28] sm:$0xff] %vm249_vm0, %v2748_v37  ;;  %v2762_v43 = vld [vmem:[#allocation2 + $0x80] sm:$0xff]  ;;  %v484_v44 = vrot.slane %v2756_v40, 1  ;;  %v2863_v23 = vld [vmem:[#allocation2 + $0x88] sm:$0x3] }
  0x51   : > { %4379 = vst [vmem:[#allocation11_spill] sm:$0xff] %v2762_v43  ;;  %v2773_v48 = vsel %vm458_vm2, %v469_v38, %v470_v39  ;;  %v485_v49 = vrot.slane %v2762_v43, 1  ;;  %v2808_v60 = vsel %vm458_vm2, %v470_v39, %v472_v53  ;;  %v487_v38 = vrot.slane %v2863_v23, 1  ;;  %v240_v53 = vld [vmem:[%s2590_s5 + $0xb8] sm:$0xff] }
  0x52   : > { %388 = vst.msk [vmem:[#allocation3 + $0x50] sm:$0xff] %vm249_vm0, %v2756_v40  ;;  %547 = vrot.lane.b32.xlu2 %v2773_v48, %s2491_s6 }
  0x53   : > { %4380 = vst [vmem:[#allocation12_spill] sm:$0xff] %v2773_v48  ;;  %551 = vrot.lane.b32.xlu0 %v2760_v42, %s2491_s6  ;;  %v2787_v51 = vsel %vm458_vm2, %v484_v44, %v485_v49  ;;  %v2789_v52 = vld [vmem:[#allocation2 + $0x90] sm:$0xff]  ;;  %v2907_v55 = vsel %vm458_vm2, %v485_v49, %v487_v38 }
  0x54   : > { %389 = vst.msk [vmem:[#allocation3 + $0x58] sm:$0xff] %vm249_vm0, %v2762_v43  ;;  %v489_v10 = vrot.slane %v2789_v52, 1 }
  0x55   : > { %303 = vst.msk [vmem:[#allocation2 + $0x99] sm:$0xff] %vm249_vm0, %v228_v41 }
  0x56   : > { %4381 = vst [vmem:[#allocation13_spill] sm:$0xff] %v2787_v51  ;;  %559 = vrot.lane.b32.xlu1 %v2787_v51, %s2491_s6 }
  0x57   : > { %304 = vst.msk [vmem:[#allocation2 + $0xa9] sm:$0xff] %vm249_vm0, %v229_v46  ;;  %v239_v46 = vld [vmem:[%s2590_s5 + $0xb0] sm:$0xff] }
  0x58   : > { %390 = vst.msk [vmem:[#allocation3 + $0x60] sm:$0xff] %vm249_vm0, %v2789_v52 }
  0x59   : > { %305 = vst.msk [vmem:[#allocation2 + $0xb1] sm:$0xff] %vm249_vm0, %v230_v50 }
  0x5a   : > { %386 = vst.msk [vmem:[#allocation3 + $0x40] sm:$0xff] %vm249_vm0, %v2799_v57  ;;  %549 = vrot.lane.b32.xlu2 %v2808_v60, %s2491_s6 }
  0x5b   : > { %306 = vst.msk [vmem:[#allocation2 + $0xc1] sm:$0xff] %vm249_vm0, %v231_v56  ;;  %557 = vrot.lane.b32.xlu0 %v2812_v61, %s2491_s6 }
  0x5c   : > { %307 = vst.msk [vmem:[#allocation2 + $0xc9] sm:$0xff] %vm249_vm0, %v232_v58  ;;  %v2816_v63 = vld [vmem:[#allocation2 + $0x98] sm:$0xff]  ;;  %v2818_v0 = vld [vmem:[#allocation2 + $0xa0] sm:$0x3]  ;;  %v242_v58 = vld [vmem:[%s2590_s5 + $0xc8] sm:$0xff] }
  0x5d   : > { %308 = vst.msk [vmem:[#allocation2 + $0xd9] sm:$0xff] %vm249_vm0, %v233_v59  ;;  %v490_v2 = vrot.slane %v2816_v63, 1  ;;  %v492_v5 = vrot.slane %v2818_v0, 1 }
  0x5e   : > { %391 = vst.msk [vmem:[#allocation3 + $0x68] sm:$0xff] %vm249_vm0, %v2816_v63  ;;  %v2869_v27 = vld [vmem:[#allocation2 + $0xa8] sm:$0xff] }
  0x5f   : > { %309 = vst.msk [vmem:[#allocation2 + $0xe1] sm:$0xff] %vm249_vm0, %v234_v62  ;;  %v2835_v11 = vsel %vm458_vm2, %v490_v2, %v492_v5  ;;  %v2856_v20 = vsel %vm458_vm2, %v489_v10, %v490_v2  ;;  %v494_v2 = vrot.slane %v2869_v27, 1 }
  0x60   : > { %4382 = vst [vmem:[#allocation14_spill] sm:$0xff] %v2835_v11  ;;  %v2837_v14 = vld [vmem:[#allocation2 + $0xb0] sm:$0xff]  ;;  %565 = vrot.lane.b32.xlu1 %v2835_v11, %s2491_s6  ;;  %v2865_v25 = vld [vmem:[#allocation2 + $0xb8] sm:$0x3] }
  0x61   : > { %310 = vst.msk [vmem:[#allocation2 + $0xf1] sm:$0xff] %vm249_vm0, %v235_v1  ;;  %v495_v39 = vrot.slane %v2837_v14, 1  ;;  %v497_v41 = vrot.slane %v2865_v25, 1 }
  0x62   : > { %393 = vst.msk [vmem:[#allocation3 + $0x78] sm:$0xff] %vm249_vm0, %v2837_v14  ;;  %v2844_v16 = vld [vmem:[#allocation2 + $0xc0] sm:$0xff]  ;;  %555 = vrot.lane.b32.xlu2 %v2848_v17, %s2491_s6 }
  0x63   : > { %311 = vst.msk [vmem:[#allocation2 + $0xf9] sm:$0xff] %vm249_vm0, %v236_v7  ;;  %v2850_v18 = vld [vmem:[#allocation2 + $0xc8] sm:$0xff]  ;;  %v499_v19 = vrot.slane %v2844_v16, 1  ;;  %563 = vrot.lane.b32.xlu0 %v2856_v20, %s2491_s6  ;;  %v2913_v59 = vsel %vm458_vm2, %v495_v39, %v497_v41 }
  0x64   : > { %4383 = vst [vmem:[#allocation15_spill] sm:$0xff] %v2848_v17  ;;  %v4286_v21 = vrot.slane %v2850_v18, 1  ;;  %v2861_v22 = vld [vmem:[#allocation2 + $0xd8] sm:$0xff] }
  0x65   : > { %4384 = vst [vmem:[#allocation16_spill] sm:$0xff] %v2850_v18  ;;  %v504_v7 = vrot.slane %v2861_v22, 1 }
  0x66   : > { %394 = vst.msk [vmem:[#allocation3 + $0x80] sm:$0xff] %vm249_vm0, %v2844_v16  ;;  %v2874_v31 = vld [vmem:[#allocation2 + $0xe0] sm:$0xff]  ;;  %v2884_v33 = vsel %vm458_vm2, %v499_v19, %v4286_v21  ;;  %v2891_v44 = vld [vmem:[#allocation2 + $0xe8] sm:$0x3] }
  0x67   : > { %4385 = vst [vmem:[#allocation17_spill] sm:$0xff] %v2856_v20  ;;  %v507_v56 = vrot.slane %v2891_v44, 1  ;;  %v505_v62 = vrot.slane %v2874_v31, 1 }
  0x68   : > { %395 = vst.msk [vmem:[#allocation3 + $0x88] sm:$0xff] %vm249_vm0, %v2850_v18  ;;  %571 = vrot.lane.b32.xlu1 %v2884_v33, %s2491_s6  ;;  %v2921_v49 = vld [vmem:[#allocation2 + $0xf0] sm:$0xff] }
  0x69   : > { %4386 = vst [vmem:[#allocation18_spill] sm:$0xff] %v2861_v22  ;;  %v2926_v1 = vsel %vm458_vm2, %v505_v62, %v507_v56  ;;  %v245_v56 = vld [vmem:[%s2590_s5 + $0xe0] sm:$0xff] }
  0x6a   : > { %396 = vst.msk [vmem:[#allocation3 + $0x90] sm:$0xff] %vm249_vm0, %v2861_v22  ;;  %v2895_v50 = vld [vmem:[#allocation2 + $0xf8] sm:$0xff]  ;;  %561 = vrot.lane.b32.xlu2 %v2907_v55, %s2491_s6 }
  0x6b   : > { %4387 = vst [vmem:[#allocation19_spill] sm:$0xff] %v2874_v31  ;;  %569 = vrot.lane.b32.xlu0 %v2913_v59, %s2491_s6 }
  0x6c   : > { %392 = vst.msk [vmem:[#allocation3 + $0x70] sm:$0xff] %vm249_vm0, %v2869_v27 }
  0x6d   : > { %4388 = vst [vmem:[#allocation20_spill] sm:$0xff] %v2884_v33 }
  0x6e   : > { %397 = vst.msk [vmem:[#allocation3 + $0x98] sm:$0xff] %vm249_vm0, %v2874_v31 }
  0x6f   : > { %312 = vst.msk [vmem:[#allocation2 + $0x109] sm:$0xff] %vm249_vm0, %v237_v28  ;;  %v244_v28 = vld [vmem:[%s2590_s5 + $0xd8] sm:$0xff] }
  0x70   : > { %313 = vst.msk [vmem:[#allocation2 + $0x111] sm:$0xff] %vm249_vm0, %v238_v32  ;;  %577 = vrot.lane.b32.xlu1 %v2926_v1, %s2491_s6  ;;  %v2948_v32 = vsel %vm458_vm2, %v494_v2, %v495_v39  ;;  %v2964_v39 = vld [vmem:[#allocation2 + $0x100] sm:$0x3]  ;;  %v246_v2 = vld [vmem:[%s2590_s5 + $0xe8] sm:$0xff] }
  0x71   : > { %399 = vst.msk [vmem:[#allocation3 + $0xa8] sm:$0xff] %vm249_vm0, %v2895_v50 }
  0x72   : > { %4389 = vst [vmem:[#allocation21_spill] sm:$0xff] %v2907_v55  ;;  %567 = vrot.lane.b32.xlu2 %v2948_v32, %s2491_s6 }
  0x73   : > { %314 = vst.msk [vmem:[#allocation2 + $0x121] sm:$0xff] %vm249_vm0, %v239_v46 }
  0x74   : > { %4390 = vst [vmem:[#allocation22_spill] sm:$0xff] %v2913_v59 }
  0x75   : > { %315 = vst.msk [vmem:[#allocation2 + $0x129] sm:$0xff] %vm249_vm0, %v240_v53  ;;  %v2957_v53 = vsel %vm458_vm2, %v504_v7, %v505_v62  ;;  %v510_v7 = vrot.slane %v2895_v50, 1 }
  0x76   : > { %316 = vst.msk [vmem:[#allocation2 + $0x139] sm:$0xff] %vm249_vm0, %v241_v54  ;;  %v2929_v5 = vld [vmem:[#allocation2 + $0x108] sm:$0xff]  ;;  %v2961_v54 = vld [vmem:[#allocation2 + $0xd0] sm:$0x3]  ;;  %575 = vrot.lane.b32.xlu0 %v2957_v53, %s2491_s6 }
  0x77   : > { %317 = vst.msk [vmem:[#allocation2 + $0x141] sm:$0xff] %vm249_vm0, %v242_v58  ;;  %v2935_v10 = vld [vmem:[#allocation2 + $0x110] sm:$0xff]  ;;  %v514_v38 = vrot.slane %v2929_v5, 1  ;;  %v3037_v55 = vld [vmem:[#allocation2 + $0x118] sm:$0x3] }
  0x78   : > { %4391 = vst [vmem:[#allocation23_spill] sm:$0xff] %v2926_v1  ;;  %v515_v41 = vrot.slane %v2935_v10, 1 }
  0x79   : > { %398 = vst.msk [vmem:[#allocation3 + $0xa0] sm:$0xff] %vm249_vm0, %v2921_v49 }
  0x7a   : > { %400 = vst.msk [vmem:[#allocation3 + $0xb0] sm:$0xff] %vm249_vm0, %v2929_v5  ;;  %v2943_v19 = vld [vmem:[#allocation2 + $0x120] sm:$0xff]  ;;  %v2977_v62 = vsel %vm458_vm2, %v514_v38, %v515_v41  ;;  %v4398_v38 = vrot.slane %v2850_v18, 1 }
  0x7b   : > { %401 = vst.msk [vmem:[#allocation3 + $0xb8] sm:$0xff] %vm249_vm0, %v2935_v10  ;;  %583 = vrot.lane.b32.xlu1 %v2977_v62, %s2491_s6  ;;  %v519_v51 = vrot.slane %v2943_v19, 1 }
  0x7c   : > { %4392 = vst [vmem:[#allocation24_spill] sm:$0xff] %v2943_v19  ;;  %v2952_v46 = vld [vmem:[#allocation2 + $0x128] sm:$0xff]  ;;  %v2983_v21 = vld [vmem:[#allocation2 + $0x130] sm:$0x3] }
  0x7d   : > { %318 = vst.msk [vmem:[#allocation2 + $0x151] sm:$0xff] %vm249_vm0, %v243_v6  ;;  %v502_v6 = vrot.slane %v2961_v54, 1  ;;  %v522_v33 = vrot.slane %v2983_v21, 1  ;;  %v2998_v11 = vld [vmem:[#allocation2 + $0x138] sm:$0xff] }
  0x7e   : > { %4393 = vst [vmem:[#allocation25_spill] sm:$0xff] %v2948_v32  ;;  %v2966_v58 = vld [vmem:[#allocation2 + $0x140] sm:$0xff]  ;;  %v3039_v35 = vld [vmem:[#allocation2 + $0x148] sm:$0x3] }
  0x7f   : > { %4394 = vst [vmem:[#allocation26_spill] sm:$0xff] %v2952_v46 }
  0x80   : > { %402 = vst.msk [vmem:[#allocation3 + $0xc0] sm:$0xff] %vm249_vm0, %v2943_v19 }
  0x81   : > { %4395 = vst [vmem:[#allocation27_spill] sm:$0xff] %v2957_v53 }
  0x82   : > { %403 = vst.msk [vmem:[#allocation3 + $0xc8] sm:$0xff] %vm249_vm0, %v2952_v46 }
  0x83   : > { %4396 = vst [vmem:[#allocation28_spill] sm:$0xff] %v2966_v58 }
  0x84   : > { %319 = vst.msk [vmem:[#allocation2 + $0x159] sm:$0xff] %vm249_vm0, %v244_v28  ;;  %v512_v28 = vrot.slane %v2964_v39, 1  ;;  %v2986_v1 = vld [vmem:[#allocation2 + $0x150] sm:$0xff] }
  0x85   : > { %405 = vst.msk [vmem:[#allocation3 + $0xd8] sm:$0xff] %vm249_vm0, %v2966_v58 }
  0x86   : > { %4397 = vst [vmem:[#allocation29_spill] sm:$0xff] %v2977_v62  ;;  %v3001_v53 = vsel %vm458_vm2, %v510_v7, %v512_v28  ;;  %v520_v62 = vrot.slane %v2952_v46, 1 }
  0x87   : > { %320 = vst.msk [vmem:[#allocation2 + $0x169] sm:$0xff] %vm249_vm0, %v245_v56  ;;  %v2995_v56 = vsel %vm458_vm2, %v4398_v38, %v502_v6  ;;  %581 = vrot.lane.b32.xlu0 %v3001_v53, %s2491_s6  ;;  %v509_v38 = vrot.slane %v2921_v49, 1 }
  0x88   : > { %321 = vst.msk [vmem:[#allocation2 + $0x171] sm:$0xff] %vm249_vm0, %v246_v2  ;;  %573 = vrot.lane.b32.xlu2 %v2995_v56, %s2491_s6  ;;  %v3017_v28 = vsel %vm458_vm2, %v520_v62, %v522_v33  ;;  %v529_v33 = vrot.slane %v2986_v1, 1  ;;  %v3035_v59 = vsel %vm458_vm2, %v519_v51, %v520_v62  ;;  %v527_v51 = vrot.slane %v3039_v35, 1 }
  0x89   : > { %406 = vst.msk [vmem:[#allocation3 + $0xe0] sm:$0xff] %vm249_vm0, %v2986_v1  ;;  %589 = vrot.lane.b32.xlu1 %v3017_v28, %s2491_s6 }
  0x8a   : > { %4399 = vst [vmem:[#allocation30_spill] sm:$0xff] %v2995_v56 }
  0x8b   : > { %4400 = vst [vmem:[#allocation31_spill] sm:$0xff] %v2998_v11  ;;  %v3003_v2 = vld [vmem:[#allocation2 + $0x158] sm:$0xff] }
  0x8c   : > { %4401 = vst [vmem:[#allocation32_spill] sm:$0xff] %v3001_v53  ;;  %v3030_v53 = vsel %vm458_vm2, %v509_v38, %v510_v7  ;;  %v530_v56 = vrot.slane %v3003_v2, 1  ;;  %v517_v38 = vrot.slane %v3037_v55, 1 }
  0x8d   : > { %404 = vst.msk [vmem:[#allocation3 + $0xd0] sm:$0xff] %vm249_vm0, %v2998_v11 }
  0x8e   : > { %407 = vst.msk [vmem:[#allocation3 + $0xe8] sm:$0xff] %vm249_vm0, %v3003_v2  ;;  %v3012_v6 = vld [vmem:[#allocation2 + $0x168] sm:$0xff]  ;;  %v3046_v7 = vsel %vm458_vm2, %v529_v33, %v530_v56  ;;  %v3056_v20 = vsel %vm458_vm2, %v515_v41, %v517_v38 }
  0x8f   : > { %4402 = vst [vmem:[#allocation33_spill] sm:$0xff] %v3012_v6  ;;  %v3020_v32 = vld [vmem:[#allocation2 + $0x170] sm:$0xff]  ;;  %587 = vrot.lane.b32.xlu0 %v3035_v59, %s2491_s6  ;;  %v3051_v62 = vld [vmem:[#allocation2 + $0x178] sm:$0x3]  ;;  %v534_v41 = vrot.slane %v3012_v6, 1 }
  0x90   : > { %4403 = vst [vmem:[#allocation34_spill] sm:$0xff] %v3017_v28  ;;  %579 = vrot.lane.b32.xlu2 %v3030_v53, %s2491_s6  ;;  %v525_v28 = vrot.slane %v2966_v58, 1  ;;  %v535_v33 = vrot.slane %v3020_v32, 1 }
  0x91   : > { %4404 = vst [vmem:[#allocation35_spill] sm:$0xff] %v3020_v32  ;;  %595 = vrot.lane.b32.xlu1 %v3046_v7, %s2491_s6 }
  0x92   : > { %408 = vst.msk [vmem:[#allocation3 + $0xf0] sm:$0xff] %vm249_vm0, %v3012_v6  ;;  %v3080_v48 = vsel %vm458_vm2, %v534_v41, %v535_v33 }
  0x93   : > { %409 = vst.msk [vmem:[#allocation3 + $0xf8] sm:$0xff] %vm249_vm0, %v3020_v32 }
  0x94   : > { %4405 = vst [vmem:[#allocation36_spill] sm:$0xff] %v3030_v53  ;;  %v537_v53 = vrot.slane %v3051_v62, 1  ;;  %v540_v41 = vpop.permute.xlu0 %539 }
  0x95   : > { %4406 = vst [vmem:[#allocation37_spill] sm:$0xff] %v3035_v59  ;;  %v3060_v59 = vsel %vm458_vm2, %v525_v28, %v527_v51  ;;  %v674_v51 = vrot.slane %v2620_v8, 2 }
  0x96   : > { %4407 = vst [vmem:[#allocation38_spill] sm:$0xff] %v3046_v7  ;;  %v3068_v17 = vsel %vm458_vm2, %v535_v33, %v537_v53  ;;  %v524_v7 = vrot.slane %v2998_v11, 1  ;;  %v672_v33 = vrot.slane %v2712_v24, 2  ;;  %v669_v24 = vrot.slane %v2599_v3, 2 }
  0x97   : > { %4408 = vst [vmem:[#allocation39_spill] sm:$0xff] %v3056_v20  ;;  %593 = vrot.lane.b32.xlu0 %v3060_v59, %s2491_s6 }
  0x98   : > { %4409 = vst [vmem:[#allocation40_spill] sm:$0xff] %v3060_v59  ;;  %585 = vrot.lane.b32.xlu2 %v3056_v20, %s2491_s6  ;;  %v3075_v38 = vsel %vm458_vm2, %v524_v7, %v525_v28  ;;  %v675_v20 = vrot.slane %v2624_v9, 2  ;;  %v3082_v59 = vld [vmem:[#allocation2 + $0x160] sm:$0x3]  ;;  %v670_v7 = vrot.slane %v2602_v4, 2 }
  0x99   : > { %4410 = vst [vmem:[#allocation41_spill] sm:$0xff] %v3068_v17  ;;  %601 = vrot.lane.b32.xlu1 %v3068_v17, %s2491_s6  ;;  %v532_v28 = vrot.slane %v3082_v59, 1 }
  0x9a   : > { %4411 = vst [vmem:[#allocation42_spill] sm:$0xff] %v3075_v38  ;;  %v3089_v53 = vsel %vm668_vm4, %v674_v51, %v675_v20  ;;  %v682_v51 = vrot.slane %v2767_v45, 2  ;;  %v671_v45 = vsel %vm668_vm4, %v669_v24, %v670_v7  ;;  %v697_v24 = vrot.slane %v2863_v23, 2 }
  0x9b   : > { %4412 = vst [vmem:[#allocation43_spill] sm:$0xff] %v3080_v48  ;;  %v3098_v17 = vsel %vm458_vm2, %v530_v56, %v532_v28  ;;  %v679_v56 = vrot.slane %v2744_v36, 2  ;;  %v689_v28 = vrot.slane %v2799_v57, 2 }
  0x9c   : > { %636 = vst.msk [vmem:[#allocation3] sm:$0xff] %vm635_vm5, %v540_v41  ;;  %v544_v41 = vpop.permute.xlu1 %543 }
  0x9d   : > { %638 = vst.msk [vmem:[#allocation3 + $0x10] sm:$0xff] %vm635_vm5, %v544_v41  ;;  %v685_v41 = vrot.slane %v2724_v29, 2 }
  0x9f   : > { %599 = vrot.lane.b32.xlu0 %v3080_v48, %s2491_s6  ;;  %v673_v48 = vsel %vm668_vm4, %v670_v7, %v672_v33  ;;  %v690_v33 = vrot.slane %v2736_v34, 2  ;;  %v687_v7 = vrot.slane %v2728_v30, 2  ;;  %v684_v30 = vrot.slane %v2717_v26, 2 }
  0xa0   : > { %591 = vrot.lane.b32.xlu2 %v3075_v38, %s2491_s6  ;;  %v680_v38 = vrot.slane %v2748_v37, 2 }
  0xa1   : > { %753 = vrot.lane.b32.xlu1 %v3089_v53, %s2492_s7  ;;  %v3124_v3 = vsel %vm668_vm4, %v689_v28, %v690_v33  ;;  %v694_v28 = vrot.slane %v2756_v40, 2 }
  0xa2   : > { %v3107_v4 = vsel %vm668_vm4, %v680_v38, %v682_v51  ;;  %4413 = vst [vmem:[#allocation44_spill] sm:$0xff] %v3124_v3  ;;  %v677_v51 = vrot.slane %v2669_v13, 2 }
  0xa7   : > { %751 = vrot.lane.b32.xlu0 %v673_v48, %s2492_s7  ;;  %v3118_v48 = vsel %vm668_vm4, %v679_v56, %v680_v38  ;;  %v3132_v38 = vsel %vm668_vm4, %v675_v20, %v677_v51  ;;  %v3136_v56 = vsel %vm668_vm4, %v685_v41, %v687_v7  ;;  %v3153_v51 = vsel %vm668_vm4, %v684_v30, %v685_v41 }
  0xa8   : > { %597 = vrot.lane.b32.xlu2 %v3098_v17, %s2491_s6  ;;  %v704_v7 = vrot.slane %v2869_v27, 2  ;;  %v700_v41 = vrot.slane %v2816_v63, 2  ;;  %v702_v30 = vrot.slane %v2818_v0, 2 }
  0xa9   : > { %759 = vrot.lane.b32.xlu1 %v3107_v4, %s2492_s7 }
  0xab   : > { %v546_v20 = vpop.permute.xlu1 %545 }
  0xac   : > { %v548_v23 = vpop.permute.xlu2 %547  ;;  %639 = vst.msk [vmem:[#allocation3 + $0x18] sm:$0xff] %vm635_vm5, %v546_v20 }
  0xad   : > { %640 = vst.msk [vmem:[#allocation3 + $0x20] sm:$0xff] %vm635_vm5, %v548_v23  ;;  %v692_v23 = vrot.slane %v2770_v47, 2  ;;  %v710_v47 = vrot.slane %v2850_v18, 2 }
  0xaf   : > { %757 = vrot.lane.b32.xlu0 %v3118_v48, %s2492_s7 }
  0xb0   : > { %749 = vrot.lane.b32.xlu2 %v671_v45, %s2492_s7  ;;  %v695_v45 = vrot.slane %v2762_v43, 2 }
  0xb1   : > { %765 = vrot.lane.b32.xlu1 %v3124_v3, %s2492_s7 }
  0xb2   : > { %v3144_v13 = vsel %vm668_vm4, %v695_v45, %v697_v24  ;;  %v705_v24 = vrot.slane %v2837_v14, 2  ;;  %v3158_v3 = vsel %vm668_vm4, %v694_v28, %v695_v45  ;;  %v3174_v45 = vsel %vm668_vm4, %v690_v33, %v692_v23 }
  0xb3   : > { %4414 = vst [vmem:[#allocation45_spill] sm:$0xff] %v3144_v13  ;;  %v712_v28 = vrot.slane %v2961_v54, 2  ;;  %v709_v33 = vrot.slane %v2844_v16, 2 }
  0xb4   : > { %v3165_v20 = vsel %vm668_vm4, %v704_v7, %v705_v24  ;;  %4416 = vst [vmem:[#allocation47_spill] sm:$0xff] %v3174_v45  ;;  %v3178_v7 = vsel %vm668_vm4, %v700_v41, %v702_v30 }
  0xb5   : > { %4415 = vst [vmem:[#allocation46_spill] sm:$0xff] %v3165_v20  ;;  %v3186_v0 = vsel %vm668_vm4, %v710_v47, %v712_v28  ;;  %v720_v28 = vrot.slane %v2895_v50, 2 }
  0xb6   : > { %4417 = vst [vmem:[#allocation48_spill] sm:$0xff] %v3178_v7 }
  0xb7   : > { %763 = vrot.lane.b32.xlu0 %v3136_v56, %s2492_s7  ;;  %4418 = vst [vmem:[#allocation49_spill] sm:$0xff] %v3186_v0 }
  0xb8   : > { %755 = vrot.lane.b32.xlu2 %v3132_v38, %s2492_s7 }
  0xb9   : > { %771 = vrot.lane.b32.xlu1 %v3144_v13, %s2492_s7  ;;  %v550_v13 = vpop.permute.xlu2 %549 }
  0xba   : > { %641 = vst.msk [vmem:[#allocation3 + $0x28] sm:$0xff] %vm635_vm5, %v550_v13  ;;  %v699_v13 = vrot.slane %v2789_v52, 2 }
  0xbc   : > { %v3195_v30 = vsel %vm668_vm4, %v699_v13, %v700_v41  ;;  %v707_v41 = vrot.slane %v2865_v25, 2  ;;  %v715_v13 = vrot.slane %v2874_v31, 2 }
  0xbd   : > { %v542_v54 = vpop.permute.xlu0 %541 }
  0xbe   : > { %637 = vst.msk [vmem:[#allocation3 + $0x8] sm:$0xff] %vm635_vm5, %v542_v54  ;;  %v717_v54 = vrot.slane %v2891_v44, 2  ;;  %v725_v44 = vrot.slane %v2935_v10, 2 }
  0xbf   : > { %769 = vrot.lane.b32.xlu0 %v3158_v3, %s2492_s7 }
  0xc0   : > { %761 = vrot.lane.b32.xlu2 %v3153_v51, %s2492_s7  ;;  %v3222_v25 = vsel %vm668_vm4, %v715_v13, %v717_v54 }
  0xc1   : > { %777 = vrot.lane.b32.xlu1 %v3165_v20, %s2492_s7  ;;  %v556_v23 = vpop.permute.xlu2 %555  ;;  %v719_v20 = vrot.slane %v2921_v49, 2  ;;  %4420 = vst [vmem:[#allocation51_spill] sm:$0xff] %v3222_v25 }
  0xc2   : > { %644 = vst.msk [vmem:[#allocation3 + $0x40] sm:$0xff] %vm635_vm5, %v556_v23 }
  0xc3   : > { %v3208_v23 = vsel %vm668_vm4, %v719_v20, %v720_v28  ;;  %v727_v20 = vrot.slane %v3037_v55, 2  ;;  %v724_v55 = vrot.slane %v2929_v5, 2 }
  0xc4   : > { %4419 = vst [vmem:[#allocation50_spill] sm:$0xff] %v3208_v23 }
  0xc7   : > { %775 = vrot.lane.b32.xlu0 %v3178_v7, %s2492_s7  ;;  %v3200_v7 = vsel %vm668_vm4, %v709_v33, %v710_v47  ;;  %v552_v33 = vpop.permute.xlu0 %551 }
  0xc8   : > { %767 = vrot.lane.b32.xlu2 %v3174_v45, %s2492_s7  ;;  %v554_v45 = vpop.permute.xlu1 %553  ;;  %642 = vst.msk [vmem:[#allocation3 + $0x30] sm:$0xff] %vm635_vm5, %v552_v33  ;;  %v734_v33 = vrot.slane %v2998_v11, 2 }
  0xc9   : > { %783 = vrot.lane.b32.xlu1 %v3186_v0, %s2492_s7  ;;  %643 = vst.msk [vmem:[#allocation3 + $0x38] sm:$0xff] %vm635_vm5, %v554_v45  ;;  %v562_v47 = vpop.permute.xlu2 %561  ;;  %v3218_v45 = vsel %vm668_vm4, %v705_v24, %v707_v41  ;;  %v714_v24 = vrot.slane %v2861_v22, 2 }
  0xca   : > { %647 = vst.msk [vmem:[#allocation3 + $0x58] sm:$0xff] %vm635_vm5, %v562_v47  ;;  %v3231_v47 = vsel %vm668_vm4, %v725_v44, %v727_v20  ;;  %v735_v20 = vrot.slane %v2966_v58, 2 }
  0xcb   : > { %4421 = vst [vmem:[#allocation52_spill] sm:$0xff] %v3231_v47 }
  0xcf   : > { %781 = vrot.lane.b32.xlu0 %v3200_v7, %s2492_s7  ;;  %v558_v54 = vpop.permute.xlu0 %557 }
  0xd0   : > { %773 = vrot.lane.b32.xlu2 %v3195_v30, %s2492_s7  ;;  %v560_v0 = vpop.permute.xlu1 %559  ;;  %645 = vst.msk [vmem:[#allocation3 + $0x48] sm:$0xff] %vm635_vm5, %v558_v54  ;;  %v732_v54 = vrot.slane %v2983_v21, 2  ;;  %v740_v21 = vrot.slane %v3003_v2, 2 }
  0xd1   : > { %789 = vrot.lane.b32.xlu1 %v3208_v23, %s2492_s7  ;;  %646 = vst.msk [vmem:[#allocation3 + $0x50] sm:$0xff] %vm635_vm5, %v560_v0  ;;  %v568_v41 = vpop.permute.xlu2 %567  ;;  %v3240_v0 = vsel %vm668_vm4, %v714_v24, %v715_v13  ;;  %v3245_v23 = vsel %vm668_vm4, %v724_v55, %v725_v44  ;;  %v722_v13 = vrot.slane %v2964_v39, 2  ;;  %v730_v24 = vrot.slane %v2952_v46, 2 }
  0xd2   : > { %650 = vst.msk [vmem:[#allocation3 + $0x70] sm:$0xff] %vm635_vm5, %v568_v41  ;;  %v3253_v41 = vsel %vm668_vm4, %v734_v33, %v735_v20  ;;  %v742_v33 = vrot.slane %v3082_v59, 2  ;;  %v739_v59 = vrot.slane %v2986_v1, 2 }
  0xd3   : > { %4422 = vst [vmem:[#allocation53_spill] sm:$0xff] %v3240_v0  ;;  %v3267_v39 = vsel %vm668_vm4, %v730_v24, %v732_v54 }
  0xd4   : > { %4423 = vst [vmem:[#allocation54_spill] sm:$0xff] %v3267_v39 }
  0xd7   : > { %787 = vrot.lane.b32.xlu0 %v3222_v25, %s2492_s7  ;;  %v564_v55 = vpop.permute.xlu0 %563 }
  0xd8   : > { %779 = vrot.lane.b32.xlu2 %v3218_v45, %s2492_s7  ;;  %v566_v25 = vpop.permute.xlu1 %565  ;;  %648 = vst.msk [vmem:[#allocation3 + $0x60] sm:$0xff] %vm635_vm5, %v564_v55  ;;  %v3288_v55 = vsel %vm668_vm4, %v739_v59, %v740_v21 }
  0xd9   : > { %795 = vrot.lane.b32.xlu1 %v3231_v47, %s2492_s7  ;;  %649 = vst.msk [vmem:[#allocation3 + $0x68] sm:$0xff] %vm635_vm5, %v566_v25  ;;  %v3263_v25 = vsel %vm668_vm4, %v720_v28, %v722_v13  ;;  %v729_v28 = vrot.slane %v2943_v19, 2 }
  0xdf   : > { %793 = vrot.lane.b32.xlu0 %v3245_v23, %s2492_s7  ;;  %v570_v54 = vpop.permute.xlu0 %569 }
  0xe0   : > { %785 = vrot.lane.b32.xlu2 %v3240_v0, %s2492_s7  ;;  %v572_v47 = vpop.permute.xlu1 %571  ;;  %651 = vst.msk [vmem:[#allocation3 + $0x78] sm:$0xff] %vm635_vm5, %v570_v54  ;;  %v745_v54 = vrot.slane %v3020_v32, 2 }
  0xe1   : > { %801 = vrot.lane.b32.xlu1 %v3253_v41, %s2492_s7  ;;  %652 = vst.msk [vmem:[#allocation3 + $0x80] sm:$0xff] %vm635_vm5, %v572_v47  ;;  %v3285_v47 = vsel %vm668_vm4, %v729_v28, %v730_v24 }
  0xe2   : > { %v574_v44 = vpop.permute.xlu2 %573 }
  0xe3   : > { %653 = vst.msk [vmem:[#allocation3 + $0x88] sm:$0xff] %vm635_vm5, %v574_v44  ;;  %v3276_v44 = vsel %vm668_vm4, %v740_v21, %v742_v33 }
  0xe4   : > { %4424 = vst [vmem:[#allocation55_spill] sm:$0xff] %v3276_v44 }
  0xe7   : > { %799 = vrot.lane.b32.xlu0 %v3267_v39, %s2492_s7 }
  0xe8   : > { %791 = vrot.lane.b32.xlu2 %v3263_v25, %s2492_s7  ;;  %v578_v33 = vpop.permute.xlu1 %577  ;;  %v576_v28 = vpop.permute.xlu0 %575 }
  0xe9   : > { %807 = vrot.lane.b32.xlu1 %v3276_v44, %s2492_s7  ;;  %655 = vst.msk [vmem:[#allocation3 + $0x98] sm:$0xff] %vm635_vm5, %v578_v33  ;;  %v747_v44 = vrot.slane %v3051_v62, 2  ;;  %v744_v62 = vrot.slane %v3012_v6, 2 }
  0xea   : > { %v580_v13 = vpop.permute.xlu2 %579  ;;  %654 = vst.msk [vmem:[#allocation3 + $0x90] sm:$0xff] %vm635_vm5, %v576_v28 }
  0xeb   : > { %656 = vst.msk [vmem:[#allocation3 + $0xa0] sm:$0xff] %vm635_vm5, %v580_v13  ;;  %v737_v13 = vrot.slane %v3039_v35, 2  ;;  %v3306_v59 = vsel %vm668_vm4, %v745_v54, %v747_v44 }
  0xec   : > { %4425 = vst [vmem:[#allocation56_spill] sm:$0xff] %v3306_v59 }
  0xed   : > { %v3303_v21 = vsel %vm668_vm4, %v735_v20, %v737_v13 }
  0xef   : > { %805 = vrot.lane.b32.xlu0 %v3288_v55, %s2492_s7 }
  0xf0   : > { %797 = vrot.lane.b32.xlu2 %v3285_v47, %s2492_s7  ;;  %v584_v35 = vpop.permute.xlu1 %583 }
  0xf1   : > { %880 = vrot.lane.b32.xlu1 %v2620_v8, %s2493_s8  ;;  %658 = vst.msk [vmem:[#allocation3 + $0xb0] sm:$0xff] %vm635_vm5, %v584_v35  ;;  %v3319_v8 = vsel %vm668_vm4, %v744_v62, %v745_v54 }
  0xf2   : > { %v586_v24 = vpop.permute.xlu2 %585 }
  0xf3   : > { %659 = vst.msk [vmem:[#allocation3 + $0xb8] sm:$0xff] %vm635_vm5, %v586_v24 }
  0xf7   : > { %811 = vrot.lane.b32.xlu0 %v3306_v59, %s2492_s7 }
  0xf8   : > { %803 = vrot.lane.b32.xlu2 %v3303_v21, %s2492_s7 }
  0xf9   : > { %v582_v24 = vpop.permute.xlu0 %581  ;;  %886 = vrot.lane.b32.xlu1 %v2748_v37, %s2493_s8 }
  0xfa   : > { %v592_v33 = vpop.permute.xlu2 %591  ;;  %657 = vst.msk [vmem:[#allocation3 + $0xa8] sm:$0xff] %vm635_vm5, %v582_v24 }
  0xfb   : > { %662 = vst.msk [vmem:[#allocation3 + $0xd0] sm:$0xff] %vm635_vm5, %v592_v33  ;;  %v590_v20 = vpop.permute.xlu1 %589 }
  0xfc   : > { %661 = vst.msk [vmem:[#allocation3 + $0xc8] sm:$0xff] %vm635_vm5, %v590_v20 }
  0xff   : > { %884 = vrot.lane.b32.xlu0 %v2744_v36, %s2493_s8 }
 0x100   : > { %809 = vrot.lane.b32.xlu2 %v3319_v8, %s2492_s7  ;;  %s4228_s7 = sshll.u32 %s2169_s22, 4  ;;  %s2174_s7 = int_to_ptr.hbm [resolvable:$true] %s4228_s7 }
 0x101   : > { %v588_v13 = vpop.permute.xlu0 %587  ;;  %892 = vrot.lane.b32.xlu1 %v2799_v57, %s2493_s8 }
 0x102   : > { %v598_v44 = vpop.permute.xlu2 %597  ;;  %660 = vst.msk [vmem:[#allocation3 + $0xc0] sm:$0xff] %vm635_vm5, %v588_v13 }
 0x103   : > { %665 = vst.msk [vmem:[#allocation3 + $0xe8] sm:$0xff] %vm635_vm5, %v598_v44  ;;  %v596_v54 = vpop.permute.xlu1 %595 }
 0x104   : > { %664 = vst.msk [vmem:[#allocation3 + $0xe0] sm:$0xff] %vm635_vm5, %v596_v54 }
 0x107   : > { %890 = vrot.lane.b32.xlu0 %v2724_v29, %s2493_s8 }
 0x108   : > { %882 = vrot.lane.b32.xlu2 %v2624_v9, %s2493_s8 }
 0x109   : > { %v594_v35 = vpop.permute.xlu0 %593  ;;  %898 = vrot.lane.b32.xlu1 %v2762_v43, %s2493_s8 }
 0x10a   : > { %v750_v28 = vpop.permute.xlu2 %749  ;;  %663 = vst.msk [vmem:[#allocation3 + $0xd8] sm:$0xff] %vm635_vm5, %v594_v35 }
 0x10b   : > { %846 = vst.msk [vmem:[#allocation3] sm:$0xff] %vm845_vm6, %v750_v28  ;;  %v602_v62 = vpop.permute.xlu1 %601 }
 0x10c   : > { %667 = vst.msk [vmem:[#allocation3 + $0xf8] sm:$0xff] %vm635_vm5, %v602_v62  ;;  %v247_v62 = vld [vmem:[%s2590_s5 + $0xf0] sm:$0xff] }
 0x10d   : > { %322 = vst.msk [vmem:[#allocation2 + $0x181] sm:$0xff] %vm249_vm0, %v247_v62 }
 0x10f   : > { %896 = vrot.lane.b32.xlu0 %v2756_v40, %s2493_s8 }
 0x110   : > { %888 = vrot.lane.b32.xlu2 %v2717_v26, %s2493_s8 }
 0x111   : > { %v600_v33 = vpop.permute.xlu0 %599  ;;  %904 = vrot.lane.b32.xlu1 %v2869_v27, %s2493_s8 }
 0x112   : > { %v756_v9 = vpop.permute.xlu2 %755  ;;  %666 = vst.msk [vmem:[#allocation3 + $0xf0] sm:$0xff] %vm635_vm5, %v600_v33 }
 0x113   : > { %849 = vst.msk [vmem:[#allocation3 + $0x18] sm:$0xff] %vm845_vm6, %v756_v9  ;;  %v754_v24 = vpop.permute.xlu1 %753 }
 0x114   : > { %848 = vst.msk [vmem:[#allocation3 + $0x10] sm:$0xff] %vm845_vm6, %v754_v24 }
 0x117   : > { %902 = vrot.lane.b32.xlu0 %v2816_v63, %s2493_s8 }
 0x118   : > { %894 = vrot.lane.b32.xlu2 %v2736_v34, %s2493_s8 }
 0x119   : > { %v752_v44 = vpop.permute.xlu0 %751  ;;  %910 = vrot.lane.b32.xlu1 %v2850_v18, %s2493_s8 }
 0x11a   : > { %v762_v20 = vpop.permute.xlu2 %761  ;;  %847 = vst.msk [vmem:[#allocation3 + $0x8] sm:$0xff] %vm845_vm6, %v752_v44 }
 0x11b   : > { %852 = vst.msk [vmem:[#allocation3 + $0x30] sm:$0xff] %vm845_vm6, %v762_v20  ;;  %v760_v13 = vpop.permute.xlu1 %759 }
 0x11c   : > { %851 = vst.msk [vmem:[#allocation3 + $0x28] sm:$0xff] %vm845_vm6, %v760_v13 }
 0x11f   : > { %908 = vrot.lane.b32.xlu0 %v2844_v16, %s2493_s8 }
 0x120   : > { %900 = vrot.lane.b32.xlu2 %v2789_v52, %s2493_s8 }
 0x121   : > { %v758_v28 = vpop.permute.xlu0 %757  ;;  %916 = vrot.lane.b32.xlu1 %v2921_v49, %s2493_s8 }
 0x122   : > { %v768_v54 = vpop.permute.xlu2 %767  ;;  %850 = vst.msk [vmem:[#allocation3 + $0x20] sm:$0xff] %vm845_vm6, %v758_v28 }
 0x123   : > { %855 = vst.msk [vmem:[#allocation3 + $0x48] sm:$0xff] %vm845_vm6, %v768_v54  ;;  %v766_v35 = vpop.permute.xlu1 %765  ;;  %v248_v54 = vld [vmem:[%s2590_s5 + $0xf8] sm:$0xff]  ;;  %s206_s5 = scalar_lea.vmem [#allocation6], %s4210_s27 }
 0x124   : > { %854 = vst.msk [vmem:[#allocation3 + $0x40] sm:$0xff] %vm845_vm6, %v766_v35  ;;  %s4226_s6 = sshll.u32 %s206_s5, 4  ;;  %s2172_s6 = int_to_ptr.vmem [resolvable:$true] %s4226_s6 }
 0x125   : > { %323 = vst.msk [vmem:[#allocation2 + $0x189] sm:$0xff] %vm249_vm0, %v248_v54  ;;  %vm2031_vm0 = vcmask 57344  }
 0x127   : > { %914 = vrot.lane.b32.xlu0 %v2874_v31, %s2493_s8  ;;  %v4438_v31 = vld [vmem:[#allocation30_spill] sm:$0xff] }
 0x128   : > { %906 = vrot.lane.b32.xlu2 %v2837_v14, %s2493_s8 }
 0x129   : > { %v764_v33 = vpop.permute.xlu0 %763  ;;  %922 = vrot.lane.b32.xlu1 %v2935_v10, %s2493_s8 }
 0x12a   : > { %v774_v9 = vpop.permute.xlu2 %773  ;;  %853 = vst.msk [vmem:[#allocation3 + $0x38] sm:$0xff] %vm845_vm6, %v764_v33 }
 0x12b   : > { %858 = vst.msk [vmem:[#allocation3 + $0x60] sm:$0xff] %vm845_vm6, %v774_v9  ;;  %v772_v24 = vpop.permute.xlu1 %771  ;;  %v3402_v9 = vld [vmem:[#allocation2 + $0x180] sm:$0xff] }
 0x12c   : > { %857 = vst.msk [vmem:[#allocation3 + $0x58] sm:$0xff] %vm845_vm6, %v772_v24 }
 0x12d   : > { %4426 = vst [vmem:[#allocation57_spill] sm:$0xff] %v3402_v9 }
 0x12f   : > { %920 = vrot.lane.b32.xlu0 %v2929_v5, %s2493_s8 }
 0x130   : > { %912 = vrot.lane.b32.xlu2 %v2861_v22, %s2493_s8 }
 0x131   : > { %v770_v44 = vpop.permute.xlu0 %769  ;;  %928 = vrot.lane.b32.xlu1 %v2998_v11, %s2493_s8 }
 0x132   : > { %v780_v20 = vpop.permute.xlu2 %779  ;;  %856 = vst.msk [vmem:[#allocation3 + $0x50] sm:$0xff] %vm845_vm6, %v770_v44 }
 0x133   : > { %861 = vst.msk [vmem:[#allocation3 + $0x78] sm:$0xff] %vm845_vm6, %v780_v20  ;;  %v778_v13 = vpop.permute.xlu1 %777 }
 0x134   : > { %860 = vst.msk [vmem:[#allocation3 + $0x70] sm:$0xff] %vm845_vm6, %v778_v13 }
 0x137   : > { %926 = vrot.lane.b32.xlu0 %v2952_v46, %s2493_s8 }
 0x138   : > { %918 = vrot.lane.b32.xlu2 %v2895_v50, %s2493_s8 }
 0x139   : > { %v776_v35 = vpop.permute.xlu0 %775  ;;  %934 = vrot.lane.b32.xlu1 %v3003_v2, %s2493_s8 }
 0x13a   : > { %v786_v28 = vpop.permute.xlu2 %785  ;;  %859 = vst.msk [vmem:[#allocation3 + $0x68] sm:$0xff] %vm845_vm6, %v776_v35 }
 0x13b   : > { %864 = vst.msk [vmem:[#allocation3 + $0x90] sm:$0xff] %vm845_vm6, %v786_v28  ;;  %v784_v62 = vpop.permute.xlu1 %783 }
 0x13c   : > { %863 = vst.msk [vmem:[#allocation3 + $0x88] sm:$0xff] %vm845_vm6, %v784_v62  ;;  %v3426_v62 = vld [vmem:[#allocation2 + $0x188] sm:$0xff] }
 0x13d   : > { %4427 = vst [vmem:[#allocation58_spill] sm:$0xff] %v3426_v62 }
 0x13f   : > { %932 = vrot.lane.b32.xlu0 %v2986_v1, %s2493_s8 }
 0x140   : > { %924 = vrot.lane.b32.xlu2 %v2943_v19, %s2493_s8 }
 0x141   : > { %v782_v24 = vpop.permute.xlu0 %781  ;;  %940 = vrot.lane.b32.xlu1 %v3402_v9, %s2493_s8 }
 0x142   : > { %v792_v33 = vpop.permute.xlu2 %791  ;;  %862 = vst.msk [vmem:[#allocation3 + $0x80] sm:$0xff] %vm845_vm6, %v782_v24 }
 0x143   : > { %867 = vst.msk [vmem:[#allocation3 + $0xa8] sm:$0xff] %vm845_vm6, %v792_v33  ;;  %v790_v20 = vpop.permute.xlu1 %789 }
 0x144   : > { %866 = vst.msk [vmem:[#allocation3 + $0xa0] sm:$0xff] %vm845_vm6, %v790_v20  ;;  %v4428_v20 = vld [vmem:[#allocation12_spill] sm:$0xff] }
 0x147   : > { %938 = vrot.lane.b32.xlu0 %v3020_v32, %s2493_s8 }
 0x148   : > { %930 = vrot.lane.b32.xlu2 %v2966_v58, %s2493_s8  ;;  %v4435_v58 = vld [vmem:[#allocation25_spill] sm:$0xff] }
 0x149   : > { %v788_v13 = vpop.permute.xlu0 %787  ;;  %1017 = vrot.lane.b32.xlu1 %v2679_v15, %s2494_s9 }
 0x14a   : > { %v798_v44 = vpop.permute.xlu2 %797  ;;  %865 = vst.msk [vmem:[#allocation3 + $0x98] sm:$0xff] %vm845_vm6, %v788_v13 }
 0x14b   : > { %870 = vst.msk [vmem:[#allocation3 + $0xc0] sm:$0xff] %vm845_vm6, %v798_v44  ;;  %v796_v54 = vpop.permute.xlu1 %795  ;;  %v4429_v44 = vld [vmem:[#allocation15_spill] sm:$0xff] }
 0x14c   : > { %869 = vst.msk [vmem:[#allocation3 + $0xb8] sm:$0xff] %vm845_vm6, %v796_v54 }
 0x14f   : > { %1015 = vrot.lane.b32.xlu0 %v2635_v12, %s2494_s9 }
 0x150   : > { %936 = vrot.lane.b32.xlu2 %v3012_v6, %s2493_s8  ;;  %v4444_v6 = vld [vmem:[#allocation39_spill] sm:$0xff] }
 0x151   : > { %v794_v35 = vpop.permute.xlu0 %793  ;;  %1023 = vrot.lane.b32.xlu1 %v2760_v42, %s2494_s9 }
 0x152   : > { %v804_v28 = vpop.permute.xlu2 %803  ;;  %868 = vst.msk [vmem:[#allocation3 + $0xb0] sm:$0xff] %vm845_vm6, %v794_v35 }
 0x153   : > { %873 = vst.msk [vmem:[#allocation3 + $0xd8] sm:$0xff] %vm845_vm6, %v804_v28  ;;  %v802_v15 = vpop.permute.xlu1 %801  ;;  %v4430_v28 = vld [vmem:[#allocation17_spill] sm:$0xff] }
 0x154   : > { %872 = vst.msk [vmem:[#allocation3 + $0xd0] sm:$0xff] %vm845_vm6, %v802_v15  ;;  %v4431_v15 = vld [vmem:[#allocation10_spill] sm:$0xff] }
 0x157   : > { %1021 = vrot.lane.b32.xlu0 %v2808_v60, %s2494_s9 }
 0x158   : > { %942 = vrot.lane.b32.xlu2 %v3426_v62, %s2493_s8 }
 0x159   : > { %v800_v33 = vpop.permute.xlu0 %799  ;;  %1029 = vrot.lane.b32.xlu1 %v2812_v61, %s2494_s9 }
 0x15a   : > { %v810_v12 = vpop.permute.xlu2 %809  ;;  %871 = vst.msk [vmem:[#allocation3 + $0xc8] sm:$0xff] %vm845_vm6, %v800_v33 }
 0x15b   : > { %876 = vst.msk [vmem:[#allocation3 + $0xf0] sm:$0xff] %vm845_vm6, %v810_v12  ;;  %v808_v24 = vpop.permute.xlu1 %807  ;;  %v4432_v12 = vld [vmem:[#allocation21_spill] sm:$0xff] }
 0x15c   : > { %875 = vst.msk [vmem:[#allocation3 + $0xe8] sm:$0xff] %vm845_vm6, %v808_v24 }
 0x15f   : > { %1027 = vrot.lane.b32.xlu0 %v4429_v44, %s2494_s9 }
 0x160   : > { %1019 = vrot.lane.b32.xlu2 %v4428_v20, %s2494_s9 }
 0x161   : > { %v806_v54 = vpop.permute.xlu0 %805  ;;  %1035 = vrot.lane.b32.xlu1 %v4430_v28, %s2494_s9 }
 0x162   : > { %v883_v13 = vpop.permute.xlu2 %882  ;;  %874 = vst.msk [vmem:[#allocation3 + $0xe0] sm:$0xff] %vm845_vm6, %v806_v54 }
 0x163   : > { %978 = vst.msk [vmem:[#allocation3 + $0x8] sm:$0xff] %vm976_vm7, %v883_v13  ;;  %v881_v35 = vpop.permute.xlu1 %880  ;;  %v4433_v13 = vld [vmem:[#allocation22_spill] sm:$0xff] }
 0x164   : > { %977 = vst.msk [vmem:[#allocation3] sm:$0xff] %vm976_vm7, %v881_v35  ;;  %v4434_v35 = vld [vmem:[#allocation13_spill] sm:$0xff] }
 0x167   : > { %1033 = vrot.lane.b32.xlu0 %v4432_v12, %s2494_s9 }
 0x168   : > { %1025 = vrot.lane.b32.xlu2 %v4431_v15, %s2494_s9 }
 0x169   : > { %v812_v24 = vpop.permute.xlu0 %811  ;;  %1041 = vrot.lane.b32.xlu1 %v4433_v13, %s2494_s9 }
 0x16a   : > { %v889_v33 = vpop.permute.xlu2 %888  ;;  %877 = vst.msk [vmem:[#allocation3 + $0xf8] sm:$0xff] %vm845_vm6, %v812_v24 }
 0x16b   : > { %981 = vst.msk [vmem:[#allocation3 + $0x20] sm:$0xff] %vm976_vm7, %v889_v33  ;;  %v887_v54 = vpop.permute.xlu1 %886  ;;  %v4436_v33 = vld [vmem:[#allocation27_spill] sm:$0xff] }
 0x16c   : > { %980 = vst.msk [vmem:[#allocation3 + $0x18] sm:$0xff] %vm976_vm7, %v887_v54  ;;  %v4437_v54 = vld [vmem:[#allocation14_spill] sm:$0xff] }
 0x16f   : > { %1039 = vrot.lane.b32.xlu0 %v4435_v58, %s2494_s9 }
 0x170   : > { %1031 = vrot.lane.b32.xlu2 %v4434_v35, %s2494_s9 }
 0x171   : > { %v885_v59 = vpop.permute.xlu0 %884  ;;  %1047 = vrot.lane.b32.xlu1 %v4436_v33, %s2494_s9  ;;  %v4441_v33 = vld [vmem:[#allocation36_spill] sm:$0xff] }
 0x172   : > { %v895_v11 = vpop.permute.xlu2 %894  ;;  %979 = vst.msk [vmem:[#allocation3 + $0x10] sm:$0xff] %vm976_vm7, %v885_v59 }
 0x173   : > { %984 = vst.msk [vmem:[#allocation3 + $0x38] sm:$0xff] %vm976_vm7, %v895_v11  ;;  %v893_v24 = vpop.permute.xlu1 %892  ;;  %v4439_v11 = vld [vmem:[#allocation32_spill] sm:$0xff] }
 0x174   : > { %983 = vst.msk [vmem:[#allocation3 + $0x30] sm:$0xff] %vm976_vm7, %v893_v24  ;;  %v4440_v24 = vld [vmem:[#allocation20_spill] sm:$0xff] }
 0x177   : > { %1045 = vrot.lane.b32.xlu0 %v4438_v31, %s2494_s9  ;;  %v3496_v31 = vld [vmem:[#allocation2 + $0x190] sm:$0x3] }
 0x178   : > { %1037 = vrot.lane.b32.xlu2 %v4437_v54, %s2494_s9  ;;  %4448 = vst [vmem:[#allocation12_spill] sm:$0xff] %v3496_v31 }
 0x179   : > { %v891_v32 = vpop.permute.xlu0 %890  ;;  %1053 = vrot.lane.b32.xlu1 %v4439_v11, %s2494_s9 }
 0x17a   : > { %v901_v46 = vpop.permute.xlu2 %900  ;;  %982 = vst.msk [vmem:[#allocation3 + $0x28] sm:$0xff] %vm976_vm7, %v891_v32  ;;  %v4442_v32 = vld [vmem:[#allocation37_spill] sm:$0xff] }
 0x17b   : > { %987 = vst.msk [vmem:[#allocation3 + $0x50] sm:$0xff] %vm976_vm7, %v901_v46  ;;  %v899_v59 = vpop.permute.xlu1 %898 }
 0x17c   : > { %986 = vst.msk [vmem:[#allocation3 + $0x48] sm:$0xff] %vm976_vm7, %v899_v59  ;;  %v4443_v59 = vld [vmem:[#allocation23_spill] sm:$0xff] }
 0x17f   : > { %1051 = vrot.lane.b32.xlu0 %v4441_v33, %s2494_s9 }
 0x180   : > { %1043 = vrot.lane.b32.xlu2 %v4440_v24, %s2494_s9 }
 0x181   : > { %v897_v19 = vpop.permute.xlu0 %896  ;;  %1059 = vrot.lane.b32.xlu1 %v4442_v32, %s2494_s9 }
 0x182   : > { %v907_v22 = vpop.permute.xlu2 %906  ;;  %985 = vst.msk [vmem:[#allocation3 + $0x40] sm:$0xff] %vm976_vm7, %v897_v19 }
 0x183   : > { %990 = vst.msk [vmem:[#allocation3 + $0x68] sm:$0xff] %vm976_vm7, %v907_v22  ;;  %v905_v46 = vpop.permute.xlu1 %904  ;;  %v4445_v22 = vld [vmem:[#allocation40_spill] sm:$0xff] }
 0x184   : > { %989 = vst.msk [vmem:[#allocation3 + $0x60] sm:$0xff] %vm976_vm7, %v905_v46  ;;  %v4446_v46 = vld [vmem:[#allocation29_spill] sm:$0xff] }
 0x187   : > { %1057 = vrot.lane.b32.xlu0 %v4444_v6, %s2494_s9 }
 0x188   : > { %1049 = vrot.lane.b32.xlu2 %v4443_v59, %s2494_s9  ;;  %v4447_v59 = vld [vmem:[#allocation42_spill] sm:$0xff] }
 0x189   : > { %v903_v12 = vpop.permute.xlu0 %902  ;;  %1065 = vrot.lane.b32.xlu1 %v4445_v22, %s2494_s9  ;;  %v1011_v22 = vrot.slane %v3426_v62, 1 }
 0x18a   : > { %v913_v18 = vpop.permute.xlu2 %912  ;;  %988 = vst.msk [vmem:[#allocation3 + $0x58] sm:$0xff] %vm976_vm7, %v903_v12  ;;  %v1013_v12 = vrot.slane %v3496_v31, 1 }
 0x18b   : > { %993 = vst.msk [vmem:[#allocation3 + $0x80] sm:$0xff] %vm976_vm7, %v913_v18  ;;  %v911_v19 = vpop.permute.xlu1 %910  ;;  %v4449_v18 = vld [vmem:[#allocation43_spill] sm:$0xff] }
 0x18c   : > { %992 = vst.msk [vmem:[#allocation3 + $0x78] sm:$0xff] %vm976_vm7, %v911_v19 }
 0x18f   : > { %1063 = vrot.lane.b32.xlu0 %v4447_v59, %s2494_s9  ;;  %v4450_v59 = vld [vmem:[#allocation34_spill] sm:$0xff] }
 0x190   : > { %1055 = vrot.lane.b32.xlu2 %v4446_v46, %s2494_s9 }
 0x191   : > { %v909_v43 = vpop.permute.xlu0 %908  ;;  %1071 = vrot.lane.b32.xlu1 %v4449_v18, %s2494_s9 }
 0x192   : > { %v919_v32 = vpop.permute.xlu2 %918  ;;  %991 = vst.msk [vmem:[#allocation3 + $0x70] sm:$0xff] %vm976_vm7, %v909_v43  ;;  %v1010_v43 = vrot.slane %v3402_v9, 1 }
 0x193   : > { %996 = vst.msk [vmem:[#allocation3 + $0x98] sm:$0xff] %vm976_vm7, %v919_v32  ;;  %v917_v19 = vpop.permute.xlu1 %916  ;;  %v3510_v32 = vsel %vm458_vm2, %v1011_v22, %v1013_v12  ;;  %v4453_v12 = vld [vmem:[#allocation38_spill] sm:$0xff] }
 0x194   : > { %995 = vst.msk [vmem:[#allocation3 + $0x90] sm:$0xff] %vm976_vm7, %v917_v19  ;;  %v3518_v19 = vsel %vm458_vm2, %v1010_v43, %v1011_v22 }
 0x195   : > { %4451 = vst [vmem:[#allocation15_spill] sm:$0xff] %v3510_v32 }
 0x196   : > { %4452 = vst [vmem:[#allocation17_spill] sm:$0xff] %v3518_v19 }
 0x197   : > { %1069 = vrot.lane.b32.xlu0 %v3098_v17, %s2494_s9 }
 0x198   : > { %1061 = vrot.lane.b32.xlu2 %v4450_v59, %s2494_s9 }
 0x199   : > { %v915_v18 = vpop.permute.xlu0 %914  ;;  %1077 = vrot.lane.b32.xlu1 %v3510_v32, %s2494_s9 }
 0x19a   : > { %v925_v6 = vpop.permute.xlu2 %924  ;;  %994 = vst.msk [vmem:[#allocation3 + $0x88] sm:$0xff] %vm976_vm7, %v915_v18 }
 0x19b   : > { %999 = vst.msk [vmem:[#allocation3 + $0xb0] sm:$0xff] %vm976_vm7, %v925_v6  ;;  %v923_v31 = vpop.permute.xlu1 %922 }
 0x19c   : > { %998 = vst.msk [vmem:[#allocation3 + $0xa8] sm:$0xff] %vm976_vm7, %v923_v31  ;;  %v4454_v31 = vld [vmem:[#allocation41_spill] sm:$0xff] }
 0x19f   : > { %1075 = vrot.lane.b32.xlu0 %v3518_v19, %s2494_s9 }
 0x1a0   : > { %1067 = vrot.lane.b32.xlu2 %v4453_v12, %s2494_s9 }
 0x1a1   : > { %v921_v9 = vpop.permute.xlu0 %920  ;;  %1153 = vrot.lane.b32.xlu1 %v3118_v48, %s2495_s10 }
 0x1a2   : > { %v931_v62 = vpop.permute.xlu2 %930  ;;  %997 = vst.msk [vmem:[#allocation3 + $0xa0] sm:$0xff] %vm976_vm7, %v921_v9 }
 0x1a3   : > { %1002 = vst.msk [vmem:[#allocation3 + $0xc8] sm:$0xff] %vm976_vm7, %v931_v62  ;;  %v929_v6 = vpop.permute.xlu1 %928 }
 0x1a4   : > { %1001 = vst.msk [vmem:[#allocation3 + $0xc0] sm:$0xff] %vm976_vm7, %v929_v6 }
 0x1a7   : > { %1151 = vrot.lane.b32.xlu0 %v3132_v38, %s2495_s10 }
 0x1a8   : > { %1073 = vrot.lane.b32.xlu2 %v4454_v31, %s2494_s9 }
 0x1a9   : > { %v927_v18 = vpop.permute.xlu0 %926  ;;  %1159 = vrot.lane.b32.xlu1 %v3136_v56, %s2495_s10 }
 0x1aa   : > { %v937_v22 = vpop.permute.xlu2 %936  ;;  %1000 = vst.msk [vmem:[#allocation3 + $0xb8] sm:$0xff] %vm976_vm7, %v927_v18  ;;  %v4456_v18 = vld [vmem:[#allocation48_spill] sm:$0xff] }
 0x1ab   : > { %1005 = vst.msk [vmem:[#allocation3 + $0xe0] sm:$0xff] %vm976_vm7, %v937_v22  ;;  %v935_v9 = vpop.permute.xlu1 %934 }
 0x1ac   : > { %1004 = vst.msk [vmem:[#allocation3 + $0xd8] sm:$0xff] %vm976_vm7, %v935_v9 }
 0x1af   : > { %1157 = vrot.lane.b32.xlu0 %v3153_v51, %s2495_s10 }
 0x1b0   : > { %1149 = vrot.lane.b32.xlu2 %v3089_v53, %s2495_s10  ;;  %v4455_v53 = vld [vmem:[#allocation47_spill] sm:$0xff] }
 0x1b1   : > { %v933_v38 = vpop.permute.xlu0 %932  ;;  %1165 = vrot.lane.b32.xlu1 %v3158_v3, %s2495_s10 }
 0x1b2   : > { %v943_v62 = vpop.permute.xlu2 %942  ;;  %1003 = vst.msk [vmem:[#allocation3 + $0xd0] sm:$0xff] %vm976_vm7, %v933_v38 }
 0x1b3   : > { %1008 = vst.msk [vmem:[#allocation3 + $0xf8] sm:$0xff] %vm976_vm7, %v943_v62  ;;  %v941_v43 = vpop.permute.xlu1 %940  ;;  %v4457_v62 = vld [vmem:[#allocation44_spill] sm:$0xff] }
 0x1b4   : > { %1007 = vst.msk [vmem:[#allocation3 + $0xf0] sm:$0xff] %vm976_vm7, %v941_v43 }
 0x1b7   : > { %1163 = vrot.lane.b32.xlu0 %v4455_v53, %s2495_s10 }
 0x1b8   : > { %1155 = vrot.lane.b32.xlu2 %v3107_v4, %s2495_s10 }
 0x1b9   : > { %v939_v22 = vpop.permute.xlu0 %938  ;;  %1171 = vrot.lane.b32.xlu1 %v4456_v18, %s2495_s10 }
 0x1ba   : > { %v1020_v6 = vpop.permute.xlu2 %1019  ;;  %1006 = vst.msk [vmem:[#allocation3 + $0xe8] sm:$0xff] %vm976_vm7, %v939_v22  ;;  %v4458_v22 = vld [vmem:[#allocation45_spill] sm:$0xff] }
 0x1bb   : > { %1114 = vst.msk [vmem:[#allocation3 + $0x10] sm:$0xff] %vm1111_vm8, %v1020_v6  ;;  %v1018_v9 = vpop.permute.xlu1 %1017 }
 0x1bc   : > { %1113 = vst.msk [vmem:[#allocation3 + $0x8] sm:$0xff] %vm1111_vm8, %v1018_v9 }
 0x1bf   : > { %1169 = vrot.lane.b32.xlu0 %v3195_v30, %s2495_s10 }
 0x1c0   : > { %1161 = vrot.lane.b32.xlu2 %v4457_v62, %s2495_s10 }
 0x1c1   : > { %v1016_v43 = vpop.permute.xlu0 %1015  ;;  %1177 = vrot.lane.b32.xlu1 %v3200_v7, %s2495_s10 }
 0x1c2   : > { %v1026_v38 = vpop.permute.xlu2 %1025  ;;  %1112 = vst.msk [vmem:[#allocation3] sm:$0xff] %vm1111_vm8, %v1016_v43 }
 0x1c3   : > { %1117 = vst.msk [vmem:[#allocation3 + $0x28] sm:$0xff] %vm1111_vm8, %v1026_v38  ;;  %v1024_v6 = vpop.permute.xlu1 %1023  ;;  %v4459_v38 = vld [vmem:[#allocation51_spill] sm:$0xff] }
 0x1c4   : > { %1116 = vst.msk [vmem:[#allocation3 + $0x20] sm:$0xff] %vm1111_vm8, %v1024_v6  ;;  %v4460_v6 = vld [vmem:[#allocation46_spill] sm:$0xff] }
 0x1c7   : > { %1175 = vrot.lane.b32.xlu0 %v3218_v45, %s2495_s10 }
 0x1c8   : > { %1167 = vrot.lane.b32.xlu2 %v4458_v22, %s2495_s10 }
 0x1c9   : > { %v1022_v32 = vpop.permute.xlu0 %1021  ;;  %1183 = vrot.lane.b32.xlu1 %v4459_v38, %s2495_s10 }
 0x1ca   : > { %v1032_v9 = vpop.permute.xlu2 %1031  ;;  %1115 = vst.msk [vmem:[#allocation3 + $0x18] sm:$0xff] %vm1111_vm8, %v1022_v32 }
 0x1cb   : > { %1120 = vst.msk [vmem:[#allocation3 + $0x40] sm:$0xff] %vm1111_vm8, %v1032_v9  ;;  %v1030_v43 = vpop.permute.xlu1 %1029  ;;  %v4461_v9 = vld [vmem:[#allocation49_spill] sm:$0xff] }
 0x1cc   : > { %1119 = vst.msk [vmem:[#allocation3 + $0x38] sm:$0xff] %vm1111_vm8, %v1030_v43 }
 0x1cf   : > { %1181 = vrot.lane.b32.xlu0 %v3240_v0, %s2495_s10 }
 0x1d0   : > { %1173 = vrot.lane.b32.xlu2 %v4460_v6, %s2495_s10 }
 0x1d1   : > { %v1028_v59 = vpop.permute.xlu0 %1027  ;;  %1189 = vrot.lane.b32.xlu1 %v3245_v23, %s2495_s10 }
 0x1d2   : > { %v1038_v19 = vpop.permute.xlu2 %1037  ;;  %1118 = vst.msk [vmem:[#allocation3 + $0x30] sm:$0xff] %vm1111_vm8, %v1028_v59 }
 0x1d3   : > { %1123 = vst.msk [vmem:[#allocation3 + $0x58] sm:$0xff] %vm1111_vm8, %v1038_v19  ;;  %v1036_v32 = vpop.permute.xlu1 %1035  ;;  %v4462_v19 = vld [vmem:[#allocation50_spill] sm:$0xff] }
 0x1d4   : > { %1122 = vst.msk [vmem:[#allocation3 + $0x50] sm:$0xff] %vm1111_vm8, %v1036_v32 }
 0x1d7   : > { %1187 = vrot.lane.b32.xlu0 %v3263_v25, %s2495_s10 }
 0x1d8   : > { %1179 = vrot.lane.b32.xlu2 %v4461_v9, %s2495_s10 }
 0x1d9   : > { %v1034_v38 = vpop.permute.xlu0 %1033  ;;  %1195 = vrot.lane.b32.xlu1 %v3267_v39, %s2495_s10 }
 0x1da   : > { %v1044_v43 = vpop.permute.xlu2 %1043  ;;  %1121 = vst.msk [vmem:[#allocation3 + $0x48] sm:$0xff] %vm1111_vm8, %v1034_v38 }
 0x1db   : > { %1126 = vst.msk [vmem:[#allocation3 + $0x70] sm:$0xff] %vm1111_vm8, %v1044_v43  ;;  %v1042_v59 = vpop.permute.xlu1 %1041  ;;  %v4463_v43 = vld [vmem:[#allocation52_spill] sm:$0xff] }
 0x1dc   : > { %1125 = vst.msk [vmem:[#allocation3 + $0x68] sm:$0xff] %vm1111_vm8, %v1042_v59 }
 0x1df   : > { %1193 = vrot.lane.b32.xlu0 %v3285_v47, %s2495_s10 }
 0x1e0   : > { %1185 = vrot.lane.b32.xlu2 %v4462_v19, %s2495_s10 }
 0x1e1   : > { %v1040_v0 = vpop.permute.xlu0 %1039  ;;  %1201 = vrot.lane.b32.xlu1 %v3288_v55, %s2495_s10 }
 0x1e2   : > { %v1050_v32 = vpop.permute.xlu2 %1049  ;;  %1124 = vst.msk [vmem:[#allocation3 + $0x60] sm:$0xff] %vm1111_vm8, %v1040_v0 }
 0x1e3   : > { %1129 = vst.msk [vmem:[#allocation3 + $0x88] sm:$0xff] %vm1111_vm8, %v1050_v32  ;;  %v1048_v38 = vpop.permute.xlu1 %1047 }
 0x1e4   : > { %1128 = vst.msk [vmem:[#allocation3 + $0x80] sm:$0xff] %vm1111_vm8, %v1048_v38 }
 0x1e7   : > { %1199 = vrot.lane.b32.xlu0 %v3303_v21, %s2495_s10 }
 0x1e8   : > { %1191 = vrot.lane.b32.xlu2 %v4463_v43, %s2495_s10 }
 0x1e9   : > { %v1046_v39 = vpop.permute.xlu0 %1045  ;;  %1280 = vrot.lane.b32.xlu1 %v2744_v36, %s2496_s11  ;;  %v4464_v36 = vld [vmem:[#allocation55_spill] sm:$0xff] }
 0x1ea   : > { %v1056_v59 = vpop.permute.xlu2 %1055  ;;  %1127 = vst.msk [vmem:[#allocation3 + $0x78] sm:$0xff] %vm1111_vm8, %v1046_v39 }
 0x1eb   : > { %1132 = vst.msk [vmem:[#allocation3 + $0xa0] sm:$0xff] %vm1111_vm8, %v1056_v59  ;;  %v1054_v0 = vpop.permute.xlu1 %1053 }
 0x1ec   : > { %1131 = vst.msk [vmem:[#allocation3 + $0x98] sm:$0xff] %vm1111_vm8, %v1054_v0 }
 0x1ef   : > { %1205 = vrot.lane.b32.xlu0 %v3319_v8, %s2495_s10 }
 0x1f0   : > { %1197 = vrot.lane.b32.xlu2 %v3253_v41, %s2495_s10 }
 0x1f1   : > { %v1052_v38 = vpop.permute.xlu0 %1051  ;;  %1282 = vrot.lane.b32.xlu1 %v2748_v37, %s2496_s11 }
 0x1f2   : > { %v1062_v32 = vpop.permute.xlu2 %1061  ;;  %1130 = vst.msk [vmem:[#allocation3 + $0x90] sm:$0xff] %vm1111_vm8, %v1052_v38 }
 0x1f3   : > { %1135 = vst.msk [vmem:[#allocation3 + $0xb8] sm:$0xff] %vm1111_vm8, %v1062_v32  ;;  %v1060_v39 = vpop.permute.xlu1 %1059 }
 0x1f4   : > { %1134 = vst.msk [vmem:[#allocation3 + $0xb0] sm:$0xff] %vm1111_vm8, %v1060_v39  ;;  %v1711_v39 = vld [vmem:[%s4282_s1 + $0x8] sm:$0xff] }
 0x1f7   : > { %1549 = vrot.lane.b32.xlu0 %v3118_v48, %s2497_s12 }
 0x1f8   : > { %1203 = vrot.lane.b32.xlu2 %v4464_v36, %s2495_s10 }
 0x1f9   : > { %v1058_v0 = vpop.permute.xlu0 %1057  ;;  %1284 = vrot.lane.b32.xlu1 %v2717_v26, %s2496_s11 }
 0x1fa   : > { %v1068_v59 = vpop.permute.xlu2 %1067  ;;  %1133 = vst.msk [vmem:[#allocation3 + $0xa8] sm:$0xff] %vm1111_vm8, %v1058_v0 }
 0x1fb   : > { %1138 = vst.msk [vmem:[#allocation3 + $0xd0] sm:$0xff] %vm1111_vm8, %v1068_v59  ;;  %v1066_v37 = vpop.permute.xlu1 %1065 }
 0x1fc   : > { %1137 = vst.msk [vmem:[#allocation3 + $0xc8] sm:$0xff] %vm1111_vm8, %v1066_v37 }
 0x1ff   : > { %1551 = vrot.lane.b32.xlu0 %v3107_v4, %s2497_s12 }
 0x200   : > { %1415 = vrot.lane.b32.xlu2 %v4428_v20, %s2498_s13 }
 0x201   : > { %v1064_v32 = vpop.permute.xlu0 %1063  ;;  %1431 = vrot.lane.b32.xlu1 %v4430_v28, %s2498_s13 }
 0x202   : > { %v1074_v48 = vpop.permute.xlu2 %1073  ;;  %1136 = vst.msk [vmem:[#allocation3 + $0xc0] sm:$0xff] %vm1111_vm8, %v1064_v32 }
 0x203   : > { %1141 = vst.msk [vmem:[#allocation3 + $0xe8] sm:$0xff] %vm1111_vm8, %v1074_v48  ;;  %v1072_v26 = vpop.permute.xlu1 %1071 }
 0x204   : > { %1140 = vst.msk [vmem:[#allocation3 + $0xe0] sm:$0xff] %vm1111_vm8, %v1072_v26 }
 0x207   : > { %1419 = vrot.lane.b32.xlu0 %v2760_v42, %s2498_s13 }
 0x208   : > { %1417 = vrot.lane.b32.xlu2 %v2808_v60, %s2498_s13 }
 0x209   : > { %v1070_v20 = vpop.permute.xlu0 %1069  ;;  %1286 = vrot.lane.b32.xlu1 %v2724_v29, %s2496_s11 }
 0x20a   : > { %v1150_v4 = vpop.permute.xlu2 %1149  ;;  %1139 = vst.msk [vmem:[#allocation3 + $0xd8] sm:$0xff] %vm1111_vm8, %v1070_v20 }
 0x20b   : > { %1246 = vst.msk [vmem:[#allocation3] sm:$0xff] %vm1245_vm9, %v1150_v4  ;;  %v1078_v28 = vpop.permute.xlu1 %1077 }
 0x20c   : > { %1143 = vst.msk [vmem:[#allocation3 + $0xf8] sm:$0xff] %vm1111_vm8, %v1078_v28 }
 0x20f   : > { %1565 = vrot.lane.b32.xlu0 %v3195_v30, %s2497_s12 }
 0x210   : > { %1296 = vrot.lane.b32.xlu2 %v2789_v52, %s2496_s11 }
 0x211   : > { %v1076_v42 = vpop.permute.xlu0 %1075  ;;  %1433 = vrot.lane.b32.xlu1 %v4437_v54, %s2498_s13 }
 0x212   : > { %v1156_v60 = vpop.permute.xlu2 %1155  ;;  %1142 = vst.msk [vmem:[#allocation3 + $0xf0] sm:$0xff] %vm1111_vm8, %v1076_v42 }
 0x213   : > { %1249 = vst.msk [vmem:[#allocation3 + $0x18] sm:$0xff] %vm1245_vm9, %v1156_v60  ;;  %v1154_v38 = vpop.permute.xlu1 %1153  ;;  %v4467_v60 = vld [vmem:[#allocation30_spill] sm:$0xff] }
 0x214   : > { %1248 = vst.msk [vmem:[#allocation3 + $0x10] sm:$0xff] %vm1245_vm9, %v1154_v38 }
 0x217   : > { %1421 = vrot.lane.b32.xlu0 %v4431_v15, %s2498_s13 }
 0x218   : > { %1553 = vrot.lane.b32.xlu2 %v3153_v51, %s2497_s12 }
 0x219   : > { %v1152_v52 = vpop.permute.xlu0 %1151  ;;  %1567 = vrot.lane.b32.xlu1 %v4456_v18, %s2497_s12 }
 0x21a   : > { %v1162_v29 = vpop.permute.xlu2 %1161  ;;  %1247 = vst.msk [vmem:[#allocation3 + $0x8] sm:$0xff] %vm1245_vm9, %v1152_v52 }
 0x21b   : > { %1252 = vst.msk [vmem:[#allocation3 + $0x30] sm:$0xff] %vm1245_vm9, %v1162_v29  ;;  %v1160_v30 = vpop.permute.xlu1 %1159 }
 0x21c   : > { %1251 = vst.msk [vmem:[#allocation3 + $0x28] sm:$0xff] %vm1245_vm9, %v1160_v30  ;;  %v4470_v30 = vld [vmem:[#allocation33_spill] sm:$0xff] }
 0x21f   : > { %1555 = vrot.lane.b32.xlu0 %v3136_v56, %s2497_s12 }
 0x220   : > { %1298 = vrot.lane.b32.xlu2 %v2816_v63, %s2496_s11 }
 0x221   : > { %v1158_v15 = vpop.permute.xlu0 %1157  ;;  %1288 = vrot.lane.b32.xlu1 %v2799_v57, %s2496_s11 }
 0x222   : > { %v1168_v51 = vpop.permute.xlu2 %1167  ;;  %1250 = vst.msk [vmem:[#allocation3 + $0x20] sm:$0xff] %vm1245_vm9, %v1158_v15 }
 0x223   : > { %1255 = vst.msk [vmem:[#allocation3 + $0x48] sm:$0xff] %vm1245_vm9, %v1168_v51  ;;  %v1166_v54 = vpop.permute.xlu1 %1165 }
 0x224   : > { %1254 = vst.msk [vmem:[#allocation3 + $0x40] sm:$0xff] %vm1245_vm9, %v1166_v54  ;;  %v4471_v54 = vld [vmem:[#allocation43_spill] sm:$0xff] }
 0x227   : > { %1581 = vrot.lane.b32.xlu0 %v4462_v19, %s2497_s12 }
 0x228   : > { %1312 = vrot.lane.b32.xlu2 %v2921_v49, %s2496_s11 }
 0x229   : > { %v1164_v56 = vpop.permute.xlu0 %1163  ;;  %1435 = vrot.lane.b32.xlu1 %v4435_v58, %s2498_s13 }
 0x22a   : > { %v1174_v63 = vpop.permute.xlu2 %1173  ;;  %1253 = vst.msk [vmem:[#allocation3 + $0x38] sm:$0xff] %vm1245_vm9, %v1164_v56  ;;  %v4472_v56 = vld [vmem:[#allocation24_spill] sm:$0xff] }
 0x22b   : > { %1258 = vst.msk [vmem:[#allocation3 + $0x60] sm:$0xff] %vm1245_vm9, %v1174_v63  ;;  %v1172_v18 = vpop.permute.xlu1 %1171 }
 0x22c   : > { %1257 = vst.msk [vmem:[#allocation3 + $0x58] sm:$0xff] %vm1245_vm9, %v1172_v18  ;;  %v4473_v18 = vld [vmem:[#allocation37_spill] sm:$0xff] }
 0x22f   : > { %1423 = vrot.lane.b32.xlu0 %v4429_v44, %s2498_s13 }
 0x230   : > { %1447 = vrot.lane.b32.xlu2 %v4441_v33, %s2498_s13 }
 0x231   : > { %v1170_v49 = vpop.permute.xlu0 %1169  ;;  %1569 = vrot.lane.b32.xlu1 %v4460_v6, %s2497_s12 }
 0x232   : > { %v1180_v57 = vpop.permute.xlu2 %1179  ;;  %1256 = vst.msk [vmem:[#allocation3 + $0x50] sm:$0xff] %vm1245_vm9, %v1170_v49 }
 0x233   : > { %1261 = vst.msk [vmem:[#allocation3 + $0x78] sm:$0xff] %vm1245_vm9, %v1180_v57  ;;  %v1178_v19 = vpop.permute.xlu1 %1177 }
 0x234   : > { %1260 = vst.msk [vmem:[#allocation3 + $0x70] sm:$0xff] %vm1245_vm9, %v1178_v19 }
 0x237   : > { %1557 = vrot.lane.b32.xlu0 %v4457_v62, %s2497_s12 }
 0x238   : > { %1300 = vrot.lane.b32.xlu2 %v2869_v27, %s2496_s11 }
 0x239   : > { %v1176_v44 = vpop.permute.xlu0 %1175  ;;  %1290 = vrot.lane.b32.xlu1 %v2736_v34, %s2496_s11  ;;  %v1714_v34 = vld [vmem:[%s4282_s1 + $0x20] sm:$0xf] }
 0x23a   : > { %v1186_v58 = vpop.permute.xlu2 %1185  ;;  %1259 = vst.msk [vmem:[#allocation3 + $0x68] sm:$0xff] %vm1245_vm9, %v1176_v44  ;;  %2289 = vmatpush.msk.msra.mxu0 %vm1812_vm10, %v1714_v34  ;;  %2326 = vmatpush.msk.msra.mxu1 %vm1812_vm10, %v1714_v34 }
 0x23b   : > { %1264 = vst.msk [vmem:[#allocation3 + $0x90] sm:$0xff] %vm1245_vm9, %v1186_v58  ;;  %v1184_v33 = vpop.permute.xlu1 %1183  ;;  %2327 = vmatpush.msk.msra.mxu2 %vm1812_vm10, %v1714_v34  ;;  %2328 = vmatpush.msk.msra.mxu3 %vm1812_vm10, %v1714_v34  ;;  %v4474_v58 = vld [vmem:[#allocation18_spill] sm:$0xff] }
 0x23c   : > { %1263 = vst.msk [vmem:[#allocation3 + $0x88] sm:$0xff] %vm1245_vm9, %v1184_v33 }
 0x23f   : > { %1583 = vrot.lane.b32.xlu0 %v3263_v25, %s2497_s12 }
 0x240   : > { %1314 = vrot.lane.b32.xlu2 %v2895_v50, %s2496_s11 }
 0x241   : > { %v1182_v62 = vpop.permute.xlu0 %1181  ;;  %1437 = vrot.lane.b32.xlu1 %v4433_v13, %s2498_s13  ;;  %v1712_v13 = vld [vmem:[%s4282_s1 + $0x10] sm:$0xff] }
 0x242   : > { %v1192_v27 = vpop.permute.xlu2 %1191  ;;  %1262 = vst.msk [vmem:[#allocation3 + $0x80] sm:$0xff] %vm1245_vm9, %v1182_v62 }
 0x243   : > { %1267 = vst.msk [vmem:[#allocation3 + $0xa8] sm:$0xff] %vm1245_vm9, %v1192_v27  ;;  %v1190_v6 = vpop.permute.xlu1 %1189 }
 0x244   : > { %1266 = vst.msk [vmem:[#allocation3 + $0xa0] sm:$0xff] %vm1245_vm9, %v1190_v6  ;;  %v4475_v6 = vld [vmem:[#allocation35_spill] sm:$0xff] }
 0x247   : > { %1425 = vrot.lane.b32.xlu0 %v2812_v61, %s2498_s13  ;;  %v1713_v61 = vld [vmem:[%s4282_s1 + $0x18] sm:$0xff] }
 0x248   : > { %1449 = vrot.lane.b32.xlu2 %v4439_v11, %s2498_s13  ;;  %1828 = vmatpush.msra.mxu0 %v1713_v61 }
 0x249   : > { %v1188_v25 = vpop.permute.xlu0 %1187  ;;  %1559 = vrot.lane.b32.xlu1 %v4455_v53, %s2497_s12  ;;  %2329 = vmatpush.msra.mxu1 %v1713_v61  ;;  %v1710_v53 = vld [vmem:[%s4282_s1] sm:$0xff] }
 0x24a   : > { %v1198_v50 = vpop.permute.xlu2 %1197  ;;  %1265 = vst.msk [vmem:[#allocation3 + $0x98] sm:$0xff] %vm1245_vm9, %v1188_v25  ;;  %2330 = vmatpush.msra.mxu2 %v1713_v61  ;;  %2331 = vmatpush.msra.mxu3 %v1713_v61 }
 0x24b   : > { %1270 = vst.msk [vmem:[#allocation3 + $0xc0] sm:$0xff] %vm1245_vm9, %v1198_v50  ;;  %v1196_v11 = vpop.permute.xlu1 %1195  ;;  %1829 = vmatpush.msra.mxu0 %v1712_v13  ;;  %2332 = vmatpush.msra.mxu1 %v1712_v13 }
 0x24c   : > { %1269 = vst.msk [vmem:[#allocation3 + $0xb8] sm:$0xff] %vm1245_vm9, %v1196_v11  ;;  %2333 = vmatpush.msra.mxu2 %v1712_v13  ;;  %2334 = vmatpush.msra.mxu3 %v1712_v13  ;;  %v4478_v13 = vld [vmem:[#allocation34_spill] sm:$0xff] }
 0x24d   : > { %1830 = vmatpush.msra.mxu0 %v1711_v39  ;;  %2335 = vmatpush.msra.mxu1 %v1711_v39 }
 0x24e   : > { %2336 = vmatpush.msra.mxu2 %v1711_v39  ;;  %2337 = vmatpush.msra.mxu3 %v1711_v39 }
 0x24f   : > { %1328 = vrot.lane.b32.xlu0 %v2986_v1, %s2496_s11  ;;  %1831 = vmatpush.msra.mxu0 %v1710_v53 }
 0x250   : > { %1302 = vrot.lane.b32.xlu2 %v2837_v14, %s2496_s11  ;;  %2338 = vmatpush.msra.mxu1 %v1710_v53 }
 0x251   : > { %v1194_v0 = vpop.permute.xlu0 %1193  ;;  %1463 = vrot.lane.b32.xlu1 %v4453_v12, %s2498_s13  ;;  %2339 = vmatpush.msra.mxu2 %v1710_v53 }
 0x252   : > { %v1204_v59 = vpop.permute.xlu2 %1203  ;;  %1268 = vst.msk [vmem:[#allocation3 + $0xb0] sm:$0xff] %vm1245_vm9, %v1194_v0  ;;  %2340 = vmatpush.msra.mxu3 %v1710_v53  ;;  %v4480_v0 = vld [vmem:[#allocation53_spill] sm:$0xff] }
 0x253   : > { %1273 = vst.msk [vmem:[#allocation3 + $0xd8] sm:$0xff] %vm1245_vm9, %v1204_v59  ;;  %v1202_v14 = vpop.permute.xlu1 %1201 }
 0x254   : > { %1272 = vst.msk [vmem:[#allocation3 + $0xd0] sm:$0xff] %vm1245_vm9, %v1202_v14  ;;  %v4481_v14 = vld [vmem:[#allocation56_spill] sm:$0xff] }
 0x257   : > { %1451 = vrot.lane.b32.xlu0 %v4446_v46, %s2498_s13 }
 0x258   : > { %1316 = vrot.lane.b32.xlu2 %v2929_v5, %s2496_s11 }
 0x259   : > { %v1200_v37 = vpop.permute.xlu0 %1199  ;;  %1292 = vrot.lane.b32.xlu1 %v2756_v40, %s2496_s11 }
 0x25a   : > { %v1416_v1 = vpop.permute.xlu2 %1415  ;;  %1271 = vst.msk [vmem:[#allocation3 + $0xc8] sm:$0xff] %vm1245_vm9, %v1200_v37 }
 0x25b   : > { %v1281_v12 = vpop.permute.xlu1 %1280 }
 0x25c   : > { %1377 = vst.msk [vmem:[#allocation3] sm:$0xff] %vm1376_vm11, %v1281_v12 }
 0x25d   : > { %1512 = vst.msk [vmem:[#allocation3] sm:$0xff] %vm1511_vm12, %v1416_v1 }
 0x25f   : > { %1597 = vrot.lane.b32.xlu0 %v3288_v55, %s2497_s12 }
 0x260   : > { %1571 = vrot.lane.b32.xlu2 %v3218_v45, %s2497_s12 }
 0x261   : > { %v1206_v46 = vpop.permute.xlu0 %1205  ;;  %1439 = vrot.lane.b32.xlu1 %v4440_v24, %s2498_s13 }
 0x262   : > { %v1418_v5 = vpop.permute.xlu2 %1417  ;;  %1274 = vst.msk [vmem:[#allocation3 + $0xe0] sm:$0xff] %vm1245_vm9, %v1206_v46 }
 0x263   : > { %v1283_v40 = vpop.permute.xlu1 %1282 }
 0x264   : > { %1378 = vst.msk [vmem:[#allocation3 + $0x8] sm:$0xff] %vm1376_vm11, %v1283_v40  ;;  %v4483_v40 = vld [vmem:[#allocation54_spill] sm:$0xff] }
 0x265   : > { %1513 = vst.msk [vmem:[#allocation3 + $0x8] sm:$0xff] %vm1511_vm12, %v1418_v5  ;;  %v4482_v5 = vld [vmem:[#allocation57_spill] sm:$0xff] }
 0x267   : > { %1427 = vrot.lane.b32.xlu0 %v4434_v35, %s2498_s13 }
 0x268   : > { %1585 = vrot.lane.b32.xlu2 %v3245_v23, %s2497_s12 }
 0x269   : > { %v1550_v55 = vpop.permute.xlu0 %1549  ;;  %1561 = vrot.lane.b32.xlu1 %v3158_v3, %s2497_s12 }
 0x26a   : > { %v1297_v45 = vpop.permute.xlu2 %1296  ;;  %1646 = vst.msk [vmem:[#allocation3] sm:$0xff] %vm1645_vm13, %v1550_v55 }
 0x26b   : > { %1385 = vst.msk [vmem:[#allocation3 + $0x40] sm:$0xff] %vm1376_vm11, %v1297_v45  ;;  %v1285_v24 = vpop.permute.xlu1 %1284  ;;  %v4484_v45 = vld [vmem:[#allocation31_spill] sm:$0xff] }
 0x26c   : > { %1379 = vst.msk [vmem:[#allocation3 + $0x10] sm:$0xff] %vm1376_vm11, %v1285_v24 }
 0x26f   : > { %1330 = vrot.lane.b32.xlu0 %v3003_v2, %s2496_s11 }
 0x270   : > { %1304 = vrot.lane.b32.xlu2 %v2844_v16, %s2496_s11  ;;  %v4465_v16 = vld [vmem:[#allocation39_spill] sm:$0xff] }
 0x271   : > { %v1552_v35 = vpop.permute.xlu0 %1551  ;;  %v1678_v48 = vld [vmem:[#allocation3] sm:$0xff]  ;;  %1465 = vrot.lane.b32.xlu1 %v3098_v17, %s2498_s13  ;;  %v4466_v17 = vld [vmem:[#allocation11_spill] sm:$0xff] }
 0x272   : > { %v1554_v23 = vpop.permute.xlu2 %1553  ;;  %1647 = vst.msk [vmem:[#allocation3 + $0x8] sm:$0xff] %vm1645_vm13, %v1552_v35  ;;  %2290 = vmatmul.msk.f32.vlgmr.msra.gmra.mxu0 %vm1715_vm14, %v1678_v48  ;;  %v4485_v35 = vld [vmem:[#allocation17_spill] sm:$0xff] }
 0x273   : > { %v1432_v3 = vpop.permute.xlu1 %1431 }
 0x274   : > { %1520 = vst.msk [vmem:[#allocation3 + $0x40] sm:$0xff] %vm1511_vm12, %v1432_v3 }
 0x277   : > { %1453 = vrot.lane.b32.xlu0 %v4465_v16, %s2498_s13  ;;  %v4486_v16 = vld [vmem:[#allocation23_spill] sm:$0xff] }
 0x278   : > { %1318 = vrot.lane.b32.xlu2 %v2935_v10, %s2496_s11 }
 0x279   : > { %v1420_v32 = vpop.permute.xlu0 %1419  ;;  %v1679_v26 = vld [vmem:[#allocation3 + $0x8] sm:$0xff]  ;;  %1294 = vrot.lane.b32.xlu1 %v4466_v17, %s2496_s11 }
 0x27a   : > { %v1299_v2 = vpop.permute.xlu2 %1298  ;;  %1514 = vst.msk [vmem:[#allocation3 + $0x10] sm:$0xff] %vm1511_vm12, %v1420_v32  ;;  %2291 = vmatmul.msk.f32.gmra.mxu0 %vm1715_vm14, %v1679_v26  ;;  %v1144_v32 = vrot.slane %v4482_v5, 2  ;;  %v4488_v26 = vld [vmem:[#allocation58_spill] sm:$0xff] }
 0x27b   : > { %1386 = vst.msk [vmem:[#allocation3 + $0x48] sm:$0xff] %vm1376_vm11, %v1299_v2  ;;  %v1287_v4 = vpop.permute.xlu1 %1286  ;;  %v4487_v2 = vld [vmem:[#allocation42_spill] sm:$0xff]  ;;  %v1145_v17 = vrot.slane %v4488_v26, 2 }
 0x27c   : > { %1648 = vst.msk [vmem:[#allocation3 + $0x10] sm:$0xff] %vm1645_vm13, %v1554_v23 }
 0x27d   : > { %1380 = vst.msk [vmem:[#allocation3 + $0x18] sm:$0xff] %vm1376_vm11, %v1287_v4 }
 0x27f   : > { %1599 = vrot.lane.b32.xlu0 %v4464_v36, %s2497_s12 }
 0x280   : > { %1573 = vrot.lane.b32.xlu2 %v3200_v7, %s2497_s12  ;;  %v4468_v7 = vld [vmem:[#allocation21_spill] sm:$0xff] }
 0x281   : > { %v1566_v20 = vpop.permute.xlu0 %1565  ;;  %1441 = vrot.lane.b32.xlu1 %v4467_v60, %s2498_s13  ;;  %v4489_v60 = vld [vmem:[#allocation51_spill] sm:$0xff] }
 0x282   : > { %v1313_v10 = vpop.permute.xlu2 %1312  ;;  %1654 = vst.msk [vmem:[#allocation3 + $0x40] sm:$0xff] %vm1645_vm13, %v1566_v20  ;;  %v1146_v20 = vsel %vm668_vm4, %v1144_v32, %v1145_v17 }
 0x283   : > { %1393 = vst.msk [vmem:[#allocation3 + $0x80] sm:$0xff] %vm1376_vm11, %v1313_v10  ;;  %v1680_v28 = vld [vmem:[#allocation3 + $0x10] sm:$0xff]  ;;  %v1434_v42 = vpop.permute.xlu1 %1433 }
 0x284   : > { %2292 = vmatmul.msk.f32.gmra.mxu0 %vm1715_vm14, %v1680_v28  ;;  %1521 = vst.msk [vmem:[#allocation3 + $0x48] sm:$0xff] %vm1511_vm12, %v1434_v42 }
 0x287   : > { %1429 = vrot.lane.b32.xlu0 %v4468_v7, %s2498_s13 }
 0x288   : > { %1587 = vrot.lane.b32.xlu2 %v4463_v43, %s2497_s12  ;;  %v4469_v43 = vld [vmem:[#allocation16_spill] sm:$0xff] }
 0x289   : > { %v1422_v38 = vpop.permute.xlu0 %1421  ;;  %v1686_v29 = vld [vmem:[#allocation3 + $0x40] sm:$0xff]  ;;  %1563 = vrot.lane.b32.xlu1 %v4458_v22, %s2497_s12 }
 0x28a   : > { %v1448_v36 = vpop.permute.xlu2 %1447  ;;  %1515 = vst.msk [vmem:[#allocation3 + $0x18] sm:$0xff] %vm1511_vm12, %v1422_v38  ;;  %2298 = vmatmul.msk.f32.vlgmr.msra.gmra.mxu1 %vm1715_vm14, %v1686_v29  ;;  %v4490_v38 = vld [vmem:[#allocation40_spill] sm:$0xff] }
 0x28b   : > { %1528 = vst.msk [vmem:[#allocation3 + $0x80] sm:$0xff] %vm1511_vm12, %v1448_v36  ;;  %v1568_v52 = vpop.permute.xlu1 %1567  ;;  %v4491_v29 = vld [vmem:[#allocation12_spill] sm:$0xff] }
 0x28c   : > { %1655 = vst.msk [vmem:[#allocation3 + $0x48] sm:$0xff] %vm1645_vm13, %v1568_v52  ;;  %v1147_v52 = vrot.slane %v4491_v29, 2 }
 0x28f   : > { %1332 = vrot.lane.b32.xlu0 %v4470_v30, %s2496_s11  ;;  %v1148_v30 = vsel %vm668_vm4, %v1145_v17, %v1147_v52 }
 0x290   : > { %1306 = vrot.lane.b32.xlu2 %v4469_v43, %s2496_s11 }
 0x291   : > { %v1556_v15 = vpop.permute.xlu0 %1555  ;;  %1467 = vrot.lane.b32.xlu1 %v4471_v54, %s2498_s13 }
 0x292   : > { %v1301_v51 = vpop.permute.xlu2 %1300  ;;  %1649 = vst.msk [vmem:[#allocation3 + $0x18] sm:$0xff] %vm1645_vm13, %v1556_v15  ;;  %v3908_v15 = vld [vmem:[#allocation2 + $0x1a0] sm:$0xff] }
 0x293   : > { %1387 = vst.msk [vmem:[#allocation3 + $0x50] sm:$0xff] %vm1376_vm11, %v1301_v51  ;;  %v1289_v63 = vpop.permute.xlu1 %1288  ;;  %v1687_v22 = vld [vmem:[#allocation3 + $0x48] sm:$0xff] }
 0x294   : > { %1381 = vst.msk [vmem:[#allocation3 + $0x20] sm:$0xff] %vm1376_vm11, %v1289_v63  ;;  %2299 = vmatmul.msk.f32.gmra.mxu1 %vm1715_vm14, %v1687_v22  ;;  %v375_v22 = vld [vmem:[#allocation2 + $0x198] sm:$0xff] }
 0x297   : > { %1455 = vrot.lane.b32.xlu0 %v4473_v18, %s2498_s13 }
 0x298   : > { %1320 = vrot.lane.b32.xlu2 %v4472_v56, %s2496_s11  ;;  %v1411_v56 = vrot.slane %v3908_v15, 1 }
 0x299   : > { %v1582_v49 = vpop.permute.xlu0 %1581  ;;  %v1681_v19 = vld [vmem:[#allocation3 + $0x18] sm:$0xff]  ;;  %1308 = vrot.lane.b32.xlu1 %v4474_v58, %s2496_s11 }
 0x29a   : > { %v1315_v57 = vpop.permute.xlu2 %1314  ;;  %1662 = vst.msk [vmem:[#allocation3 + $0x80] sm:$0xff] %vm1645_vm13, %v1582_v49  ;;  %2293 = vmatmul.msk.f32.gmra.mxu0 %vm1715_vm14, %v1681_v19 }
 0x29b   : > { %1394 = vst.msk [vmem:[#allocation3 + $0x88] sm:$0xff] %vm1376_vm11, %v1315_v57  ;;  %v1436_v44 = vpop.permute.xlu1 %1435  ;;  %v4492_v57 = vld [vmem:[#allocation28_spill] sm:$0xff] }
 0x29c   : > { %1522 = vst.msk [vmem:[#allocation3 + $0x50] sm:$0xff] %vm1511_vm12, %v1436_v44 }
 0x29f   : > { %1601 = vrot.lane.b32.xlu0 %v3319_v8, %s2497_s12  ;;  %v4476_v8 = vld [vmem:[#allocation26_spill] sm:$0xff] }
 0x2a0   : > { %1575 = vrot.lane.b32.xlu2 %v4461_v9, %s2497_s12 }
 0x2a1   : > { %v1424_v27 = vpop.permute.xlu0 %1423  ;;  %v1694_v62 = vld [vmem:[#allocation3 + $0x80] sm:$0xff]  ;;  %1334 = vrot.lane.b32.xlu1 %v4475_v6, %s2496_s11 }
 0x2a2   : > { %v1450_v33 = vpop.permute.xlu2 %1449  ;;  %1516 = vst.msk [vmem:[#allocation3 + $0x20] sm:$0xff] %vm1511_vm12, %v1424_v27  ;;  %2306 = vmatmul.msk.f32.vlgmr.msra.gmra.mxu2 %vm1715_vm14, %v1694_v62 }
 0x2a3   : > { %1529 = vst.msk [vmem:[#allocation3 + $0x88] sm:$0xff] %vm1511_vm12, %v1450_v33  ;;  %v1570_v34 = vpop.permute.xlu1 %1569 }
 0x2a4   : > { %1656 = vst.msk [vmem:[#allocation3 + $0x50] sm:$0xff] %vm1645_vm13, %v1570_v34 }
 0x2a7   : > { %1322 = vrot.lane.b32.xlu0 %v4476_v8, %s2496_s11  ;;  %v377_v8 = vld [vmem:[#allocation2 + $0x1a8] sm:$0x3] }
 0x2a8   : > { %1589 = vrot.lane.b32.xlu2 %v3285_v47, %s2497_s12  ;;  %v4477_v47 = vld [vmem:[#allocation27_spill] sm:$0xff] }
 0x2a9   : > { %v1558_v50 = vpop.permute.xlu0 %1557  ;;  %1469 = vrot.lane.b32.xlu1 %v4454_v31, %s2498_s13  ;;  %v4479_v31 = vld [vmem:[#allocation19_spill] sm:$0xff] }
 0x2aa   : > { %v1303_v9 = vpop.permute.xlu2 %1302  ;;  %1650 = vst.msk [vmem:[#allocation3 + $0x20] sm:$0xff] %vm1645_vm13, %v1558_v50 }
 0x2ab   : > { %1388 = vst.msk [vmem:[#allocation3 + $0x58] sm:$0xff] %vm1376_vm11, %v1303_v9  ;;  %v1291_v25 = vpop.permute.xlu1 %1290  ;;  %v1688_v61 = vld [vmem:[#allocation3 + $0x50] sm:$0xff]  ;;  %v1544_v9 = vrot.slane %v375_v22, 2 }
 0x2ac   : > { %1382 = vst.msk [vmem:[#allocation3 + $0x28] sm:$0xff] %vm1376_vm11, %v1291_v25  ;;  %2300 = vmatmul.msk.f32.gmra.mxu1 %vm1715_vm14, %v1688_v61  ;;  %v1545_v25 = vrot.slane %v3908_v15, 2  ;;  %v1547_v61 = vrot.slane %v377_v8, 2 }
 0x2af   : > { %1457 = vrot.lane.b32.xlu0 %v4478_v13, %s2498_s13 }
 0x2b0   : > { %1443 = vrot.lane.b32.xlu2 %v4477_v47, %s2498_s13 }
 0x2b1   : > { %v1584_v39 = vpop.permute.xlu0 %1583  ;;  %v1682_v53 = vld [vmem:[#allocation3 + $0x20] sm:$0xff]  ;;  %1310 = vrot.lane.b32.xlu1 %v4479_v31, %s2496_s11 }
 0x2b2   : > { %v1317_v11 = vpop.permute.xlu2 %1316  ;;  %1663 = vst.msk [vmem:[#allocation3 + $0x88] sm:$0xff] %vm1645_vm13, %v1584_v39  ;;  %2294 = vmatmul.msk.f32.gmra.mxu0 %vm1715_vm14, %v1682_v53  ;;  %v1546_v39 = vsel %vm668_vm4, %v1544_v9, %v1545_v25  ;;  %v1548_v53 = vsel %vm668_vm4, %v1545_v25, %v1547_v61 }
 0x2b3   : > { %1395 = vst.msk [vmem:[#allocation3 + $0x90] sm:$0xff] %vm1376_vm11, %v1317_v11  ;;  %v1438_v59 = vpop.permute.xlu1 %1437 }
 0x2b4   : > { %1523 = vst.msk [vmem:[#allocation3 + $0x58] sm:$0xff] %vm1511_vm12, %v1438_v59 }
 0x2b7   : > { %1603 = vrot.lane.b32.xlu0 %v4481_v14, %s2497_s12 }
 0x2b8   : > { %1577 = vrot.lane.b32.xlu2 %v4480_v0, %s2497_s12 }
 0x2b9   : > { %v1426_v37 = vpop.permute.xlu0 %1425  ;;  %v1695_v12 = vld [vmem:[#allocation3 + $0x88] sm:$0xff]  ;;  %1336 = vrot.lane.b32.xlu1 %v4482_v5, %s2496_s11 }
 0x2ba   : > { %v1572_v1 = vpop.permute.xlu2 %1571  ;;  %1517 = vst.msk [vmem:[#allocation3 + $0x28] sm:$0xff] %vm1511_vm12, %v1426_v37  ;;  %2307 = vmatmul.msk.f32.gmra.mxu2 %vm1715_vm14, %v1695_v12 }
 0x2bb   : > { %1657 = vst.msk [vmem:[#allocation3 + $0x58] sm:$0xff] %vm1645_vm13, %v1572_v1  ;;  %v1560_v46 = vpop.permute.xlu1 %1559 }
 0x2bc   : > { %1651 = vst.msk [vmem:[#allocation3 + $0x28] sm:$0xff] %vm1645_vm13, %v1560_v46 }
 0x2bf   : > { %1324 = vrot.lane.b32.xlu0 %v4484_v45, %s2496_s11 }
 0x2c0   : > { %1591 = vrot.lane.b32.xlu2 %v4483_v40, %s2497_s12 }
 0x2c1   : > { %v1329_v23 = vpop.permute.xlu0 %1328  ;;  %1471 = vrot.lane.b32.xlu1 %v4485_v35, %s2498_s13 }
 0x2c2   : > { %v1586_v55 = vpop.permute.xlu2 %1585  ;;  %v1689_v24 = vld [vmem:[#allocation3 + $0x58] sm:$0xff]  ;;  %1401 = vst.msk [vmem:[#allocation3 + $0xc0] sm:$0xff] %vm1376_vm11, %v1329_v23 }
 0x2c3   : > { %2301 = vmatmul.msk.f32.gmra.mxu1 %vm1715_vm14, %v1689_v24  ;;  %v1464_v48 = vpop.permute.xlu1 %1463  ;;  %v1683_v3 = vld [vmem:[#allocation3 + $0x28] sm:$0xff] }
 0x2c4   : > { %1536 = vst.msk [vmem:[#allocation3 + $0xc0] sm:$0xff] %vm1511_vm12, %v1464_v48  ;;  %2295 = vmatmul.msk.f32.gmra.mxu0 %vm1715_vm14, %v1683_v3 }
 0x2c7   : > { %1459 = vrot.lane.b32.xlu0 %v4487_v2, %s2498_s13 }
 0x2c8   : > { %1445 = vrot.lane.b32.xlu2 %v4486_v16, %s2498_s13 }
 0x2c9   : > { %v1452_v10 = vpop.permute.xlu0 %1451  ;;  %1207 = vrot.lane.b32.xlu1 %v4481_v14, %s2495_s10  ;;  %v1413_v14 = vrot.slane %v377_v8, 1 }
 0x2ca   : > { %v1305_v4 = vpop.permute.xlu2 %1304  ;;  %1530 = vst.msk [vmem:[#allocation3 + $0x90] sm:$0xff] %vm1511_vm12, %v1452_v10 }
 0x2cb   : > { %1389 = vst.msk [vmem:[#allocation3 + $0x60] sm:$0xff] %vm1376_vm11, %v1305_v4  ;;  %v1293_v28 = vpop.permute.xlu1 %1292  ;;  %v1414_v35 = vsel %vm458_vm2, %v1411_v56, %v1413_v14 }
 0x2cc   : > { %1664 = vst.msk [vmem:[#allocation3 + $0x90] sm:$0xff] %vm1645_vm13, %v1586_v55 }
 0x2cd   : > { %1383 = vst.msk [vmem:[#allocation3 + $0x30] sm:$0xff] %vm1376_vm11, %v1293_v28 }
 0x2cf   : > { %1605 = vrot.lane.b32.xlu0 %v1146_v20, %s2497_s12 }
 0x2d0   : > { %1579 = vrot.lane.b32.xlu2 %v4489_v60, %s2497_s12 }
 0x2d1   : > { %v1598_v7 = vpop.permute.xlu0 %1597  ;;  %1461 = vrot.lane.b32.xlu1 %v4490_v38, %s2498_s13 }
 0x2d2   : > { %v1319_v42 = vpop.permute.xlu2 %1318  ;;  %1670 = vst.msk [vmem:[#allocation3 + $0xc0] sm:$0xff] %vm1645_vm13, %v1598_v7 }
 0x2d3   : > { %1396 = vst.msk [vmem:[#allocation3 + $0x98] sm:$0xff] %vm1376_vm11, %v1319_v42  ;;  %v1696_v36 = vld [vmem:[#allocation3 + $0x90] sm:$0xff]  ;;  %v1440_v43 = vpop.permute.xlu1 %1439 }
 0x2d4   : > { %2308 = vmatmul.msk.f32.gmra.mxu2 %vm1715_vm14, %v1696_v36  ;;  %1524 = vst.msk [vmem:[#allocation3 + $0x60] sm:$0xff] %vm1511_vm12, %v1440_v43 }
 0x2d7   : > { %1338 = vrot.lane.b32.xlu0 %v4488_v26, %s2496_s11 }
 0x2d8   : > { %1593 = vrot.lane.b32.xlu2 %v3253_v41, %s2497_s12  ;;  %v1410_v41 = vrot.slane %v375_v22, 1 }
 0x2d9   : > { %v1428_v54 = vpop.permute.xlu0 %1427  ;;  %v1702_v63 = vld [vmem:[#allocation3 + $0xc0] sm:$0xff]  ;;  %1607 = vrot.lane.b32.xlu1 %v1148_v30, %s2497_s12 }
 0x2da   : > { %v1574_v51 = vpop.permute.xlu2 %1573  ;;  %1518 = vst.msk [vmem:[#allocation3 + $0x30] sm:$0xff] %vm1511_vm12, %v1428_v54  ;;  %2314 = vmatmul.msk.f32.vlgmr.msra.gmra.mxu3 %vm1715_vm14, %v1702_v63  ;;  %v1412_v49 = vsel %vm458_vm2, %v1410_v41, %v1411_v56 }
 0x2db   : > { %1658 = vst.msk [vmem:[#allocation3 + $0x60] sm:$0xff] %vm1645_vm13, %v1574_v51  ;;  %v1562_v18 = vpop.permute.xlu1 %1561 }
 0x2dc   : > { %1652 = vst.msk [vmem:[#allocation3 + $0x30] sm:$0xff] %vm1645_vm13, %v1562_v18 }
 0x2df   : > { %1595 = vrot.lane.b32.xlu0 %v3303_v21, %s2497_s12  ;;  %v4493_v21 = vld [vmem:[#allocation15_spill] sm:$0xff] }
 0x2e0   : > { %1326 = vrot.lane.b32.xlu2 %v4492_v57, %s2496_s11 }
 0x2e1   : > { %v1331_v44 = vpop.permute.xlu0 %1330  ;;  %1475 = vrot.lane.b32.xlu1 %v1412_v49, %s2498_s13 }
 0x2e2   : > { %v1588_v19 = vpop.permute.xlu2 %1587  ;;  %v1690_v58 = vld [vmem:[#allocation3 + $0x60] sm:$0xff]  ;;  %1402 = vst.msk [vmem:[#allocation3 + $0xc8] sm:$0xff] %vm1376_vm11, %v1331_v44 }
 0x2e3   : > { %2302 = vmatmul.msk.f32.gmra.mxu1 %vm1715_vm14, %v1690_v58  ;;  %v1466_v33 = vpop.permute.xlu1 %1465  ;;  %v1684_v27 = vld [vmem:[#allocation3 + $0x30] sm:$0xff] }
 0x2e4   : > { %1537 = vst.msk [vmem:[#allocation3 + $0xc8] sm:$0xff] %vm1511_vm12, %v1466_v33  ;;  %2296 = vmatmul.msk.f32.gmra.mxu0 %vm1715_vm14, %v1684_v27 }
 0x2e7   : > { %1340 = vrot.lane.b32.xlu0 %v375_v22, %s2496_s11 }
 0x2e8   : > { %1473 = vrot.lane.b32.xlu2 %v4493_v21, %s2498_s13 }
 0x2e9   : > { %v1454_v6 = vpop.permute.xlu0 %1453  ;;  %1342 = vrot.lane.b32.xlu1 %v3908_v15, %s2496_s11  ;;  %s2156_s11 = scalar_lea.hbm %s4284_s3, %s2545_s19  ;;  %s2141_s19 = scalar_lea.sflag [#allocation5], %s4210_s27 }
 0x2ea   : > { %v1307_v62 = vpop.permute.xlu2 %1306  ;;  %1531 = vst.msk [vmem:[#allocation3 + $0x98] sm:$0xff] %vm1511_vm12, %v1454_v6  ;;  %s4223_s30 = sshll.u32 %s2156_s11, 4  ;;  %s2161_s30 = int_to_ptr.hbm [resolvable:$true] %s4223_s30 }
 0x2eb   : > { %1390 = vst.msk [vmem:[#allocation3 + $0x68] sm:$0xff] %vm1376_vm11, %v1307_v62  ;;  %v1295_v34 = vpop.permute.xlu1 %1294  ;;  %s2408_s8 = sshra.s32 %s2161_s30, 4  ;;  %s2409_s8 = int_to_ptr.hbm [resolvable:$true] %s2408_s8 }
 0x2ec   : > { %1665 = vst.msk [vmem:[#allocation3 + $0x98] sm:$0xff] %vm1645_vm13, %v1588_v19  ;;  %s2410_s9 = scalar_lea.hbm %s2409_s8, 1  ;;  %p2415_p0 = scmp.lt.s32.totalorder %s2409_s8, %s4284_s3 }
 0x2ed   : > { %1384 = vst.msk [vmem:[#allocation3 + $0x38] sm:$0xff] %vm1376_vm11, %v1295_v34  ;;  %p2411_p11 = scmp.ne.s32.totalorder %s2409_s8, %s2410_s9  ;;  %p2416_p1 = scmp.lt.s32.totalorder %s2414_s28, %s2410_s9 }
 0x2ef   : > { %1211 = vrot.lane.b32.xlu0 %v1148_v30, %s2495_s10  ;;  %v1833_v50 = vpop.f32.mrf.mxu0  ;;  %p2412_p12 = pnand %p2411_p11, %p2562_p5  ;;  %p2417_p2 = por %p2416_p1, %p2415_p0 }
 0x2f0   : > { %1209 = vrot.lane.b32.xlu2 %v1146_v20, %s2495_s10  ;;  %1930 = vst.msk [vmem:[%s3941_s20] sm:$0xff] %vm1929_vm15, %v1833_v50  ;;  %v2033_v59 = vmul.f32 %v1833_v50, %v1833_v50  ;;  %v1962_v1 = vsel %vm1929_vm15, %v1833_v50, 0.0 }
 0x2f1   : > { %v1600_v13 = vpop.permute.xlu0 %1599  ;;  %p2413_p13 = pneg %p2412_p12 }
 0x2f2   : > { %v1321_v47 = vpop.permute.xlu2 %1320  ;;  %1671 = vst.msk [vmem:[#allocation3 + $0xc8] sm:$0xff] %vm1645_vm13, %v1600_v13  ;;  %v2065_v55 = vsel %vm1929_vm15, %v2033_v59, 0.0 }
 0x2f3   : > { %1397 = vst.msk [vmem:[#allocation3 + $0xa0] sm:$0xff] %vm1376_vm11, %v1321_v47  ;;  %v1697_v11 = vld [vmem:[#allocation3 + $0x98] sm:$0xff]  ;;  %v1442_v31 = vpop.permute.xlu1 %1441  ;;  %p2418_p3 = pnand %p2417_p2, %p2413_p13 }
 0x2f4   : > { %2309 = vmatmul.msk.f32.gmra.mxu2 %vm1715_vm14, %v1697_v11  ;;  %1525 = vst.msk [vmem:[#allocation3 + $0x68] sm:$0xff] %vm1511_vm12, %v1442_v31 }
 0x2f7   : > { %1611 = vrot.lane.b32.xlu0 %v1548_v53, %s2497_s12  ;;  %v1836_v0 = vpop.f32.mrf.mxu0 }
 0x2f8   : > { %1609 = vrot.lane.b32.xlu2 %v1546_v39, %s2497_s12  ;;  %1931 = vst.msk [vmem:[%s3941_s20 + $0x8] sm:$0xff] %vm1929_vm15, %v1836_v0  ;;  %v1963_v37 = vsel %vm1929_vm15, %v1836_v0, 0.0  ;;  %v2034_v12 = vmul.f32 %v1836_v0, %v1836_v0 }
 0x2f9   : > { %v1964_v46 = vadd.f32 %v1963_v37, %v1962_v1  ;;  %v1430_v40 = vpop.permute.xlu0 %1429  ;;  %v1703_v45 = vld [vmem:[#allocation3 + $0xc8] sm:$0xff] }
 0x2fa   : > { %v1576_v5 = vpop.permute.xlu2 %1575  ;;  %v2066_v24 = vsel %vm1929_vm15, %v2034_v12, 0.0  ;;  %1519 = vst.msk [vmem:[#allocation3 + $0x38] sm:$0xff] %vm1511_vm12, %v1430_v40  ;;  %2315 = vmatmul.msk.f32.gmra.mxu3 %vm1715_vm14, %v1703_v45 }
 0x2fb   : > { %1659 = vst.msk [vmem:[#allocation3 + $0x68] sm:$0xff] %vm1645_vm13, %v1576_v5  ;;  %v2067_v23 = vadd.f32 %v2066_v24, %v2065_v55  ;;  %v1564_v48 = vpop.permute.xlu1 %1563 }
 0x2fc   : > { %1653 = vst.msk [vmem:[#allocation3 + $0x38] sm:$0xff] %vm1645_vm13, %v1564_v48 }
 0x300   : > { %1477 = vrot.lane.b32.xlu2 %v1414_v35, %s2498_s13 }
 0x301   : > { %v1839_v3 = vpop.f32.mrf.mxu0  ;;  %v1333_v17 = vpop.permute.xlu0 %1332 }
 0x302   : > { %v1590_v16 = vpop.permute.xlu2 %1589  ;;  %v1691_v2 = vld [vmem:[#allocation3 + $0x68] sm:$0xff]  ;;  %1932 = vst.msk [vmem:[%s3941_s20 + $0x10] sm:$0xff] %vm1929_vm15, %v1839_v3  ;;  %v1965_v32 = vsel %vm1929_vm15, %v1839_v3, 0.0  ;;  %v2035_v26 = vmul.f32 %v1839_v3, %v1839_v3 }
 0x303   : > { %2303 = vmatmul.msk.f32.gmra.mxu1 %vm1715_vm14, %v1691_v2  ;;  %v1966_v4 = vadd.f32 %v1965_v32, %v1964_v46  ;;  %1403 = vst.msk [vmem:[#allocation3 + $0xd0] sm:$0xff] %vm1376_vm11, %v1333_v17  ;;  %v1468_v28 = vpop.permute.xlu1 %1467  ;;  %v1685_v60 = vld [vmem:[#allocation3 + $0x38] sm:$0xff] }
 0x304   : > { %v2068_v10 = vsel %vm1929_vm15, %v2035_v26, 0.0  ;;  %1538 = vst.msk [vmem:[#allocation3 + $0xd0] sm:$0xff] %vm1511_vm12, %v1468_v28  ;;  %2297 = vmatmul.msk.f32.gmra.mxu0 %vm1715_vm14, %v1685_v60 }
 0x305   : > { %v2069_v20 = vadd.f32 %v2068_v10, %v2067_v23 }
 0x307   : > { %v3979_v42 = vpop.f32.mrf.mxu1 }
 0x308   : > { %1938 = vst.msk [vmem:[%s3941_s20 + $0x40] sm:$0xff] %vm1929_vm15, %v3979_v42 }
 0x309   : > { %v1456_v36 = vpop.permute.xlu0 %1455 }
 0x30a   : > { %v1444_v7 = vpop.permute.xlu2 %1443  ;;  %1532 = vst.msk [vmem:[#allocation3 + $0xa0] sm:$0xff] %vm1511_vm12, %v1456_v36 }
 0x30b   : > { %1666 = vst.msk [vmem:[#allocation3 + $0xa0] sm:$0xff] %vm1645_vm13, %v1590_v16  ;;  %v1309_v38 = vpop.permute.xlu1 %1308 }
 0x30c   : > { %1391 = vst.msk [vmem:[#allocation3 + $0x70] sm:$0xff] %vm1376_vm11, %v1309_v38 }
 0x30d   : > { %1526 = vst.msk [vmem:[#allocation3 + $0x70] sm:$0xff] %vm1511_vm12, %v1444_v7 }
 0x311   : > { %v1602_v52 = vpop.permute.xlu0 %1601  ;;  %v3990_v30 = vpop.f32.mrf.mxu1 }
 0x312   : > { %v1578_v29 = vpop.permute.xlu2 %1577  ;;  %1672 = vst.msk [vmem:[#allocation3 + $0xd0] sm:$0xff] %vm1645_vm13, %v1602_v52  ;;  %v1698_v43 = vld [vmem:[#allocation3 + $0xa0] sm:$0xff] }
 0x313   : > { %1660 = vst.msk [vmem:[#allocation3 + $0x70] sm:$0xff] %vm1645_vm13, %v1578_v29  ;;  %2310 = vmatmul.msk.f32.gmra.mxu2 %vm1715_vm14, %v1698_v43  ;;  %v1335_v51 = vpop.permute.xlu1 %1334 }
 0x314   : > { %1939 = vst.msk [vmem:[%s3941_s20 + $0x48] sm:$0xff] %vm1929_vm15, %v3990_v30 }
 0x315   : > { %1404 = vst.msk [vmem:[#allocation3 + $0xd8] sm:$0xff] %vm1376_vm11, %v1335_v51 }
 0x317   : > { %v1842_v15 = vpop.f32.mrf.mxu0 }
 0x318   : > { %1933 = vst.msk [vmem:[%s3941_s20 + $0x18] sm:$0xff] %vm1929_vm15, %v1842_v15  ;;  %v1967_v54 = vsel %vm1929_vm15, %v1842_v15, 0.0  ;;  %v2036_v63 = vmul.f32 %v1842_v15, %v1842_v15 }
 0x319   : > { %v1968_v56 = vadd.f32 %v1967_v54, %v1966_v4  ;;  %v1323_v18 = vpop.permute.xlu0 %1322  ;;  %v1704_v57 = vld [vmem:[#allocation3 + $0xd0] sm:$0xff] }
 0x31a   : > { %v1592_v22 = vpop.permute.xlu2 %1591  ;;  %v1692_v41 = vld [vmem:[#allocation3 + $0x70] sm:$0xff]  ;;  %v2070_v49 = vsel %vm1929_vm15, %v2036_v63, 0.0  ;;  %1398 = vst.msk [vmem:[#allocation3 + $0xa8] sm:$0xff] %vm1376_vm11, %v1323_v18  ;;  %2316 = vmatmul.msk.f32.gmra.mxu3 %vm1715_vm14, %v1704_v57 }
 0x31b   : > { %2304 = vmatmul.msk.f32.gmra.mxu1 %vm1715_vm14, %v1692_v41  ;;  %v2071_v19 = vadd.f32 %v2070_v49, %v2069_v20  ;;  %v1470_v58 = vpop.permute.xlu1 %1469 }
 0x31c   : > { %1539 = vst.msk [vmem:[#allocation3 + $0xd8] sm:$0xff] %vm1511_vm12, %v1470_v58 }
 0x321   : > { %v1458_v33 = vpop.permute.xlu0 %1457 }
 0x322   : > { %v1446_v44 = vpop.permute.xlu2 %1445  ;;  %1533 = vst.msk [vmem:[#allocation3 + $0xa8] sm:$0xff] %vm1511_vm12, %v1458_v33 }
 0x323   : > { %1667 = vst.msk [vmem:[#allocation3 + $0xa8] sm:$0xff] %vm1645_vm13, %v1592_v22  ;;  %v1311_v27 = vpop.permute.xlu1 %1310 }
 0x324   : > { %1392 = vst.msk [vmem:[#allocation3 + $0x78] sm:$0xff] %vm1376_vm11, %v1311_v27  ;;  %v2041_v27 = vmul.f32 %v3979_v42, %v3979_v42 }
 0x325   : > { %v4007_v21 = vpop.f32.mrf.mxu2  ;;  %1527 = vst.msk [vmem:[#allocation3 + $0x78] sm:$0xff] %vm1511_vm12, %v1446_v44 }
 0x326   : > { %1946 = vst.msk [vmem:[%s3941_s20 + $0x80] sm:$0xff] %vm1929_vm15, %v4007_v21 }
 0x329   : > { %v1604_v6 = vpop.permute.xlu0 %1603  ;;  %v4016_v8 = vpop.f32.mrf.mxu1 }
 0x32a   : > { %v1580_v62 = vpop.permute.xlu2 %1579  ;;  %1673 = vst.msk [vmem:[#allocation3 + $0xd8] sm:$0xff] %vm1645_vm13, %v1604_v6  ;;  %v1699_v34 = vld [vmem:[#allocation3 + $0xa8] sm:$0xff] }
 0x32b   : > { %1661 = vst.msk [vmem:[#allocation3 + $0x78] sm:$0xff] %vm1645_vm13, %v1580_v62  ;;  %2311 = vmatmul.msk.f32.gmra.mxu2 %vm1715_vm14, %v1699_v34  ;;  %v1337_v9 = vpop.permute.xlu1 %1336 }
 0x32c   : > { %1940 = vst.msk [vmem:[%s3941_s20 + $0x50] sm:$0xff] %vm1929_vm15, %v4016_v8 }
 0x32d   : > { %1405 = vst.msk [vmem:[#allocation3 + $0xe0] sm:$0xff] %vm1376_vm11, %v1337_v9  ;;  %v1977_v9 = vsel %vm1929_vm15, %v3979_v42, 0.0  ;;  %v1981_v42 = vsel %vm1929_vm15, %v4016_v8, 0.0 }
 0x32f   : > { %v1845_v50 = vpop.f32.mrf.mxu0 }
 0x330   : > { %1934 = vst.msk [vmem:[%s3941_s20 + $0x20] sm:$0xff] %vm1929_vm15, %v1845_v50  ;;  %v1969_v25 = vsel %vm1929_vm15, %v1845_v50, 0.0  ;;  %v2037_v61 = vmul.f32 %v1845_v50, %v1845_v50  ;;  %v2042_v50 = vmul.f32 %v3990_v30, %v3990_v30 }
 0x331   : > { %v1970_v11 = vadd.f32 %v1969_v25, %v1968_v56  ;;  %v1325_v39 = vpop.permute.xlu0 %1324  ;;  %v1705_v53 = vld [vmem:[#allocation3 + $0xd8] sm:$0xff] }
 0x332   : > { %v1594_v47 = vpop.permute.xlu2 %1593  ;;  %v1693_v13 = vld [vmem:[#allocation3 + $0x78] sm:$0xff]  ;;  %v2072_v31 = vsel %vm1929_vm15, %v2037_v61, 0.0  ;;  %1399 = vst.msk [vmem:[#allocation3 + $0xb0] sm:$0xff] %vm1376_vm11, %v1325_v39  ;;  %2317 = vmatmul.msk.f32.gmra.mxu3 %vm1715_vm14, %v1705_v53  ;;  %v2043_v39 = vmul.f32 %v4016_v8, %v4016_v8 }
 0x333   : > { %2305 = vmatmul.msk.f32.gmra.mxu1 %vm1715_vm14, %v1693_v13  ;;  %v2073_v59 = vadd.f32 %v2072_v31, %v2071_v19  ;;  %v1472_v0 = vpop.permute.xlu1 %1471  ;;  %v2080_v13 = vsel %vm1929_vm15, %v2041_v27, 0.0 }
 0x334   : > { %1540 = vst.msk [vmem:[#allocation3 + $0xe0] sm:$0xff] %vm1511_vm12, %v1472_v0 }
 0x339   : > { %v1460_v1 = vpop.permute.xlu0 %1459 }
 0x33a   : > { %v1327_v14 = vpop.permute.xlu2 %1326  ;;  %1534 = vst.msk [vmem:[#allocation3 + $0xb0] sm:$0xff] %vm1511_vm12, %v1460_v1 }
 0x33b   : > { %1400 = vst.msk [vmem:[#allocation3 + $0xb8] sm:$0xff] %vm1376_vm11, %v1327_v14  ;;  %v1208_v37 = vpop.permute.xlu1 %1207 }
 0x33c   : > { %1668 = vst.msk [vmem:[#allocation3 + $0xb0] sm:$0xff] %vm1645_vm13, %v1594_v47 }
 0x33d   : > { %v4034_v12 = vpop.f32.mrf.mxu2  ;;  %1275 = vst.msk [vmem:[#allocation3 + $0xe8] sm:$0xff] %vm1245_vm9, %v1208_v37  ;;  %v2084_v37 = vsel %vm1929_vm15, %v2043_v39, 0.0 }
 0x33e   : > { %1947 = vst.msk [vmem:[%s3941_s20 + $0x88] sm:$0xff] %vm1929_vm15, %v4034_v12 }
 0x340   : > { %v4040_v5 = vpop.f32.mrf.mxu1 }
 0x341   : > { %1941 = vst.msk [vmem:[%s3941_s20 + $0x58] sm:$0xff] %vm1929_vm15, %v4040_v5  ;;  %v1606_v40 = vpop.permute.xlu0 %1605  ;;  %v1848_v55 = vpop.f32.mrf.mxu0  ;;  %v2044_v0 = vmul.f32 %v4040_v5, %v4040_v5 }
 0x342   : > { %v1474_v46 = vpop.permute.xlu2 %1473  ;;  %1674 = vst.msk [vmem:[#allocation3 + $0xe0] sm:$0xff] %vm1645_vm13, %v1606_v40  ;;  %v1971_v24 = vsel %vm1929_vm15, %v1848_v55, 0.0  ;;  %v2038_v23 = vmul.f32 %v1848_v55, %v1848_v55 }
 0x343   : > { %v1700_v45 = vld [vmem:[#allocation3 + $0xb0] sm:$0xff]  ;;  %1935 = vst.msk [vmem:[%s3941_s20 + $0x28] sm:$0xff] %vm1929_vm15, %v1848_v55  ;;  %v1972_v35 = vadd.f32 %v1971_v24, %v1970_v11  ;;  %v1462_v48 = vpop.permute.xlu1 %1461  ;;  %v1979_v11 = vsel %vm1929_vm15, %v3990_v30, 0.0  ;;  %v1983_v30 = vsel %vm1929_vm15, %v4040_v5, 0.0  ;;  %v2086_v55 = vsel %vm1929_vm15, %v2044_v0, 0.0 }
 0x344   : > { %2312 = vmatmul.msk.f32.gmra.mxu2 %vm1715_vm14, %v1700_v45  ;;  %v2074_v3 = vsel %vm1929_vm15, %v2038_v23, 0.0  ;;  %1535 = vst.msk [vmem:[#allocation3 + $0xb8] sm:$0xff] %vm1511_vm12, %v1462_v48 }
 0x345   : > { %v2075_v16 = vadd.f32 %v2074_v3, %v2073_v59  ;;  %v2082_v59 = vsel %vm1929_vm15, %v2042_v50, 0.0 }
 0x349   : > { %v1339_v32 = vpop.permute.xlu0 %1338  ;;  %v1706_v26 = vld [vmem:[#allocation3 + $0xe0] sm:$0xff] }
 0x34a   : > { %v1210_v2 = vpop.permute.xlu2 %1209  ;;  %1406 = vst.msk [vmem:[#allocation3 + $0xe8] sm:$0xff] %vm1376_vm11, %v1339_v32  ;;  %2318 = vmatmul.msk.f32.gmra.mxu3 %vm1715_vm14, %v1706_v26 }
 0x34b   : > { %1276 = vst.msk [vmem:[#allocation3 + $0xf0] sm:$0xff] %vm1245_vm9, %v1210_v2  ;;  %v1608_v17 = vpop.permute.xlu1 %1607 }
 0x34c   : > { %1541 = vst.msk [vmem:[#allocation3 + $0xe8] sm:$0xff] %vm1511_vm12, %v1474_v46 }
 0x34d   : > { %1675 = vst.msk [vmem:[#allocation3 + $0xe8] sm:$0xff] %vm1645_vm13, %v1608_v17 }
 0x351   : > { %v1596_v4 = vpop.permute.xlu0 %1595 }
 0x352   : > { %1669 = vst.msk [vmem:[#allocation3 + $0xb8] sm:$0xff] %vm1645_vm13, %v1596_v4  ;;  %v1610_v60 = vpop.permute.xlu2 %1609 }
 0x353   : > { %v1476_v28 = vpop.permute.xlu1 %1475 }
 0x354   : > { %v1707_v10 = vld [vmem:[#allocation3 + $0xe8] sm:$0xff] }
 0x355   : > { %2319 = vmatmul.msk.f32.gmra.mxu3 %vm1715_vm14, %v1707_v10 }
 0x357   : > { %v4059_v20 = vpop.f32.mrf.mxu2 }
 0x358   : > { %1948 = vst.msk [vmem:[%s3941_s20 + $0x90] sm:$0xff] %vm1929_vm15, %v4059_v20 }
 0x359   : > { %v1341_v7 = vpop.permute.xlu0 %1340  ;;  %v1701_v36 = vld [vmem:[#allocation3 + $0xb8] sm:$0xff] }
 0x35a   : > { %1407 = vst.msk [vmem:[#allocation3 + $0xf0] sm:$0xff] %vm1376_vm11, %v1341_v7  ;;  %2313 = vmatmul.msk.f32.gmra.mxu2 %vm1715_vm14, %v1701_v36  ;;  %v1478_v51 = vpop.permute.xlu2 %1477 }
 0x35b   : > { %1542 = vst.msk [vmem:[#allocation3 + $0xf0] sm:$0xff] %vm1511_vm12, %v1476_v28  ;;  %v1343_v52 = vpop.permute.xlu1 %1342 }
 0x35c   : > { %1676 = vst.msk [vmem:[#allocation3 + $0xf0] sm:$0xff] %vm1645_vm13, %v1610_v60 }
 0x35d   : > { %v4068_v38 = vpop.f32.mrf.mxu3 }
 0x35e   : > { %1954 = vst.msk [vmem:[%s3941_s20 + $0xc0] sm:$0xff] %vm1929_vm15, %v4068_v38 }
 0x360   : > { %v1869_v29 = vpop.f32.mrf.mxu1 }
 0x361   : > { %1942 = vst.msk [vmem:[%s3941_s20 + $0x60] sm:$0xff] %vm1929_vm15, %v1869_v29  ;;  %v1212_v43 = vpop.permute.xlu0 %1211  ;;  %v1851_v15 = vpop.f32.mrf.mxu0  ;;  %v2045_v46 = vmul.f32 %v1869_v29, %v1869_v29  ;;  %v1985_v8 = vsel %vm1929_vm15, %v1869_v29, 0.0 }
 0x362   : > { %1277 = vst.msk [vmem:[#allocation3 + $0xf8] sm:$0xff] %vm1245_vm9, %v1212_v43  ;;  %v1973_v63 = vsel %vm1929_vm15, %v1851_v15, 0.0  ;;  %v2039_v22 = vmul.f32 %v1851_v15, %v1851_v15 }
 0x363   : > { %1408 = vst.msk [vmem:[#allocation3 + $0xf8] sm:$0xff] %vm1376_vm11, %v1343_v52  ;;  %v1708_v54 = vld [vmem:[#allocation3 + $0xf0] sm:$0xff]  ;;  %v1974_v41 = vadd.f32 %v1973_v63, %v1972_v35  ;;  %v2088_v48 = vsel %vm1929_vm15, %v2045_v46, 0.0  ;;  %v2049_v52 = vmul.f32 %v4007_v21, %v4007_v21  ;;  %v1993_v63 = vsel %vm1929_vm15, %v4007_v21, 0.0 }
 0x364   : > { %1543 = vst.msk [vmem:[#allocation3 + $0xf8] sm:$0xff] %vm1511_vm12, %v1478_v51  ;;  %2320 = vmatmul.msk.f32.gmra.mxu3 %vm1715_vm14, %v1708_v54  ;;  %v2076_v56 = vsel %vm1929_vm15, %v2039_v22, 0.0  ;;  %v2050_v22 = vmul.f32 %v4034_v12, %v4034_v12  ;;  %v1997_v21 = vsel %vm1929_vm15, %v4059_v20, 0.0 }
 0x365   : > { %1936 = vst.msk [vmem:[%s3941_s20 + $0x30] sm:$0xff] %vm1929_vm15, %v1851_v15  ;;  %v2077_v18 = vadd.f32 %v2076_v56, %v2075_v16 }
 0x369   : > { %v1612_v57 = vpop.permute.xlu0 %1611 }
 0x36a   : > { %1677 = vst.msk [vmem:[#allocation3 + $0xf8] sm:$0xff] %vm1645_vm13, %v1612_v57  ;;  %v2096_v57 = vsel %vm1929_vm15, %v2049_v52, 0.0 }
 0x371   : > { %v1709_v49 = vld [vmem:[#allocation3 + $0xf8] sm:$0xff] }
 0x372   : > { %2321 = vmatmul.msk.f32.gmra.mxu3 %vm1715_vm14, %v1709_v49  ;;  %v1995_v49 = vsel %vm1929_vm15, %v4034_v12, 0.0 }
 0x377   : > { %v4085_v19 = vpop.f32.mrf.mxu2 }
 0x378   : > { %1949 = vst.msk [vmem:[%s3941_s20 + $0x98] sm:$0xff] %vm1929_vm15, %v4085_v19 }
 0x37d   : > { %v4090_v58 = vpop.f32.mrf.mxu3 }
 0x37e   : > { %1955 = vst.msk [vmem:[%s3941_s20 + $0xc8] sm:$0xff] %vm1929_vm15, %v4090_v58 }
 0x380   : > { %v1872_v44 = vpop.f32.mrf.mxu1 }
 0x381   : > { %1943 = vst.msk [vmem:[%s3941_s20 + $0x68] sm:$0xff] %vm1929_vm15, %v1872_v44  ;;  %v1854_v33 = vpop.f32.mrf.mxu0  ;;  %v2046_v24 = vmul.f32 %v1872_v44, %v1872_v44  ;;  %v1987_v3 = vsel %vm1929_vm15, %v1872_v44, 0.0  ;;  %v2051_v44 = vmul.f32 %v4059_v20, %v4059_v20 }
 0x382   : > { %1937 = vst.msk [vmem:[%s3941_s20 + $0x38] sm:$0xff] %vm1929_vm15, %v1854_v33  ;;  %v1975_v62 = vsel %vm1929_vm15, %v1854_v33, 0.0  ;;  %v2040_v6 = vmul.f32 %v1854_v33, %v1854_v33 }
 0x383   : > { %v1976_v34 = vadd.f32 %v1975_v62, %v1974_v41  ;;  %v2090_v5 = vsel %vm1929_vm15, %v2046_v24, 0.0  ;;  %v2098_v62 = vsel %vm1929_vm15, %v2050_v22, 0.0  ;;  %v2100_v50 = vsel %vm1929_vm15, %v2051_v44, 0.0 }
 0x384   : > { %v2078_v25 = vsel %vm1929_vm15, %v2040_v6, 0.0  ;;  %v2052_v6 = vmul.f32 %v4085_v19, %v4085_v19 }
 0x385   : > { %v1978_v61 = vadd.f32 %v1977_v9, %v1976_v34  ;;  %v2079_v47 = vadd.f32 %v2078_v25, %v2077_v18  ;;  %v1999_v25 = vsel %vm1929_vm15, %v4085_v19, 0.0 }
 0x386   : > { %v2102_v20 = vsel %vm1929_vm15, %v2052_v6, 0.0 }
 0x387   : > { %v1980_v53 = vadd.f32 %v1979_v11, %v1978_v61  ;;  %v2081_v31 = vadd.f32 %v2080_v13, %v2079_v47 }
 0x389   : > { %v1982_v14 = vadd.f32 %v1981_v42, %v1980_v53  ;;  %v2083_v1 = vadd.f32 %v2082_v59, %v2081_v31 }
 0x38b   : > { %v2085_v40 = vadd.f32 %v2084_v37, %v2083_v1  ;;  %v1984_v45 = vadd.f32 %v1983_v30, %v1982_v14 }
 0x38d   : > { %v1986_v23 = vadd.f32 %v1985_v8, %v1984_v45  ;;  %v2087_v35 = vadd.f32 %v2086_v55, %v2085_v40 }
 0x38f   : > { %v1988_v16 = vadd.f32 %v1987_v3, %v1986_v23  ;;  %v2089_v2 = vadd.f32 %v2088_v48, %v2087_v35  ;;  %v2057_v23 = vmul.f32 %v4068_v38, %v4068_v38 }
 0x391   : > { %v2091_v32 = vadd.f32 %v2090_v5, %v2089_v2  ;;  %v2009_v2 = vsel %vm1929_vm15, %v4068_v38, 0.0  ;;  %v2058_v5 = vmul.f32 %v4090_v58, %v4090_v58 }
 0x393   : > { %v2114_v38 = vsel %vm1929_vm15, %v2058_v5, 0.0 }
 0x396   : > { %v1893_v26 = vpop.f32.mrf.mxu2 }
 0x397   : > { %1950 = vst.msk [vmem:[%s3941_s20 + $0xa0] sm:$0xff] %vm1929_vm15, %v1893_v26  ;;  %v2053_v61 = vmul.f32 %v1893_v26, %v1893_v26  ;;  %v2001_v11 = vsel %vm1929_vm15, %v1893_v26, 0.0 }
 0x398   : > { %v1875_v17 = vpop.f32.mrf.mxu1 }
 0x399   : > { %1944 = vst.msk [vmem:[%s3941_s20 + $0x70] sm:$0xff] %vm1929_vm15, %v1875_v17  ;;  %v2047_v10 = vmul.f32 %v1875_v17, %v1875_v17  ;;  %v1989_v28 = vsel %vm1929_vm15, %v1875_v17, 0.0  ;;  %v2104_v31 = vsel %vm1929_vm15, %v2053_v61, 0.0 }
 0x39a   : > { %v1990_v7 = vadd.f32 %v1989_v28, %v1988_v16  ;;  %v2011_v28 = vsel %vm1929_vm15, %v4090_v58, 0.0 }
 0x39b   : > { %v2092_v60 = vsel %vm1929_vm15, %v2047_v10, 0.0  ;;  %v2112_v10 = vsel %vm1929_vm15, %v2057_v23, 0.0 }
 0x39c   : > { %v2093_v15 = vadd.f32 %v2092_v60, %v2091_v32 }
 0x39d   : > { %v4129_v4 = vpop.f32.mrf.mxu3 }
 0x39e   : > { %1956 = vst.msk [vmem:[%s3941_s20 + $0xd0] sm:$0xff] %vm1929_vm15, %v4129_v4  ;;  %v2059_v60 = vmul.f32 %v4129_v4, %v4129_v4 }
 0x3ae   : > { %v1896_v36 = vpop.f32.mrf.mxu2 }
 0x3af   : > { %1951 = vst.msk [vmem:[%s3941_s20 + $0xa8] sm:$0xff] %vm1929_vm15, %v1896_v36  ;;  %v2054_v19 = vmul.f32 %v1896_v36, %v1896_v36  ;;  %v2003_v14 = vsel %vm1929_vm15, %v1896_v36, 0.0 }
 0x3b0   : > { %v1878_v29 = vpop.f32.mrf.mxu1 }
 0x3b1   : > { %v1991_v43 = vsel %vm1929_vm15, %v1878_v29, 0.0  ;;  %v2048_v51 = vmul.f32 %v1878_v29, %v1878_v29  ;;  %1945 = vst.msk [vmem:[%s3941_s20 + $0x78] sm:$0xff] %vm1929_vm15, %v1878_v29  ;;  %v2106_v46 = vsel %vm1929_vm15, %v2054_v19, 0.0  ;;  %v2013_v29 = vsel %vm1929_vm15, %v4129_v4, 0.0 }
 0x3b2   : > { %v1992_v54 = vadd.f32 %v1991_v43, %v1990_v7 }
 0x3b3   : > { %v2094_v41 = vsel %vm1929_vm15, %v2048_v51, 0.0  ;;  %v2116_v51 = vsel %vm1929_vm15, %v2059_v60, 0.0 }
 0x3b4   : > { %v1994_v56 = vadd.f32 %v1993_v63, %v1992_v54  ;;  %v2095_v18 = vadd.f32 %v2094_v41, %v2093_v15 }
 0x3b5   : > { %v1914_v34 = vpop.f32.mrf.mxu3 }
 0x3b6   : > { %v1996_v33 = vadd.f32 %v1995_v49, %v1994_v56  ;;  %v2097_v27 = vadd.f32 %v2096_v57, %v2095_v18  ;;  %1957 = vst.msk [vmem:[%s3941_s20 + $0xd8] sm:$0xff] %vm1929_vm15, %v1914_v34  ;;  %v2060_v15 = vmul.f32 %v1914_v34, %v1914_v34  ;;  %v2015_v22 = vsel %vm1929_vm15, %v1914_v34, 0.0 }
 0x3b8   : > { %v1998_v9 = vadd.f32 %v1997_v21, %v1996_v33  ;;  %v2099_v12 = vadd.f32 %v2098_v62, %v2097_v27  ;;  %v2118_v41 = vsel %vm1929_vm15, %v2060_v15, 0.0 }
 0x3ba   : > { %v2101_v47 = vadd.f32 %v2100_v50, %v2099_v12  ;;  %v2000_v13 = vadd.f32 %v1999_v25, %v1998_v9 }
 0x3bc   : > { %v2002_v39 = vadd.f32 %v2001_v11, %v2000_v13  ;;  %v2103_v53 = vadd.f32 %v2102_v20, %v2101_v47 }
 0x3be   : > { %v2105_v59 = vadd.f32 %v2104_v31, %v2103_v53  ;;  %v2004_v30 = vadd.f32 %v2003_v14, %v2002_v39 }
 0x3c0   : > { %v2107_v45 = vadd.f32 %v2106_v46, %v2105_v59 }
 0x3c7   : > { %v1899_v42 = vpop.f32.mrf.mxu2 }
 0x3c8   : > { %1952 = vst.msk [vmem:[%s3941_s20 + $0xb0] sm:$0xff] %vm1929_vm15, %v1899_v42  ;;  %v2055_v1 = vmul.f32 %v1899_v42, %v1899_v42  ;;  %v2005_v40 = vsel %vm1929_vm15, %v1899_v42, 0.0 }
 0x3c9   : > { %v2006_v8 = vadd.f32 %v2005_v40, %v2004_v30 }
 0x3ca   : > { %v2108_v55 = vsel %vm1929_vm15, %v2055_v1, 0.0 }
 0x3cb   : > { %v2109_v3 = vadd.f32 %v2108_v55, %v2107_v45 }
 0x3cd   : > { %v1917_v0 = vpop.f32.mrf.mxu3 }
 0x3ce   : > { %1958 = vst.msk [vmem:[%s3941_s20 + $0xe0] sm:$0xff] %vm1929_vm15, %v1917_v0  ;;  %v2061_v56 = vmul.f32 %v1917_v0, %v1917_v0  ;;  %v2017_v57 = vsel %vm1929_vm15, %v1917_v0, 0.0 }
 0x3d0   : > { %v2120_v49 = vsel %vm1929_vm15, %v2061_v56, 0.0 }
 0x3d8   : > { %v1920_v37 = vpop.f32.mrf.mxu3 }
 0x3d9   : > { %1959 = vst.msk [vmem:[%s3941_s20 + $0xe8] sm:$0xff] %vm1929_vm15, %v1920_v37  ;;  %v2062_v44 = vmul.f32 %v1920_v37, %v1920_v37  ;;  %v2019_v27 = vsel %vm1929_vm15, %v1920_v37, 0.0 }
 0x3db   : > { %v2122_v6 = vsel %vm1929_vm15, %v2062_v44, 0.0 }
 0x3dd   : > { %v1902_v24 = vpop.f32.mrf.mxu2 }
 0x3de   : > { %1953 = vst.msk [vmem:[%s3941_s20 + $0xb8] sm:$0xff] %vm1929_vm15, %v1902_v24  ;;  %v2007_v35 = vsel %vm1929_vm15, %v1902_v24, 0.0  ;;  %v2056_v48 = vmul.f32 %v1902_v24, %v1902_v24 }
 0x3df   : > { %v2008_v16 = vadd.f32 %v2007_v35, %v2006_v8 }
 0x3e0   : > { %v2110_v32 = vsel %vm1929_vm15, %v2056_v48, 0.0 }
 0x3e1   : > { %v2010_v26 = vadd.f32 %v2009_v2, %v2008_v16  ;;  %v2111_v17 = vadd.f32 %v2110_v32, %v2109_v3 }
 0x3e3   : > { %v2012_v7 = vadd.f32 %v2011_v28, %v2010_v26  ;;  %v2113_v36 = vadd.f32 %v2112_v10, %v2111_v17 }
 0x3e5   : > { %v2014_v52 = vadd.f32 %v2013_v29, %v2012_v7  ;;  %v2115_v43 = vadd.f32 %v2114_v38, %v2113_v36 }
 0x3e7   : > { %v2117_v54 = vadd.f32 %v2116_v51, %v2115_v43  ;;  %v1923_v63 = vpop.f32.mrf.mxu3  ;;  %v2016_v58 = vadd.f32 %v2015_v22, %v2014_v52 }
 0x3e8   : > { %1960 = vst.msk [vmem:[%s3941_s20 + $0xf0] sm:$0xff] %vm1929_vm15, %v1923_v63  ;;  %v2063_v62 = vmul.f32 %v1923_v63, %v1923_v63  ;;  %v2021_v34 = vsel %vm1929_vm15, %v1923_v63, 0.0 }
 0x3e9   : > { %v2119_v18 = vadd.f32 %v2118_v41, %v2117_v54  ;;  %v2018_v4 = vadd.f32 %v2017_v57, %v2016_v58 }
 0x3ea   : > { %v2124_v12 = vsel %vm1929_vm15, %v2063_v62, 0.0 }
 0x3eb   : > { %v2121_v33 = vadd.f32 %v2120_v49, %v2119_v18  ;;  %v2020_v21 = vadd.f32 %v2019_v27, %v2018_v4 }
 0x3ed   : > { %v2123_v9 = vadd.f32 %v2122_v6, %v2121_v33  ;;  %v2022_v50 = vadd.f32 %v2021_v34, %v2020_v21 }
 0x3ef   : > { %v2125_v13 = vadd.f32 %v2124_v12, %v2123_v9 }
 0x3f5   : > { %v1926_v25 = vpop.f32.mrf.mxu3 }
 0x3f6   : > { %1961 = vst.msk [vmem:[%s3941_s20 + $0xf8] sm:$0xff] %vm1929_vm15, %v1926_v25  ;;  %v2023_v61 = vsel %vm1929_vm15, %v1926_v25, 0.0  ;;  %v2064_v47 = vmul.f32 %v1926_v25, %v1926_v25 }
 0x3f7   : > { %v2024_v20 = vadd.f32 %v2023_v61, %v2022_v50 }
 0x3f8   : > { %v2126_v11 = vsel %vm1929_vm15, %v2064_v47, 0.0 }
 0x3f9   : > { %v2025_v39 = vrot.slane %v2024_v20, 4  ;;  %v2127_v53 = vadd.f32 %v2126_v11, %v2125_v13 }
 0x3fb   : > { %v2026_v31 = vadd.f32 %v2025_v39, %v2024_v20  ;;  %v2128_v59 = vrot.slane %v2127_v53, 4 }
 0x3fd   : > { %v2027_v42 = vrot.slane %v2026_v31, 2  ;;  %v2129_v0 = vadd.f32 %v2128_v59, %v2127_v53 }
 0x3ff   : > { %v2028_v19 = vadd.f32 %v2027_v42, %v2026_v31  ;;  %v2130_v14 = vrot.slane %v2129_v0, 2 }
 0x401   : > { %v2029_v1 = vrot.slane %v2028_v19, 1  ;;  %v2131_v37 = vadd.f32 %v2130_v14, %v2129_v0 }
 0x403   : > { %v2030_v30 = vadd.f32 %v2029_v1, %v2028_v19  ;;  %v2132_v46 = vrot.slane %v2131_v37, 1 }
 0x405   : > { %2032 = vst.msk [vmem:[%s200_s23] sm:$0x1] %vm2031_vm0, %v2030_v30  ;;  %v2133_v40 = vadd.f32 %v2132_v46, %v2131_v37 }
 0x406   : > { %2421 = shalt.err (!%p2418_p3)
}
 0x407   : > { %2341 = dma.vmem_to_hbm [thread:$0]  (%p2562_p5), %s2159_s29, 16, %s2161_s30, %s2141_s19   ;;  %2134 = vst.msk [vmem:[%s206_s5] sm:$0x1] %vm2031_vm0, %v2133_v40 }
 0x408   : > { %s2145_s12 = scalar_lea.sflag [#allocation7], %s4210_s27  ;;  %s2436_s13 = sshra.s32 %s2174_s7, 4  ;;  %s2437_s13 = int_to_ptr.hbm [resolvable:$true] %s2436_s13 }
 0x409   : > { %s2438_s22 = scalar_lea.hbm %s2437_s13, 1  ;;  %s2442_s9 = scalar_lea.hbm %s4285_s4, 2 }
 0x40a   : > { %p2439_p4 = scmp.ne.s32.totalorder %s2437_s13, %s2438_s22  ;;  %p2443_p9 = scmp.lt.s32.totalorder %s2437_s13, %s4285_s4 }
 0x40b   : > { %p2444_p10 = scmp.lt.s32.totalorder %s2442_s9, %s2438_s22 }
 0x40c   : > { %p2440_p7 = pnand %p2439_p4, %p2562_p5 }
 0x40d   : > { %p2445_p11 = por %p2444_p10, %p2443_p9 }
 0x40e   : > { %p2441_p8 = pneg %p2440_p7 }
 0x410   : > { %p2446_p12 = pnand %p2445_p11, %p2441_p8 }
 0x412   : > { %2449 = shalt.err (!%p2446_p12)
}
 0x413   : > { %2342 = dma.vmem_to_hbm [thread:$0]  (%p2562_p5), %s2172_s6, 16, %s2174_s7, %s2145_s12  }
 0x414 PF: > { %p2352_p13 = scmp.ge.s32.totalorder %s2488_s18, 2  ;;  %s2193_s27 = sand.u32 1, %s2476_s15  }
 0x415   : > { %s2194_s29 = scalar_lea.sflag [#allocation5], %s2193_s27 }
 0x416   : > { %p2346_p0 = pnand %p2352_p13, %p2566_p6 }
 0x418   : > { %p2347_p1 = pneg %p2346_p0 }
 0x41a   : > { %2467 = dma.done.wait (%p2347_p1), %s2194_s29, 16  }
 0x41b   : > { %2469 = vsyncadd (%p2347_p1), %s2194_s29, 4294967280  ;;  %s2203_s30 = scalar_lea.sflag [#allocation7], %s2193_s27 }
 0x41c   : > { %2471 = dma.done.wait (%p2347_p1), %s2203_s30, 16  }
 0x41d   : > { %2473 = vsyncadd (%p2347_p1), %s2203_s30, 4294967280  ;;  %p18_p5 = scmp.ge.s32.totalorder %s2549_s21, 4   ;;  %s4494_s15 = smov %s2480_s16 }
 0x41e   : > { %s4495_s16 = smov %s2484_s17  ;;  %s4496_s17 = smov %s2560_s24 }
 0x41f   : > { %s4497_s18 = smov %s2549_s21  ;;  %20 = sbr.rel (!%p18_p5) target bundleno = 5 (0x5), region = 94 }
 0x424   :  { %2208 = vsyncpa [#allocation5], 1 }
 0x425   :  { %2210 = vsyncpa [#allocation5 + $0x1], 1 }
 0x426   :  { %2211 = vsyncpa [#allocation7], 1 }
 0x427   :  { %2213 = vsyncpa [#allocation7 + $0x1], 1 }

</bundles_post_ra>
